<compile_context>
chip_gen: v7x
topology: tpu7x:2x2x1
jax: 0.10.0
libtpu: 0.0.40
codegen_flags: <defaults>
</compile_context>

<pallas_src>
import functools
import math

import jax
import jax.numpy as jnp
from jax.experimental import pallas as pl
from jax.experimental.pallas import tpu as pltpu

# ----------------------- model hyper-parameters (from __init__) --------------
EMBED = 128          # n_embd
N_LAYER = 3
N_HEAD = 1           # single head -> head_dim == EMBED
N_INNER = 4 * EMBED  # 512
STATE_DIM = 30
ACT_DIM = 12
MAX_EP_LEN = 120     # embed_timestep vocabulary
N_POSITIONS = 1024   # GPT2 wpe table
LN_EPS = 1e-5

TOK_FEAT = 128       # padded [return(1) | state(30) | action(12)] feature lanes
HEAD_PAD = 128       # predict_action output padded to a full lane tile


def _round_up(x, m):
    return (x + m - 1) // m * m


# ------------------------------ fused kernel ---------------------------------

def _layernorm(x, g, b, eps):
    x = x.astype(jnp.float32)
    mu = jnp.mean(x, axis=-1, keepdims=True)
    var = jnp.mean(jnp.square(x - mu), axis=-1, keepdims=True)
    return (x - mu) * jax.lax.rsqrt(var + eps) * g + b


def _dt_fused_kernel(tok_ref, emb_w_ref, add_ref, wpe_ref,
                     eln_g_ref, eln_b_ref,
                     ln1_g_ref, ln1_b_ref, cattn_w_ref, cattn_b_ref,
                     cproj_w_ref, cproj_b_ref,
                     ln2_g_ref, ln2_b_ref, fc_w_ref, fc_b_ref,
                     mproj_w_ref, mproj_b_ref,
                     lnf_g_ref, lnf_b_ref, head_w_ref, head_b_ref,
                     out_ref, *, n_layer, l_actual, scale, eps):
    E = EMBED
    bf = jnp.bfloat16
    tok = tok_ref[0]                                    # (Lp, TOK_FEAT) f32
    Lp = tok.shape[0]

    # --- fused embedding: one matmul yields return/state/action embeddings
    # (token rows are already interleaved R,S,A per timestep).
    emb = jnp.dot(tok.astype(bf), emb_w_ref[...],
                  preferred_element_type=jnp.float32)   # (Lp, E)
    emb = emb + add_ref[...]                            # per-type bias + time emb
    h = _layernorm(emb, eln_g_ref[...], eln_b_ref[...], eps)   # embed_ln
    h = h + wpe_ref[...]                                # GPT2 learned positions

    # causal mask (attention_mask == all-ones -> causal only; padded keys off)
    row = jax.lax.broadcasted_iota(jnp.int32, (Lp, Lp), 0)
    col = jax.lax.broadcasted_iota(jnp.int32, (Lp, Lp), 1)
    mask = (col <= row) & (col < l_actual)

    for li in range(n_layer):
        # ----- attention block (pre-LN, single head, causal)
        x = _layernorm(h, ln1_g_ref[li], ln1_b_ref[li], eps)
        qkv = jnp.dot(x.astype(bf), cattn_w_ref[li],
                      preferred_element_type=jnp.float32) + cattn_b_ref[li]
        q = qkv[:, 0:E]
        k = qkv[:, E:2 * E]
        v = qkv[:, 2 * E:3 * E]
        s = jax.lax.dot_general(q.astype(bf), k.astype(bf),
                                (((1,), (1,)), ((), ())),
                                preferred_element_type=jnp.float32) * scale
        s = jnp.where(mask, s, -1e30)
        p = jnp.exp(s - jnp.max(s, axis=-1, keepdims=True))
        p = p * pl.reciprocal(jnp.sum(p, axis=-1, keepdims=True), approx=True)
        a = jnp.dot(p.astype(bf), v.astype(bf),
                    preferred_element_type=jnp.float32)
        a = jnp.dot(a.astype(bf), cproj_w_ref[li],
                    preferred_element_type=jnp.float32) + cproj_b_ref[li]
        h = h + a

        # ----- MLP block (relu, pre-LN)
        x = _layernorm(h, ln2_g_ref[li], ln2_b_ref[li], eps)
        m = jnp.dot(x.astype(bf), fc_w_ref[li],
                    preferred_element_type=jnp.float32) + fc_b_ref[li]
        m = jnp.maximum(m, 0.0)
        m = jnp.dot(m.astype(bf), mproj_w_ref[li],
                    preferred_element_type=jnp.float32) + mproj_b_ref[li]
        h = h + m

    # final LN + action head (computed lane-dense on all rows; state-token rows
    # are selected outside the kernel)
    h = _layernorm(h, lnf_g_ref[...], lnf_b_ref[...], eps)
    out = jnp.dot(h.astype(bf), head_w_ref[...],
                  preferred_element_type=jnp.float32) + head_b_ref[...]
    out_ref[0] = out.astype(out_ref.dtype)


# --------------------------- parameters (synthetic) ---------------------------

def init_params(key):
    """Raw per-module parameters, mirroring the torch module."""
    def normal(k, shape, scale=0.02):
        return scale * jax.random.normal(k, shape, dtype=jnp.float32)

    keys = iter(jax.random.split(key, 64))
    p = {}
    p['embed_timestep'] = normal(next(keys), (MAX_EP_LEN, EMBED))
    p['embed_return_w'] = normal(next(keys), (1, EMBED))
    p['embed_return_b'] = jnp.zeros((EMBED,), jnp.float32)
    p['embed_state_w'] = normal(next(keys), (STATE_DIM, EMBED))
    p['embed_state_b'] = jnp.zeros((EMBED,), jnp.float32)
    p['embed_action_w'] = normal(next(keys), (ACT_DIM, EMBED))
    p['embed_action_b'] = jnp.zeros((EMBED,), jnp.float32)
    p['embed_ln_g'] = jnp.ones((EMBED,), jnp.float32)
    p['embed_ln_b'] = jnp.zeros((EMBED,), jnp.float32)
    p['wpe'] = normal(next(keys), (N_POSITIONS, EMBED))
    layers = []
    for _ in range(N_LAYER):
        layers.append(dict(
            ln1_g=jnp.ones((EMBED,), jnp.float32),
            ln1_b=jnp.zeros((EMBED,), jnp.float32),
            c_attn_w=normal(next(keys), (EMBED, 3 * EMBED)),
            c_attn_b=jnp.zeros((3 * EMBED,), jnp.float32),
            c_proj_w=normal(next(keys), (EMBED, EMBED)),
            c_proj_b=jnp.zeros((EMBED,), jnp.float32),
            ln2_g=jnp.ones((EMBED,), jnp.float32),
            ln2_b=jnp.zeros((EMBED,), jnp.float32),
            fc_w=normal(next(keys), (EMBED, N_INNER)),
            fc_b=jnp.zeros((N_INNER,), jnp.float32),
            proj_w=normal(next(keys), (N_INNER, EMBED)),
            proj_b=jnp.zeros((EMBED,), jnp.float32),
        ))
    p['layers'] = layers
    p['lnf_g'] = jnp.ones((EMBED,), jnp.float32)
    p['lnf_b'] = jnp.zeros((EMBED,), jnp.float32)
    p['predict_action_w'] = normal(next(keys), (EMBED, ACT_DIM))
    p['predict_action_b'] = jnp.zeros((ACT_DIM,), jnp.float32)
    # present in the module, unused by the returned output:
    p['predict_state_w'] = normal(next(keys), (EMBED, STATE_DIM))
    p['predict_state_b'] = jnp.zeros((STATE_DIM,), jnp.float32)
    p['predict_return_w'] = normal(next(keys), (EMBED, 1))
    p['predict_return_b'] = jnp.zeros((1,), jnp.float32)
    return p


def pack_params(p):
    """One-time packing: fuse/stack/pad weights; MXU operands stored as bf16."""
    bf = jnp.bfloat16
    E = EMBED
    packed = {}
    packed['embed_timestep'] = p['embed_timestep']
    packed['wpe'] = p['wpe']

    # block-structured embedding weight: rows [return(0:1) | state(1:31) | action(31:43)]
    emb_w = jnp.zeros((TOK_FEAT, E), jnp.float32)
    emb_w = emb_w.at[0:1].set(p['embed_return_w'])
    emb_w = emb_w.at[1:1 + STATE_DIM].set(p['embed_state_w'])
    emb_w = emb_w.at[1 + STATE_DIM:1 + STATE_DIM + ACT_DIM].set(p['embed_action_w'])
    packed['emb_w'] = emb_w.astype(bf)
    packed['type_bias'] = jnp.stack(
        [p['embed_return_b'], p['embed_state_b'], p['embed_action_b']])   # (3, E)
    packed['eln_g'] = p['embed_ln_g'].reshape(1, E)
    packed['eln_b'] = p['embed_ln_b'].reshape(1, E)

    def stack(name):
        return jnp.stack([l[name] for l in p['layers']])
    packed['ln1_g'] = stack('ln1_g')[:, None, :]
    packed['ln1_b'] = stack('ln1_b')[:, None, :]
    packed['cattn_w'] = stack('c_attn_w').astype(bf)          # (NL, E, 3E)
    packed['cattn_b'] = stack('c_attn_b')[:, None, :]
    packed['cproj_w'] = stack('c_proj_w').astype(bf)          # (NL, E, E)
    packed['cproj_b'] = stack('c_proj_b')[:, None, :]
    packed['ln2_g'] = stack('ln2_g')[:, None, :]
    packed['ln2_b'] = stack('ln2_b')[:, None, :]
    packed['fc_w'] = stack('fc_w').astype(bf)                 # (NL, E, 4E)
    packed['fc_b'] = stack('fc_b')[:, None, :]
    packed['mproj_w'] = stack('proj_w').astype(bf)            # (NL, 4E, E)
    packed['mproj_b'] = stack('proj_b')[:, None, :]
    packed['lnf_g'] = p['lnf_g'].reshape(1, E)
    packed['lnf_b'] = p['lnf_b'].reshape(1, E)

    head_w = jnp.zeros((E, HEAD_PAD), jnp.float32).at[:, :ACT_DIM].set(p['predict_action_w'])
    head_b = jnp.zeros((1, HEAD_PAD), jnp.float32).at[0, :ACT_DIM].set(p['predict_action_b'])
    packed['head_w'] = head_w.astype(bf)
    packed['head_b'] = head_b
    return packed


# ------------------------------- forward pass ---------------------------------

def decision_transformer_forward(packed, observations, actions, returns, timesteps):
    """observations (B,T,30), actions (B,T,12), returns (B,T,1), timesteps (T,)
    -> action predictions (B, T, 12) from the state-token hidden states."""
    B, T, _ = observations.shape
    L = 3 * T
    Lp = _round_up(L, 16)       # bf16-friendly sublane multiple
    E = EMBED
    NL = N_LAYER

    # interleaved token features: per timestep the rows are [return, state, action],
    # each placed in its own column band so one matmul with packed['emb_w'] gives
    # the correct per-type embedding (tiny XLA glue, fused under jit).
    tok = jnp.zeros((B, T, 3, TOK_FEAT), jnp.float32)
    tok = tok.at[:, :, 0, 0:1].set(returns)
    tok = tok.at[:, :, 1, 1:1 + STATE_DIM].set(observations)
    tok = tok.at[:, :, 2, 1 + STATE_DIM:1 + STATE_DIM + ACT_DIM].set(actions)
    tok = tok.reshape(B, L, TOK_FEAT)
    tok = jnp.pad(tok, ((0, 0), (0, Lp - L), (0, 0)))

    # per-token additive term: per-type linear bias + timestep embedding (gather in XLA)
    time_emb = packed['embed_timestep'][timesteps]                      # (T, E)
    add = (time_emb[:, None, :] + packed['type_bias'][None, :, :]).reshape(L, E)
    add = jnp.pad(add, ((0, Lp - L), (0, 0)))
    wpe = jnp.pad(packed['wpe'][:L], ((0, Lp - L), (0, 0)))

    def bmap(b):
        return (b, 0, 0)

    def c2(b):
        return (0, 0)

    def c3(b):
        return (0, 0, 0)

    in_specs = [
        pl.BlockSpec((1, Lp, TOK_FEAT), bmap),        # tok
        pl.BlockSpec((TOK_FEAT, E), c2),              # emb_w
        pl.BlockSpec((Lp, E), c2),                    # add (type bias + time emb)
        pl.BlockSpec((Lp, E), c2),                    # wpe slice
        pl.BlockSpec((1, E), c2),                     # embed_ln gamma
        pl.BlockSpec((1, E), c2),                     # embed_ln beta
        pl.BlockSpec((NL, 1, E), c3),                 # ln1 gamma
        pl.BlockSpec((NL, 1, E), c3),                 # ln1 beta
        pl.BlockSpec((NL, E, 3 * E), c3),             # c_attn W
        pl.BlockSpec((NL, 1, 3 * E), c3),             # c_attn b
        pl.BlockSpec((NL, E, E), c3),                 # c_proj W
        pl.BlockSpec((NL, 1, E), c3),                 # c_proj b
        pl.BlockSpec((NL, 1, E), c3),                 # ln2 gamma
        pl.BlockSpec((NL, 1, E), c3),                 # ln2 beta
        pl.BlockSpec((NL, E, N_INNER), c3),           # mlp fc W
        pl.BlockSpec((NL, 1, N_INNER), c3),           # mlp fc b
        pl.BlockSpec((NL, N_INNER, E), c3),           # mlp proj W
        pl.BlockSpec((NL, 1, E), c3),                 # mlp proj b
        pl.BlockSpec((1, E), c2),                     # ln_f gamma
        pl.BlockSpec((1, E), c2),                     # ln_f beta
        pl.BlockSpec((E, HEAD_PAD), c2),              # predict_action W (padded)
        pl.BlockSpec((1, HEAD_PAD), c2),              # predict_action b (padded)
    ]
    out_spec = pl.BlockSpec((1, Lp, HEAD_PAD), bmap)

    kernel = functools.partial(_dt_fused_kernel, n_layer=NL, l_actual=L,
                               scale=1.0 / math.sqrt(E), eps=LN_EPS)

    out = pl.pallas_call(
        kernel,
        out_shape=jax.ShapeDtypeStruct((B, Lp, HEAD_PAD), jnp.float32),
        grid=(B,),
        in_specs=in_specs,
        out_specs=out_spec,
        compiler_params=pltpu.CompilerParams(
            dimension_semantics=("parallel",),        # batch across TCs on v7x
            vmem_limit_bytes=64 * 1024 * 1024),
    )(tok, packed['emb_w'], add, wpe,
      packed['eln_g'], packed['eln_b'],
      packed['ln1_g'], packed['ln1_b'], packed['cattn_w'], packed['cattn_b'],
      packed['cproj_w'], packed['cproj_b'],
      packed['ln2_g'], packed['ln2_b'], packed['fc_w'], packed['fc_b'],
      packed['mproj_w'], packed['mproj_b'],
      packed['lnf_g'], packed['lnf_b'], packed['head_w'], packed['head_b'])

    # action predictions come from the state-token rows (sequence index 3t+1)
    return out[:, 1:L:3, :ACT_DIM]


# ----------------------------------- main --------------------------------------

if __name__ == "__main__":
    key = jax.random.PRNGKey(0)
    k_params, k_obs, k_act, k_ret = jax.random.split(key, 4)

    raw_params = init_params(k_params)
    packed_params = pack_params(raw_params)            # one-time weight packing

    B, T = 2, 8
    observations = jax.random.normal(k_obs, (B, T, STATE_DIM), dtype=jnp.float32)
    actions = jax.random.normal(k_act, (B, T, ACT_DIM), dtype=jnp.float32)
    returns = jax.random.normal(k_ret, (B, T, 1), dtype=jnp.float32)
    timesteps = jnp.arange(T, dtype=jnp.int32)

    forward = jax.jit(decision_transformer_forward)
    out = forward(packed_params, observations, actions, returns, timesteps)
    out = jax.block_until_ready(out)
    assert out.shape == (B, T, ACT_DIM) and out.dtype == jnp.float32
    print("KERNEL_OK")
</pallas_src>

<mosaic_0001>
module attributes {stable_mosaic.version = 11 : i64} {
  func.func @_dt_fused_kernel(%arg0: i32, %arg1: memref<1x32x128xf32, #tpu.memory_space<vmem>>, %arg2: memref<128x128xbf16, #tpu.memory_space<vmem>>, %arg3: memref<32x128xf32, #tpu.memory_space<vmem>>, %arg4: memref<32x128xf32, #tpu.memory_space<vmem>>, %arg5: memref<1x128xf32, #tpu.memory_space<vmem>>, %arg6: memref<1x128xf32, #tpu.memory_space<vmem>>, %arg7: memref<3x1x128xf32, #tpu.memory_space<vmem>>, %arg8: memref<3x1x128xf32, #tpu.memory_space<vmem>>, %arg9: memref<3x128x384xbf16, #tpu.memory_space<vmem>>, %arg10: memref<3x1x384xf32, #tpu.memory_space<vmem>>, %arg11: memref<3x128x128xbf16, #tpu.memory_space<vmem>>, %arg12: memref<3x1x128xf32, #tpu.memory_space<vmem>>, %arg13: memref<3x1x128xf32, #tpu.memory_space<vmem>>, %arg14: memref<3x1x128xf32, #tpu.memory_space<vmem>>, %arg15: memref<3x128x512xbf16, #tpu.memory_space<vmem>>, %arg16: memref<3x1x512xf32, #tpu.memory_space<vmem>>, %arg17: memref<3x512x128xbf16, #tpu.memory_space<vmem>>, %arg18: memref<3x1x128xf32, #tpu.memory_space<vmem>>, %arg19: memref<1x128xf32, #tpu.memory_space<vmem>>, %arg20: memref<1x128xf32, #tpu.memory_space<vmem>>, %arg21: memref<128x128xbf16, #tpu.memory_space<vmem>>, %arg22: memref<1x128xf32, #tpu.memory_space<vmem>>, %arg23: memref<1x32x128xf32, #tpu.memory_space<vmem>>) attributes {dimension_semantics = [#tpu.dimension_semantics<parallel>], iteration_bounds = array<i64: 2>, scalar_prefetch = 0 : i64, scratch_operands = 0 : i64, tpu.core_type = #tpu.core_type<tc>, window_params = [{transform_indices = @transform_0, window_bounds = array<i64: 1, 32, 128>}, {pipeline_mode = #tpu.pipeline_mode<synchronous>, transform_indices = @transform_1, window_bounds = array<i64: 128, 128>}, {pipeline_mode = #tpu.pipeline_mode<synchronous>, transform_indices = @transform_2, window_bounds = array<i64: 32, 128>}, {pipeline_mode = #tpu.pipeline_mode<synchronous>, transform_indices = @transform_3, window_bounds = array<i64: 32, 128>}, {pipeline_mode = #tpu.pipeline_mode<synchronous>, transform_indices = @transform_4, window_bounds = array<i64: 1, 128>}, {pipeline_mode = #tpu.pipeline_mode<synchronous>, transform_indices = @transform_5, window_bounds = array<i64: 1, 128>}, {pipeline_mode = #tpu.pipeline_mode<synchronous>, transform_indices = @transform_6, window_bounds = array<i64: 3, 1, 128>}, {pipeline_mode = #tpu.pipeline_mode<synchronous>, transform_indices = @transform_7, window_bounds = array<i64: 3, 1, 128>}, {pipeline_mode = #tpu.pipeline_mode<synchronous>, transform_indices = @transform_8, window_bounds = array<i64: 3, 128, 384>}, {pipeline_mode = #tpu.pipeline_mode<synchronous>, transform_indices = @transform_9, window_bounds = array<i64: 3, 1, 384>}, {pipeline_mode = #tpu.pipeline_mode<synchronous>, transform_indices = @transform_10, window_bounds = array<i64: 3, 128, 128>}, {pipeline_mode = #tpu.pipeline_mode<synchronous>, transform_indices = @transform_11, window_bounds = array<i64: 3, 1, 128>}, {pipeline_mode = #tpu.pipeline_mode<synchronous>, transform_indices = @transform_12, window_bounds = array<i64: 3, 1, 128>}, {pipeline_mode = #tpu.pipeline_mode<synchronous>, transform_indices = @transform_13, window_bounds = array<i64: 3, 1, 128>}, {pipeline_mode = #tpu.pipeline_mode<synchronous>, transform_indices = @transform_14, window_bounds = array<i64: 3, 128, 512>}, {pipeline_mode = #tpu.pipeline_mode<synchronous>, transform_indices = @transform_15, window_bounds = array<i64: 3, 1, 512>}, {pipeline_mode = #tpu.pipeline_mode<synchronous>, transform_indices = @transform_16, window_bounds = array<i64: 3, 512, 128>}, {pipeline_mode = #tpu.pipeline_mode<synchronous>, transform_indices = @transform_17, window_bounds = array<i64: 3, 1, 128>}, {pipeline_mode = #tpu.pipeline_mode<synchronous>, transform_indices = @transform_18, window_bounds = array<i64: 1, 128>}, {pipeline_mode = #tpu.pipeline_mode<synchronous>, transform_indices = @transform_19, window_bounds = array<i64: 1, 128>}, {pipeline_mode = #tpu.pipeline_mode<synchronous>, transform_indices = @transform_20, window_bounds = array<i64: 128, 128>}, {pipeline_mode = #tpu.pipeline_mode<synchronous>, transform_indices = @transform_21, window_bounds = array<i64: 1, 128>}, {transform_indices = @transform_22, window_bounds = array<i64: 1, 32, 128>}]} {
    %c0 = arith.constant 0 : index
    %c0_0 = arith.constant 0 : index
    %c0_1 = arith.constant 0 : index
    %0 = vector.load %arg1[%c0, %c0_0, %c0_1] : memref<1x32x128xf32, #tpu.memory_space<vmem>>, vector<1x32x128xf32>
    %1 = vector.shape_cast %0 : vector<1x32x128xf32> to vector<32x128xf32>
    %2 = arith.truncf %1 : vector<32x128xf32> to vector<32x128xbf16>
    %c0_2 = arith.constant 0 : index
    %c0_3 = arith.constant 0 : index
    %3 = vector.load %arg2[%c0_2, %c0_3] : memref<128x128xbf16, #tpu.memory_space<vmem>>, vector<128x128xbf16>
    %cst = arith.constant dense<0.000000e+00> : vector<32x128xf32>
    %4 = tpu.matmul %2, %3, %cst {dimension_numbers = #tpu.dot_dimension_numbers<[1], [0], [0], [1], [0, 0, 1, 1], [], []>} : vector<32x128xbf16>, vector<128x128xbf16>, vector<32x128xf32> -> vector<32x128xf32>
    %c0_4 = arith.constant 0 : index
    %c0_5 = arith.constant 0 : index
    %5 = vector.load %arg3[%c0_4, %c0_5] : memref<32x128xf32, #tpu.memory_space<vmem>>, vector<32x128xf32>
    %6 = arith.addf %4, %5 : vector<32x128xf32>
    %c0_6 = arith.constant 0 : index
    %c0_7 = arith.constant 0 : index
    %7 = vector.load %arg5[%c0_6, %c0_7] : memref<1x128xf32, #tpu.memory_space<vmem>>, vector<1x128xf32>
    %c0_8 = arith.constant 0 : index
    %c0_9 = arith.constant 0 : index
    %8 = vector.load %arg6[%c0_8, %c0_9] : memref<1x128xf32, #tpu.memory_space<vmem>>, vector<1x128xf32>
    %cst_10 = arith.constant dense<0.000000e+00> : vector<32xf32>
    %9 = vector.multi_reduction <add>, %6, %cst_10 [1] : vector<32x128xf32> to vector<32xf32>
    %10 = vector.shape_cast %9 : vector<32xf32> to vector<32x1xf32>
    %cst_11 = arith.constant 1.280000e+02 : f32
    %11 = vector.broadcast %cst_11 : f32 to vector<32x1xf32>
    %12 = arith.divf %10, %11 : vector<32x1xf32>
    %13 = vector.broadcast %12 : vector<32x1xf32> to vector<32x128xf32>
    %14 = arith.subf %6, %13 : vector<32x128xf32>
    %15 = arith.mulf %14, %14 : vector<32x128xf32>
    %cst_12 = arith.constant dense<0.000000e+00> : vector<32xf32>
    %16 = vector.multi_reduction <add>, %15, %cst_12 [1] : vector<32x128xf32> to vector<32xf32>
    %17 = vector.shape_cast %16 : vector<32xf32> to vector<32x1xf32>
    %cst_13 = arith.constant 1.280000e+02 : f32
    %18 = vector.broadcast %cst_13 : f32 to vector<32x1xf32>
    %19 = arith.divf %17, %18 : vector<32x1xf32>
    %20 = vector.broadcast %12 : vector<32x1xf32> to vector<32x128xf32>
    %21 = arith.subf %6, %20 : vector<32x128xf32>
    %cst_14 = arith.constant 9.99999974E-6 : f32
    %22 = vector.broadcast %cst_14 : f32 to vector<32x1xf32>
    %23 = arith.addf %19, %22 : vector<32x1xf32>
    %24 = math.rsqrt %23 : vector<32x1xf32>
    %25 = vector.broadcast %24 : vector<32x1xf32> to vector<32x128xf32>
    %26 = arith.mulf %21, %25 : vector<32x128xf32>
    %27 = vector.broadcast %7 : vector<1x128xf32> to vector<32x128xf32>
    %28 = arith.mulf %26, %27 : vector<32x128xf32>
    %29 = vector.broadcast %8 : vector<1x128xf32> to vector<32x128xf32>
    %30 = arith.addf %28, %29 : vector<32x128xf32>
    %c0_15 = arith.constant 0 : index
    %c0_16 = arith.constant 0 : index
    %31 = vector.load %arg4[%c0_15, %c0_16] : memref<32x128xf32, #tpu.memory_space<vmem>>, vector<32x128xf32>
    %32 = arith.addf %30, %31 : vector<32x128xf32>
    %33 = tpu.iota {dimensions = array<i32: 0>} : vector<32x32xi32>
    %34 = tpu.iota {dimensions = array<i32: 1>} : vector<32x32xi32>
    %35 = arith.cmpi sle, %34, %33 : vector<32x32xi32>
    %c24_i32 = arith.constant 24 : i32
    %36 = vector.broadcast %c24_i32 : i32 to vector<32x32xi32>
    %37 = arith.cmpi slt, %34, %36 : vector<32x32xi32>
    %38 = arith.andi %35, %37 : vector<32x32xi1>
    %c0_17 = arith.constant 0 : index
    %c0_18 = arith.constant 0 : index
    %c0_19 = arith.constant 0 : index
    %39 = vector.load %arg7[%c0_17, %c0_18, %c0_19] : memref<3x1x128xf32, #tpu.memory_space<vmem>>, vector<1x1x128xf32>
    %40 = vector.shape_cast %39 : vector<1x1x128xf32> to vector<1x128xf32>
    %c0_20 = arith.constant 0 : index
    %c0_21 = arith.constant 0 : index
    %c0_22 = arith.constant 0 : index
    %41 = vector.load %arg8[%c0_20, %c0_21, %c0_22] : memref<3x1x128xf32, #tpu.memory_space<vmem>>, vector<1x1x128xf32>
    %42 = vector.shape_cast %41 : vector<1x1x128xf32> to vector<1x128xf32>
    %cst_23 = arith.constant dense<0.000000e+00> : vector<32xf32>
    %43 = vector.multi_reduction <add>, %32, %cst_23 [1] : vector<32x128xf32> to vector<32xf32>
    %44 = vector.shape_cast %43 : vector<32xf32> to vector<32x1xf32>
    %cst_24 = arith.constant 1.280000e+02 : f32
    %45 = vector.broadcast %cst_24 : f32 to vector<32x1xf32>
    %46 = arith.divf %44, %45 : vector<32x1xf32>
    %47 = vector.broadcast %46 : vector<32x1xf32> to vector<32x128xf32>
    %48 = arith.subf %32, %47 : vector<32x128xf32>
    %49 = arith.mulf %48, %48 : vector<32x128xf32>
    %cst_25 = arith.constant dense<0.000000e+00> : vector<32xf32>
    %50 = vector.multi_reduction <add>, %49, %cst_25 [1] : vector<32x128xf32> to vector<32xf32>
    %51 = vector.shape_cast %50 : vector<32xf32> to vector<32x1xf32>
    %cst_26 = arith.constant 1.280000e+02 : f32
    %52 = vector.broadcast %cst_26 : f32 to vector<32x1xf32>
    %53 = arith.divf %51, %52 : vector<32x1xf32>
    %54 = vector.broadcast %46 : vector<32x1xf32> to vector<32x128xf32>
    %55 = arith.subf %32, %54 : vector<32x128xf32>
    %cst_27 = arith.constant 9.99999974E-6 : f32
    %56 = vector.broadcast %cst_27 : f32 to vector<32x1xf32>
    %57 = arith.addf %53, %56 : vector<32x1xf32>
    %58 = math.rsqrt %57 : vector<32x1xf32>
    %59 = vector.broadcast %58 : vector<32x1xf32> to vector<32x128xf32>
    %60 = arith.mulf %55, %59 : vector<32x128xf32>
    %61 = vector.broadcast %40 : vector<1x128xf32> to vector<32x128xf32>
    %62 = arith.mulf %60, %61 : vector<32x128xf32>
    %63 = vector.broadcast %42 : vector<1x128xf32> to vector<32x128xf32>
    %64 = arith.addf %62, %63 : vector<32x128xf32>
    %65 = arith.truncf %64 : vector<32x128xf32> to vector<32x128xbf16>
    %c0_28 = arith.constant 0 : index
    %c0_29 = arith.constant 0 : index
    %c0_30 = arith.constant 0 : index
    %66 = vector.load %arg9[%c0_28, %c0_29, %c0_30] : memref<3x128x384xbf16, #tpu.memory_space<vmem>>, vector<1x128x384xbf16>
    %67 = vector.shape_cast %66 : vector<1x128x384xbf16> to vector<128x384xbf16>
    %cst_31 = arith.constant dense<0.000000e+00> : vector<32x384xf32>
    %68 = tpu.matmul %65, %67, %cst_31 {dimension_numbers = #tpu.dot_dimension_numbers<[1], [0], [0], [1], [0, 0, 1, 1], [], []>} : vector<32x128xbf16>, vector<128x384xbf16>, vector<32x384xf32> -> vector<32x384xf32>
    %c0_32 = arith.constant 0 : index
    %c0_33 = arith.constant 0 : index
    %c0_34 = arith.constant 0 : index
    %69 = vector.load %arg10[%c0_32, %c0_33, %c0_34] : memref<3x1x384xf32, #tpu.memory_space<vmem>>, vector<1x1x384xf32>
    %70 = vector.shape_cast %69 : vector<1x1x384xf32> to vector<1x384xf32>
    %71 = vector.broadcast %70 : vector<1x384xf32> to vector<32x384xf32>
    %72 = arith.addf %68, %71 : vector<32x384xf32>
    %73 = vector.extract_strided_slice %72 {offsets = [0, 0], sizes = [32, 128], strides = [1, 1]} : vector<32x384xf32> to vector<32x128xf32>
    %74 = vector.extract_strided_slice %72 {offsets = [0, 128], sizes = [32, 128], strides = [1, 1]} : vector<32x384xf32> to vector<32x128xf32>
    %75 = vector.extract_strided_slice %72 {offsets = [0, 256], sizes = [32, 128], strides = [1, 1]} : vector<32x384xf32> to vector<32x128xf32>
    %76 = arith.truncf %73 : vector<32x128xf32> to vector<32x128xbf16>
    %77 = arith.truncf %74 : vector<32x128xf32> to vector<32x128xbf16>
    %cst_35 = arith.constant dense<0.000000e+00> : vector<32x32xf32>
    %78 = tpu.matmul %76, %77, %cst_35 {dimension_numbers = #tpu.dot_dimension_numbers<[1], [1], [0], [0], [0, 0, 1, 0], [], []>} : vector<32x128xbf16>, vector<32x128xbf16>, vector<32x32xf32> -> vector<32x32xf32>
    %cst_36 = arith.constant 0.0883883461 : f32
    %79 = vector.broadcast %cst_36 : f32 to vector<32x32xf32>
    %80 = arith.mulf %78, %79 : vector<32x32xf32>
    %cst_37 = arith.constant -1.000000e+30 : f32
    %81 = vector.broadcast %cst_37 : f32 to vector<32x32xf32>
    %82 = arith.select %38, %80, %81 : vector<32x32xi1>, vector<32x32xf32>
    %cst_38 = arith.constant dense<0xFF800000> : vector<32xf32>
    %83 = vector.multi_reduction <maximumf>, %82, %cst_38 [1] : vector<32x32xf32> to vector<32xf32>
    %84 = vector.shape_cast %83 : vector<32xf32> to vector<32x1xf32>
    %85 = vector.broadcast %84 : vector<32x1xf32> to vector<32x32xf32>
    %86 = arith.subf %82, %85 : vector<32x32xf32>
    %87 = math.exp %86 : vector<32x32xf32>
    %cst_39 = arith.constant dense<0.000000e+00> : vector<32xf32>
    %88 = vector.multi_reduction <add>, %87, %cst_39 [1] : vector<32x32xf32> to vector<32xf32>
    %89 = vector.shape_cast %88 : vector<32xf32> to vector<32x1xf32>
    %90 = tpu.reciprocal %89 {approx = true} : vector<32x1xf32> -> vector<32x1xf32>
    %91 = vector.broadcast %90 : vector<32x1xf32> to vector<32x32xf32>
    %92 = arith.mulf %87, %91 : vector<32x32xf32>
    %93 = arith.truncf %92 : vector<32x32xf32> to vector<32x32xbf16>
    %94 = arith.truncf %75 : vector<32x128xf32> to vector<32x128xbf16>
    %cst_40 = arith.constant dense<0.000000e+00> : vector<32x128xf32>
    %95 = tpu.matmul %93, %94, %cst_40 {dimension_numbers = #tpu.dot_dimension_numbers<[1], [0], [0], [1], [0, 0, 1, 1], [], []>} : vector<32x32xbf16>, vector<32x128xbf16>, vector<32x128xf32> -> vector<32x128xf32>
    %96 = arith.truncf %95 : vector<32x128xf32> to vector<32x128xbf16>
    %c0_41 = arith.constant 0 : index
    %c0_42 = arith.constant 0 : index
    %c0_43 = arith.constant 0 : index
    %97 = vector.load %arg11[%c0_41, %c0_42, %c0_43] : memref<3x128x128xbf16, #tpu.memory_space<vmem>>, vector<1x128x128xbf16>
    %98 = vector.shape_cast %97 : vector<1x128x128xbf16> to vector<128x128xbf16>
    %cst_44 = arith.constant dense<0.000000e+00> : vector<32x128xf32>
    %99 = tpu.matmul %96, %98, %cst_44 {dimension_numbers = #tpu.dot_dimension_numbers<[1], [0], [0], [1], [0, 0, 1, 1], [], []>} : vector<32x128xbf16>, vector<128x128xbf16>, vector<32x128xf32> -> vector<32x128xf32>
    %c0_45 = arith.constant 0 : index
    %c0_46 = arith.constant 0 : index
    %c0_47 = arith.constant 0 : index
    %100 = vector.load %arg12[%c0_45, %c0_46, %c0_47] : memref<3x1x128xf32, #tpu.memory_space<vmem>>, vector<1x1x128xf32>
    %101 = vector.shape_cast %100 : vector<1x1x128xf32> to vector<1x128xf32>
    %102 = vector.broadcast %101 : vector<1x128xf32> to vector<32x128xf32>
    %103 = arith.addf %99, %102 : vector<32x128xf32>
    %104 = arith.addf %32, %103 : vector<32x128xf32>
    %c0_48 = arith.constant 0 : index
    %c0_49 = arith.constant 0 : index
    %c0_50 = arith.constant 0 : index
    %105 = vector.load %arg13[%c0_48, %c0_49, %c0_50] : memref<3x1x128xf32, #tpu.memory_space<vmem>>, vector<1x1x128xf32>
    %106 = vector.shape_cast %105 : vector<1x1x128xf32> to vector<1x128xf32>
    %c0_51 = arith.constant 0 : index
    %c0_52 = arith.constant 0 : index
    %c0_53 = arith.constant 0 : index
    %107 = vector.load %arg14[%c0_51, %c0_52, %c0_53] : memref<3x1x128xf32, #tpu.memory_space<vmem>>, vector<1x1x128xf32>
    %108 = vector.shape_cast %107 : vector<1x1x128xf32> to vector<1x128xf32>
    %cst_54 = arith.constant dense<0.000000e+00> : vector<32xf32>
    %109 = vector.multi_reduction <add>, %104, %cst_54 [1] : vector<32x128xf32> to vector<32xf32>
    %110 = vector.shape_cast %109 : vector<32xf32> to vector<32x1xf32>
    %cst_55 = arith.constant 1.280000e+02 : f32
    %111 = vector.broadcast %cst_55 : f32 to vector<32x1xf32>
    %112 = arith.divf %110, %111 : vector<32x1xf32>
    %113 = vector.broadcast %112 : vector<32x1xf32> to vector<32x128xf32>
    %114 = arith.subf %104, %113 : vector<32x128xf32>
    %115 = arith.mulf %114, %114 : vector<32x128xf32>
    %cst_56 = arith.constant dense<0.000000e+00> : vector<32xf32>
    %116 = vector.multi_reduction <add>, %115, %cst_56 [1] : vector<32x128xf32> to vector<32xf32>
    %117 = vector.shape_cast %116 : vector<32xf32> to vector<32x1xf32>
    %cst_57 = arith.constant 1.280000e+02 : f32
    %118 = vector.broadcast %cst_57 : f32 to vector<32x1xf32>
    %119 = arith.divf %117, %118 : vector<32x1xf32>
    %120 = vector.broadcast %112 : vector<32x1xf32> to vector<32x128xf32>
    %121 = arith.subf %104, %120 : vector<32x128xf32>
    %cst_58 = arith.constant 9.99999974E-6 : f32
    %122 = vector.broadcast %cst_58 : f32 to vector<32x1xf32>
    %123 = arith.addf %119, %122 : vector<32x1xf32>
    %124 = math.rsqrt %123 : vector<32x1xf32>
    %125 = vector.broadcast %124 : vector<32x1xf32> to vector<32x128xf32>
    %126 = arith.mulf %121, %125 : vector<32x128xf32>
    %127 = vector.broadcast %106 : vector<1x128xf32> to vector<32x128xf32>
    %128 = arith.mulf %126, %127 : vector<32x128xf32>
    %129 = vector.broadcast %108 : vector<1x128xf32> to vector<32x128xf32>
    %130 = arith.addf %128, %129 : vector<32x128xf32>
    %131 = arith.truncf %130 : vector<32x128xf32> to vector<32x128xbf16>
    %c0_59 = arith.constant 0 : index
    %c0_60 = arith.constant 0 : index
    %c0_61 = arith.constant 0 : index
    %132 = vector.load %arg15[%c0_59, %c0_60, %c0_61] : memref<3x128x512xbf16, #tpu.memory_space<vmem>>, vector<1x128x512xbf16>
    %133 = vector.shape_cast %132 : vector<1x128x512xbf16> to vector<128x512xbf16>
    %cst_62 = arith.constant dense<0.000000e+00> : vector<32x512xf32>
    %134 = tpu.matmul %131, %133, %cst_62 {dimension_numbers = #tpu.dot_dimension_numbers<[1], [0], [0], [1], [0, 0, 1, 1], [], []>} : vector<32x128xbf16>, vector<128x512xbf16>, vector<32x512xf32> -> vector<32x512xf32>
    %c0_63 = arith.constant 0 : index
    %c0_64 = arith.constant 0 : index
    %c0_65 = arith.constant 0 : index
    %135 = vector.load %arg16[%c0_63, %c0_64, %c0_65] : memref<3x1x512xf32, #tpu.memory_space<vmem>>, vector<1x1x512xf32>
    %136 = vector.shape_cast %135 : vector<1x1x512xf32> to vector<1x512xf32>
    %137 = vector.broadcast %136 : vector<1x512xf32> to vector<32x512xf32>
    %138 = arith.addf %134, %137 : vector<32x512xf32>
    %cst_66 = arith.constant 0.000000e+00 : f32
    %139 = vector.broadcast %cst_66 : f32 to vector<32x512xf32>
    %140 = arith.maximumf %138, %139 : vector<32x512xf32>
    %141 = arith.truncf %140 : vector<32x512xf32> to vector<32x512xbf16>
    %c0_67 = arith.constant 0 : index
    %c0_68 = arith.constant 0 : index
    %c0_69 = arith.constant 0 : index
    %142 = vector.load %arg17[%c0_67, %c0_68, %c0_69] : memref<3x512x128xbf16, #tpu.memory_space<vmem>>, vector<1x512x128xbf16>
    %143 = vector.shape_cast %142 : vector<1x512x128xbf16> to vector<512x128xbf16>
    %cst_70 = arith.constant dense<0.000000e+00> : vector<32x128xf32>
    %144 = tpu.matmul %141, %143, %cst_70 {dimension_numbers = #tpu.dot_dimension_numbers<[1], [0], [0], [1], [0, 0, 1, 1], [], []>} : vector<32x512xbf16>, vector<512x128xbf16>, vector<32x128xf32> -> vector<32x128xf32>
    %c0_71 = arith.constant 0 : index
    %c0_72 = arith.constant 0 : index
    %c0_73 = arith.constant 0 : index
    %145 = vector.load %arg18[%c0_71, %c0_72, %c0_73] : memref<3x1x128xf32, #tpu.memory_space<vmem>>, vector<1x1x128xf32>
    %146 = vector.shape_cast %145 : vector<1x1x128xf32> to vector<1x128xf32>
    %147 = vector.broadcast %146 : vector<1x128xf32> to vector<32x128xf32>
    %148 = arith.addf %144, %147 : vector<32x128xf32>
    %149 = arith.addf %104, %148 : vector<32x128xf32>
    %c1 = arith.constant 1 : index
    %c0_74 = arith.constant 0 : index
    %c0_75 = arith.constant 0 : index
    %150 = vector.load %arg7[%c1, %c0_74, %c0_75] : memref<3x1x128xf32, #tpu.memory_space<vmem>>, vector<1x1x128xf32>
    %151 = vector.shape_cast %150 : vector<1x1x128xf32> to vector<1x128xf32>
    %c1_76 = arith.constant 1 : index
    %c0_77 = arith.constant 0 : index
    %c0_78 = arith.constant 0 : index
    %152 = vector.load %arg8[%c1_76, %c0_77, %c0_78] : memref<3x1x128xf32, #tpu.memory_space<vmem>>, vector<1x1x128xf32>
    %153 = vector.shape_cast %152 : vector<1x1x128xf32> to vector<1x128xf32>
    %cst_79 = arith.constant dense<0.000000e+00> : vector<32xf32>
    %154 = vector.multi_reduction <add>, %149, %cst_79 [1] : vector<32x128xf32> to vector<32xf32>
    %155 = vector.shape_cast %154 : vector<32xf32> to vector<32x1xf32>
    %cst_80 = arith.constant 1.280000e+02 : f32
    %156 = vector.broadcast %cst_80 : f32 to vector<32x1xf32>
    %157 = arith.divf %155, %156 : vector<32x1xf32>
    %158 = vector.broadcast %157 : vector<32x1xf32> to vector<32x128xf32>
    %159 = arith.subf %149, %158 : vector<32x128xf32>
    %160 = arith.mulf %159, %159 : vector<32x128xf32>
    %cst_81 = arith.constant dense<0.000000e+00> : vector<32xf32>
    %161 = vector.multi_reduction <add>, %160, %cst_81 [1] : vector<32x128xf32> to vector<32xf32>
    %162 = vector.shape_cast %161 : vector<32xf32> to vector<32x1xf32>
    %cst_82 = arith.constant 1.280000e+02 : f32
    %163 = vector.broadcast %cst_82 : f32 to vector<32x1xf32>
    %164 = arith.divf %162, %163 : vector<32x1xf32>
    %165 = vector.broadcast %157 : vector<32x1xf32> to vector<32x128xf32>
    %166 = arith.subf %149, %165 : vector<32x128xf32>
    %cst_83 = arith.constant 9.99999974E-6 : f32
    %167 = vector.broadcast %cst_83 : f32 to vector<32x1xf32>
    %168 = arith.addf %164, %167 : vector<32x1xf32>
    %169 = math.rsqrt %168 : vector<32x1xf32>
    %170 = vector.broadcast %169 : vector<32x1xf32> to vector<32x128xf32>
    %171 = arith.mulf %166, %170 : vector<32x128xf32>
    %172 = vector.broadcast %151 : vector<1x128xf32> to vector<32x128xf32>
    %173 = arith.mulf %171, %172 : vector<32x128xf32>
    %174 = vector.broadcast %153 : vector<1x128xf32> to vector<32x128xf32>
    %175 = arith.addf %173, %174 : vector<32x128xf32>
    %176 = arith.truncf %175 : vector<32x128xf32> to vector<32x128xbf16>
    %c1_84 = arith.constant 1 : index
    %c0_85 = arith.constant 0 : index
    %c0_86 = arith.constant 0 : index
    %177 = vector.load %arg9[%c1_84, %c0_85, %c0_86] : memref<3x128x384xbf16, #tpu.memory_space<vmem>>, vector<1x128x384xbf16>
    %178 = vector.shape_cast %177 : vector<1x128x384xbf16> to vector<128x384xbf16>
    %cst_87 = arith.constant dense<0.000000e+00> : vector<32x384xf32>
    %179 = tpu.matmul %176, %178, %cst_87 {dimension_numbers = #tpu.dot_dimension_numbers<[1], [0], [0], [1], [0, 0, 1, 1], [], []>} : vector<32x128xbf16>, vector<128x384xbf16>, vector<32x384xf32> -> vector<32x384xf32>
    %c1_88 = arith.constant 1 : index
    %c0_89 = arith.constant 0 : index
    %c0_90 = arith.constant 0 : index
    %180 = vector.load %arg10[%c1_88, %c0_89, %c0_90] : memref<3x1x384xf32, #tpu.memory_space<vmem>>, vector<1x1x384xf32>
    %181 = vector.shape_cast %180 : vector<1x1x384xf32> to vector<1x384xf32>
    %182 = vector.broadcast %181 : vector<1x384xf32> to vector<32x384xf32>
    %183 = arith.addf %179, %182 : vector<32x384xf32>
    %184 = vector.extract_strided_slice %183 {offsets = [0, 0], sizes = [32, 128], strides = [1, 1]} : vector<32x384xf32> to vector<32x128xf32>
    %185 = vector.extract_strided_slice %183 {offsets = [0, 128], sizes = [32, 128], strides = [1, 1]} : vector<32x384xf32> to vector<32x128xf32>
    %186 = vector.extract_strided_slice %183 {offsets = [0, 256], sizes = [32, 128], strides = [1, 1]} : vector<32x384xf32> to vector<32x128xf32>
    %187 = arith.truncf %184 : vector<32x128xf32> to vector<32x128xbf16>
    %188 = arith.truncf %185 : vector<32x128xf32> to vector<32x128xbf16>
    %cst_91 = arith.constant dense<0.000000e+00> : vector<32x32xf32>
    %189 = tpu.matmul %187, %188, %cst_91 {dimension_numbers = #tpu.dot_dimension_numbers<[1], [1], [0], [0], [0, 0, 1, 0], [], []>} : vector<32x128xbf16>, vector<32x128xbf16>, vector<32x32xf32> -> vector<32x32xf32>
    %cst_92 = arith.constant 0.0883883461 : f32
    %190 = vector.broadcast %cst_92 : f32 to vector<32x32xf32>
    %191 = arith.mulf %189, %190 : vector<32x32xf32>
    %cst_93 = arith.constant -1.000000e+30 : f32
    %192 = vector.broadcast %cst_93 : f32 to vector<32x32xf32>
    %193 = arith.select %38, %191, %192 : vector<32x32xi1>, vector<32x32xf32>
    %cst_94 = arith.constant dense<0xFF800000> : vector<32xf32>
    %194 = vector.multi_reduction <maximumf>, %193, %cst_94 [1] : vector<32x32xf32> to vector<32xf32>
    %195 = vector.shape_cast %194 : vector<32xf32> to vector<32x1xf32>
    %196 = vector.broadcast %195 : vector<32x1xf32> to vector<32x32xf32>
    %197 = arith.subf %193, %196 : vector<32x32xf32>
    %198 = math.exp %197 : vector<32x32xf32>
    %cst_95 = arith.constant dense<0.000000e+00> : vector<32xf32>
    %199 = vector.multi_reduction <add>, %198, %cst_95 [1] : vector<32x32xf32> to vector<32xf32>
    %200 = vector.shape_cast %199 : vector<32xf32> to vector<32x1xf32>
    %201 = tpu.reciprocal %200 {approx = true} : vector<32x1xf32> -> vector<32x1xf32>
    %202 = vector.broadcast %201 : vector<32x1xf32> to vector<32x32xf32>
    %203 = arith.mulf %198, %202 : vector<32x32xf32>
    %204 = arith.truncf %203 : vector<32x32xf32> to vector<32x32xbf16>
    %205 = arith.truncf %186 : vector<32x128xf32> to vector<32x128xbf16>
    %cst_96 = arith.constant dense<0.000000e+00> : vector<32x128xf32>
    %206 = tpu.matmul %204, %205, %cst_96 {dimension_numbers = #tpu.dot_dimension_numbers<[1], [0], [0], [1], [0, 0, 1, 1], [], []>} : vector<32x32xbf16>, vector<32x128xbf16>, vector<32x128xf32> -> vector<32x128xf32>
    %207 = arith.truncf %206 : vector<32x128xf32> to vector<32x128xbf16>
    %c1_97 = arith.constant 1 : index
    %c0_98 = arith.constant 0 : index
    %c0_99 = arith.constant 0 : index
    %208 = vector.load %arg11[%c1_97, %c0_98, %c0_99] : memref<3x128x128xbf16, #tpu.memory_space<vmem>>, vector<1x128x128xbf16>
    %209 = vector.shape_cast %208 : vector<1x128x128xbf16> to vector<128x128xbf16>
    %cst_100 = arith.constant dense<0.000000e+00> : vector<32x128xf32>
    %210 = tpu.matmul %207, %209, %cst_100 {dimension_numbers = #tpu.dot_dimension_numbers<[1], [0], [0], [1], [0, 0, 1, 1], [], []>} : vector<32x128xbf16>, vector<128x128xbf16>, vector<32x128xf32> -> vector<32x128xf32>
    %c1_101 = arith.constant 1 : index
    %c0_102 = arith.constant 0 : index
    %c0_103 = arith.constant 0 : index
    %211 = vector.load %arg12[%c1_101, %c0_102, %c0_103] : memref<3x1x128xf32, #tpu.memory_space<vmem>>, vector<1x1x128xf32>
    %212 = vector.shape_cast %211 : vector<1x1x128xf32> to vector<1x128xf32>
    %213 = vector.broadcast %212 : vector<1x128xf32> to vector<32x128xf32>
    %214 = arith.addf %210, %213 : vector<32x128xf32>
    %215 = arith.addf %149, %214 : vector<32x128xf32>
    %c1_104 = arith.constant 1 : index
    %c0_105 = arith.constant 0 : index
    %c0_106 = arith.constant 0 : index
    %216 = vector.load %arg13[%c1_104, %c0_105, %c0_106] : memref<3x1x128xf32, #tpu.memory_space<vmem>>, vector<1x1x128xf32>
    %217 = vector.shape_cast %216 : vector<1x1x128xf32> to vector<1x128xf32>
    %c1_107 = arith.constant 1 : index
    %c0_108 = arith.constant 0 : index
    %c0_109 = arith.constant 0 : index
    %218 = vector.load %arg14[%c1_107, %c0_108, %c0_109] : memref<3x1x128xf32, #tpu.memory_space<vmem>>, vector<1x1x128xf32>
    %219 = vector.shape_cast %218 : vector<1x1x128xf32> to vector<1x128xf32>
    %cst_110 = arith.constant dense<0.000000e+00> : vector<32xf32>
    %220 = vector.multi_reduction <add>, %215, %cst_110 [1] : vector<32x128xf32> to vector<32xf32>
    %221 = vector.shape_cast %220 : vector<32xf32> to vector<32x1xf32>
    %cst_111 = arith.constant 1.280000e+02 : f32
    %222 = vector.broadcast %cst_111 : f32 to vector<32x1xf32>
    %223 = arith.divf %221, %222 : vector<32x1xf32>
    %224 = vector.broadcast %223 : vector<32x1xf32> to vector<32x128xf32>
    %225 = arith.subf %215, %224 : vector<32x128xf32>
    %226 = arith.mulf %225, %225 : vector<32x128xf32>
    %cst_112 = arith.constant dense<0.000000e+00> : vector<32xf32>
    %227 = vector.multi_reduction <add>, %226, %cst_112 [1] : vector<32x128xf32> to vector<32xf32>
    %228 = vector.shape_cast %227 : vector<32xf32> to vector<32x1xf32>
    %cst_113 = arith.constant 1.280000e+02 : f32
    %229 = vector.broadcast %cst_113 : f32 to vector<32x1xf32>
    %230 = arith.divf %228, %229 : vector<32x1xf32>
    %231 = vector.broadcast %223 : vector<32x1xf32> to vector<32x128xf32>
    %232 = arith.subf %215, %231 : vector<32x128xf32>
    %cst_114 = arith.constant 9.99999974E-6 : f32
    %233 = vector.broadcast %cst_114 : f32 to vector<32x1xf32>
    %234 = arith.addf %230, %233 : vector<32x1xf32>
    %235 = math.rsqrt %234 : vector<32x1xf32>
    %236 = vector.broadcast %235 : vector<32x1xf32> to vector<32x128xf32>
    %237 = arith.mulf %232, %236 : vector<32x128xf32>
    %238 = vector.broadcast %217 : vector<1x128xf32> to vector<32x128xf32>
    %239 = arith.mulf %237, %238 : vector<32x128xf32>
    %240 = vector.broadcast %219 : vector<1x128xf32> to vector<32x128xf32>
    %241 = arith.addf %239, %240 : vector<32x128xf32>
    %242 = arith.truncf %241 : vector<32x128xf32> to vector<32x128xbf16>
    %c1_115 = arith.constant 1 : index
    %c0_116 = arith.constant 0 : index
    %c0_117 = arith.constant 0 : index
    %243 = vector.load %arg15[%c1_115, %c0_116, %c0_117] : memref<3x128x512xbf16, #tpu.memory_space<vmem>>, vector<1x128x512xbf16>
    %244 = vector.shape_cast %243 : vector<1x128x512xbf16> to vector<128x512xbf16>
    %cst_118 = arith.constant dense<0.000000e+00> : vector<32x512xf32>
    %245 = tpu.matmul %242, %244, %cst_118 {dimension_numbers = #tpu.dot_dimension_numbers<[1], [0], [0], [1], [0, 0, 1, 1], [], []>} : vector<32x128xbf16>, vector<128x512xbf16>, vector<32x512xf32> -> vector<32x512xf32>
    %c1_119 = arith.constant 1 : index
    %c0_120 = arith.constant 0 : index
    %c0_121 = arith.constant 0 : index
    %246 = vector.load %arg16[%c1_119, %c0_120, %c0_121] : memref<3x1x512xf32, #tpu.memory_space<vmem>>, vector<1x1x512xf32>
    %247 = vector.shape_cast %246 : vector<1x1x512xf32> to vector<1x512xf32>
    %248 = vector.broadcast %247 : vector<1x512xf32> to vector<32x512xf32>
    %249 = arith.addf %245, %248 : vector<32x512xf32>
    %cst_122 = arith.constant 0.000000e+00 : f32
    %250 = vector.broadcast %cst_122 : f32 to vector<32x512xf32>
    %251 = arith.maximumf %249, %250 : vector<32x512xf32>
    %252 = arith.truncf %251 : vector<32x512xf32> to vector<32x512xbf16>
    %c1_123 = arith.constant 1 : index
    %c0_124 = arith.constant 0 : index
    %c0_125 = arith.constant 0 : index
    %253 = vector.load %arg17[%c1_123, %c0_124, %c0_125] : memref<3x512x128xbf16, #tpu.memory_space<vmem>>, vector<1x512x128xbf16>
    %254 = vector.shape_cast %253 : vector<1x512x128xbf16> to vector<512x128xbf16>
    %cst_126 = arith.constant dense<0.000000e+00> : vector<32x128xf32>
    %255 = tpu.matmul %252, %254, %cst_126 {dimension_numbers = #tpu.dot_dimension_numbers<[1], [0], [0], [1], [0, 0, 1, 1], [], []>} : vector<32x512xbf16>, vector<512x128xbf16>, vector<32x128xf32> -> vector<32x128xf32>
    %c1_127 = arith.constant 1 : index
    %c0_128 = arith.constant 0 : index
    %c0_129 = arith.constant 0 : index
    %256 = vector.load %arg18[%c1_127, %c0_128, %c0_129] : memref<3x1x128xf32, #tpu.memory_space<vmem>>, vector<1x1x128xf32>
    %257 = vector.shape_cast %256 : vector<1x1x128xf32> to vector<1x128xf32>
    %258 = vector.broadcast %257 : vector<1x128xf32> to vector<32x128xf32>
    %259 = arith.addf %255, %258 : vector<32x128xf32>
    %260 = arith.addf %215, %259 : vector<32x128xf32>
    %c2 = arith.constant 2 : index
    %c0_130 = arith.constant 0 : index
    %c0_131 = arith.constant 0 : index
    %261 = vector.load %arg7[%c2, %c0_130, %c0_131] : memref<3x1x128xf32, #tpu.memory_space<vmem>>, vector<1x1x128xf32>
    %262 = vector.shape_cast %261 : vector<1x1x128xf32> to vector<1x128xf32>
    %c2_132 = arith.constant 2 : index
    %c0_133 = arith.constant 0 : index
    %c0_134 = arith.constant 0 : index
    %263 = vector.load %arg8[%c2_132, %c0_133, %c0_134] : memref<3x1x128xf32, #tpu.memory_space<vmem>>, vector<1x1x128xf32>
    %264 = vector.shape_cast %263 : vector<1x1x128xf32> to vector<1x128xf32>
    %cst_135 = arith.constant dense<0.000000e+00> : vector<32xf32>
    %265 = vector.multi_reduction <add>, %260, %cst_135 [1] : vector<32x128xf32> to vector<32xf32>
    %266 = vector.shape_cast %265 : vector<32xf32> to vector<32x1xf32>
    %cst_136 = arith.constant 1.280000e+02 : f32
    %267 = vector.broadcast %cst_136 : f32 to vector<32x1xf32>
    %268 = arith.divf %266, %267 : vector<32x1xf32>
    %269 = vector.broadcast %268 : vector<32x1xf32> to vector<32x128xf32>
    %270 = arith.subf %260, %269 : vector<32x128xf32>
    %271 = arith.mulf %270, %270 : vector<32x128xf32>
    %cst_137 = arith.constant dense<0.000000e+00> : vector<32xf32>
    %272 = vector.multi_reduction <add>, %271, %cst_137 [1] : vector<32x128xf32> to vector<32xf32>
    %273 = vector.shape_cast %272 : vector<32xf32> to vector<32x1xf32>
    %cst_138 = arith.constant 1.280000e+02 : f32
    %274 = vector.broadcast %cst_138 : f32 to vector<32x1xf32>
    %275 = arith.divf %273, %274 : vector<32x1xf32>
    %276 = vector.broadcast %268 : vector<32x1xf32> to vector<32x128xf32>
    %277 = arith.subf %260, %276 : vector<32x128xf32>
    %cst_139 = arith.constant 9.99999974E-6 : f32
    %278 = vector.broadcast %cst_139 : f32 to vector<32x1xf32>
    %279 = arith.addf %275, %278 : vector<32x1xf32>
    %280 = math.rsqrt %279 : vector<32x1xf32>
    %281 = vector.broadcast %280 : vector<32x1xf32> to vector<32x128xf32>
    %282 = arith.mulf %277, %281 : vector<32x128xf32>
    %283 = vector.broadcast %262 : vector<1x128xf32> to vector<32x128xf32>
    %284 = arith.mulf %282, %283 : vector<32x128xf32>
    %285 = vector.broadcast %264 : vector<1x128xf32> to vector<32x128xf32>
    %286 = arith.addf %284, %285 : vector<32x128xf32>
    %287 = arith.truncf %286 : vector<32x128xf32> to vector<32x128xbf16>
    %c2_140 = arith.constant 2 : index
    %c0_141 = arith.constant 0 : index
    %c0_142 = arith.constant 0 : index
    %288 = vector.load %arg9[%c2_140, %c0_141, %c0_142] : memref<3x128x384xbf16, #tpu.memory_space<vmem>>, vector<1x128x384xbf16>
    %289 = vector.shape_cast %288 : vector<1x128x384xbf16> to vector<128x384xbf16>
    %cst_143 = arith.constant dense<0.000000e+00> : vector<32x384xf32>
    %290 = tpu.matmul %287, %289, %cst_143 {dimension_numbers = #tpu.dot_dimension_numbers<[1], [0], [0], [1], [0, 0, 1, 1], [], []>} : vector<32x128xbf16>, vector<128x384xbf16>, vector<32x384xf32> -> vector<32x384xf32>
    %c2_144 = arith.constant 2 : index
    %c0_145 = arith.constant 0 : index
    %c0_146 = arith.constant 0 : index
    %291 = vector.load %arg10[%c2_144, %c0_145, %c0_146] : memref<3x1x384xf32, #tpu.memory_space<vmem>>, vector<1x1x384xf32>
    %292 = vector.shape_cast %291 : vector<1x1x384xf32> to vector<1x384xf32>
    %293 = vector.broadcast %292 : vector<1x384xf32> to vector<32x384xf32>
    %294 = arith.addf %290, %293 : vector<32x384xf32>
    %295 = vector.extract_strided_slice %294 {offsets = [0, 0], sizes = [32, 128], strides = [1, 1]} : vector<32x384xf32> to vector<32x128xf32>
    %296 = vector.extract_strided_slice %294 {offsets = [0, 128], sizes = [32, 128], strides = [1, 1]} : vector<32x384xf32> to vector<32x128xf32>
    %297 = vector.extract_strided_slice %294 {offsets = [0, 256], sizes = [32, 128], strides = [1, 1]} : vector<32x384xf32> to vector<32x128xf32>
    %298 = arith.truncf %295 : vector<32x128xf32> to vector<32x128xbf16>
    %299 = arith.truncf %296 : vector<32x128xf32> to vector<32x128xbf16>
    %cst_147 = arith.constant dense<0.000000e+00> : vector<32x32xf32>
    %300 = tpu.matmul %298, %299, %cst_147 {dimension_numbers = #tpu.dot_dimension_numbers<[1], [1], [0], [0], [0, 0, 1, 0], [], []>} : vector<32x128xbf16>, vector<32x128xbf16>, vector<32x32xf32> -> vector<32x32xf32>
    %cst_148 = arith.constant 0.0883883461 : f32
    %301 = vector.broadcast %cst_148 : f32 to vector<32x32xf32>
    %302 = arith.mulf %300, %301 : vector<32x32xf32>
    %cst_149 = arith.constant -1.000000e+30 : f32
    %303 = vector.broadcast %cst_149 : f32 to vector<32x32xf32>
    %304 = arith.select %38, %302, %303 : vector<32x32xi1>, vector<32x32xf32>
    %cst_150 = arith.constant dense<0xFF800000> : vector<32xf32>
    %305 = vector.multi_reduction <maximumf>, %304, %cst_150 [1] : vector<32x32xf32> to vector<32xf32>
    %306 = vector.shape_cast %305 : vector<32xf32> to vector<32x1xf32>
    %307 = vector.broadcast %306 : vector<32x1xf32> to vector<32x32xf32>
    %308 = arith.subf %304, %307 : vector<32x32xf32>
    %309 = math.exp %308 : vector<32x32xf32>
    %cst_151 = arith.constant dense<0.000000e+00> : vector<32xf32>
    %310 = vector.multi_reduction <add>, %309, %cst_151 [1] : vector<32x32xf32> to vector<32xf32>
    %311 = vector.shape_cast %310 : vector<32xf32> to vector<32x1xf32>
    %312 = tpu.reciprocal %311 {approx = true} : vector<32x1xf32> -> vector<32x1xf32>
    %313 = vector.broadcast %312 : vector<32x1xf32> to vector<32x32xf32>
    %314 = arith.mulf %309, %313 : vector<32x32xf32>
    %315 = arith.truncf %314 : vector<32x32xf32> to vector<32x32xbf16>
    %316 = arith.truncf %297 : vector<32x128xf32> to vector<32x128xbf16>
    %cst_152 = arith.constant dense<0.000000e+00> : vector<32x128xf32>
    %317 = tpu.matmul %315, %316, %cst_152 {dimension_numbers = #tpu.dot_dimension_numbers<[1], [0], [0], [1], [0, 0, 1, 1], [], []>} : vector<32x32xbf16>, vector<32x128xbf16>, vector<32x128xf32> -> vector<32x128xf32>
    %318 = arith.truncf %317 : vector<32x128xf32> to vector<32x128xbf16>
    %c2_153 = arith.constant 2 : index
    %c0_154 = arith.constant 0 : index
    %c0_155 = arith.constant 0 : index
    %319 = vector.load %arg11[%c2_153, %c0_154, %c0_155] : memref<3x128x128xbf16, #tpu.memory_space<vmem>>, vector<1x128x128xbf16>
    %320 = vector.shape_cast %319 : vector<1x128x128xbf16> to vector<128x128xbf16>
    %cst_156 = arith.constant dense<0.000000e+00> : vector<32x128xf32>
    %321 = tpu.matmul %318, %320, %cst_156 {dimension_numbers = #tpu.dot_dimension_numbers<[1], [0], [0], [1], [0, 0, 1, 1], [], []>} : vector<32x128xbf16>, vector<128x128xbf16>, vector<32x128xf32> -> vector<32x128xf32>
    %c2_157 = arith.constant 2 : index
    %c0_158 = arith.constant 0 : index
    %c0_159 = arith.constant 0 : index
    %322 = vector.load %arg12[%c2_157, %c0_158, %c0_159] : memref<3x1x128xf32, #tpu.memory_space<vmem>>, vector<1x1x128xf32>
    %323 = vector.shape_cast %322 : vector<1x1x128xf32> to vector<1x128xf32>
    %324 = vector.broadcast %323 : vector<1x128xf32> to vector<32x128xf32>
    %325 = arith.addf %321, %324 : vector<32x128xf32>
    %326 = arith.addf %260, %325 : vector<32x128xf32>
    %c2_160 = arith.constant 2 : index
    %c0_161 = arith.constant 0 : index
    %c0_162 = arith.constant 0 : index
    %327 = vector.load %arg13[%c2_160, %c0_161, %c0_162] : memref<3x1x128xf32, #tpu.memory_space<vmem>>, vector<1x1x128xf32>
    %328 = vector.shape_cast %327 : vector<1x1x128xf32> to vector<1x128xf32>
    %c2_163 = arith.constant 2 : index
    %c0_164 = arith.constant 0 : index
    %c0_165 = arith.constant 0 : index
    %329 = vector.load %arg14[%c2_163, %c0_164, %c0_165] : memref<3x1x128xf32, #tpu.memory_space<vmem>>, vector<1x1x128xf32>
    %330 = vector.shape_cast %329 : vector<1x1x128xf32> to vector<1x128xf32>
    %cst_166 = arith.constant dense<0.000000e+00> : vector<32xf32>
    %331 = vector.multi_reduction <add>, %326, %cst_166 [1] : vector<32x128xf32> to vector<32xf32>
    %332 = vector.shape_cast %331 : vector<32xf32> to vector<32x1xf32>
    %cst_167 = arith.constant 1.280000e+02 : f32
    %333 = vector.broadcast %cst_167 : f32 to vector<32x1xf32>
    %334 = arith.divf %332, %333 : vector<32x1xf32>
    %335 = vector.broadcast %334 : vector<32x1xf32> to vector<32x128xf32>
    %336 = arith.subf %326, %335 : vector<32x128xf32>
    %337 = arith.mulf %336, %336 : vector<32x128xf32>
    %cst_168 = arith.constant dense<0.000000e+00> : vector<32xf32>
    %338 = vector.multi_reduction <add>, %337, %cst_168 [1] : vector<32x128xf32> to vector<32xf32>
    %339 = vector.shape_cast %338 : vector<32xf32> to vector<32x1xf32>
    %cst_169 = arith.constant 1.280000e+02 : f32
    %340 = vector.broadcast %cst_169 : f32 to vector<32x1xf32>
    %341 = arith.divf %339, %340 : vector<32x1xf32>
    %342 = vector.broadcast %334 : vector<32x1xf32> to vector<32x128xf32>
    %343 = arith.subf %326, %342 : vector<32x128xf32>
    %cst_170 = arith.constant 9.99999974E-6 : f32
    %344 = vector.broadcast %cst_170 : f32 to vector<32x1xf32>
    %345 = arith.addf %341, %344 : vector<32x1xf32>
    %346 = math.rsqrt %345 : vector<32x1xf32>
    %347 = vector.broadcast %346 : vector<32x1xf32> to vector<32x128xf32>
    %348 = arith.mulf %343, %347 : vector<32x128xf32>
    %349 = vector.broadcast %328 : vector<1x128xf32> to vector<32x128xf32>
    %350 = arith.mulf %348, %349 : vector<32x128xf32>
    %351 = vector.broadcast %330 : vector<1x128xf32> to vector<32x128xf32>
    %352 = arith.addf %350, %351 : vector<32x128xf32>
    %353 = arith.truncf %352 : vector<32x128xf32> to vector<32x128xbf16>
    %c2_171 = arith.constant 2 : index
    %c0_172 = arith.constant 0 : index
    %c0_173 = arith.constant 0 : index
    %354 = vector.load %arg15[%c2_171, %c0_172, %c0_173] : memref<3x128x512xbf16, #tpu.memory_space<vmem>>, vector<1x128x512xbf16>
    %355 = vector.shape_cast %354 : vector<1x128x512xbf16> to vector<128x512xbf16>
    %cst_174 = arith.constant dense<0.000000e+00> : vector<32x512xf32>
    %356 = tpu.matmul %353, %355, %cst_174 {dimension_numbers = #tpu.dot_dimension_numbers<[1], [0], [0], [1], [0, 0, 1, 1], [], []>} : vector<32x128xbf16>, vector<128x512xbf16>, vector<32x512xf32> -> vector<32x512xf32>
    %c2_175 = arith.constant 2 : index
    %c0_176 = arith.constant 0 : index
    %c0_177 = arith.constant 0 : index
    %357 = vector.load %arg16[%c2_175, %c0_176, %c0_177] : memref<3x1x512xf32, #tpu.memory_space<vmem>>, vector<1x1x512xf32>
    %358 = vector.shape_cast %357 : vector<1x1x512xf32> to vector<1x512xf32>
    %359 = vector.broadcast %358 : vector<1x512xf32> to vector<32x512xf32>
    %360 = arith.addf %356, %359 : vector<32x512xf32>
    %cst_178 = arith.constant 0.000000e+00 : f32
    %361 = vector.broadcast %cst_178 : f32 to vector<32x512xf32>
    %362 = arith.maximumf %360, %361 : vector<32x512xf32>
    %363 = arith.truncf %362 : vector<32x512xf32> to vector<32x512xbf16>
    %c2_179 = arith.constant 2 : index
    %c0_180 = arith.constant 0 : index
    %c0_181 = arith.constant 0 : index
    %364 = vector.load %arg17[%c2_179, %c0_180, %c0_181] : memref<3x512x128xbf16, #tpu.memory_space<vmem>>, vector<1x512x128xbf16>
    %365 = vector.shape_cast %364 : vector<1x512x128xbf16> to vector<512x128xbf16>
    %cst_182 = arith.constant dense<0.000000e+00> : vector<32x128xf32>
    %366 = tpu.matmul %363, %365, %cst_182 {dimension_numbers = #tpu.dot_dimension_numbers<[1], [0], [0], [1], [0, 0, 1, 1], [], []>} : vector<32x512xbf16>, vector<512x128xbf16>, vector<32x128xf32> -> vector<32x128xf32>
    %c2_183 = arith.constant 2 : index
    %c0_184 = arith.constant 0 : index
    %c0_185 = arith.constant 0 : index
    %367 = vector.load %arg18[%c2_183, %c0_184, %c0_185] : memref<3x1x128xf32, #tpu.memory_space<vmem>>, vector<1x1x128xf32>
    %368 = vector.shape_cast %367 : vector<1x1x128xf32> to vector<1x128xf32>
    %369 = vector.broadcast %368 : vector<1x128xf32> to vector<32x128xf32>
    %370 = arith.addf %366, %369 : vector<32x128xf32>
    %371 = arith.addf %326, %370 : vector<32x128xf32>
    %c0_186 = arith.constant 0 : index
    %c0_187 = arith.constant 0 : index
    %372 = vector.load %arg19[%c0_186, %c0_187] : memref<1x128xf32, #tpu.memory_space<vmem>>, vector<1x128xf32>
    %c0_188 = arith.constant 0 : index
    %c0_189 = arith.constant 0 : index
    %373 = vector.load %arg20[%c0_188, %c0_189] : memref<1x128xf32, #tpu.memory_space<vmem>>, vector<1x128xf32>
    %cst_190 = arith.constant dense<0.000000e+00> : vector<32xf32>
    %374 = vector.multi_reduction <add>, %371, %cst_190 [1] : vector<32x128xf32> to vector<32xf32>
    %375 = vector.shape_cast %374 : vector<32xf32> to vector<32x1xf32>
    %cst_191 = arith.constant 1.280000e+02 : f32
    %376 = vector.broadcast %cst_191 : f32 to vector<32x1xf32>
    %377 = arith.divf %375, %376 : vector<32x1xf32>
    %378 = vector.broadcast %377 : vector<32x1xf32> to vector<32x128xf32>
    %379 = arith.subf %371, %378 : vector<32x128xf32>
    %380 = arith.mulf %379, %379 : vector<32x128xf32>
    %cst_192 = arith.constant dense<0.000000e+00> : vector<32xf32>
    %381 = vector.multi_reduction <add>, %380, %cst_192 [1] : vector<32x128xf32> to vector<32xf32>
    %382 = vector.shape_cast %381 : vector<32xf32> to vector<32x1xf32>
    %cst_193 = arith.constant 1.280000e+02 : f32
    %383 = vector.broadcast %cst_193 : f32 to vector<32x1xf32>
    %384 = arith.divf %382, %383 : vector<32x1xf32>
    %385 = vector.broadcast %377 : vector<32x1xf32> to vector<32x128xf32>
    %386 = arith.subf %371, %385 : vector<32x128xf32>
    %cst_194 = arith.constant 9.99999974E-6 : f32
    %387 = vector.broadcast %cst_194 : f32 to vector<32x1xf32>
    %388 = arith.addf %384, %387 : vector<32x1xf32>
    %389 = math.rsqrt %388 : vector<32x1xf32>
    %390 = vector.broadcast %389 : vector<32x1xf32> to vector<32x128xf32>
    %391 = arith.mulf %386, %390 : vector<32x128xf32>
    %392 = vector.broadcast %372 : vector<1x128xf32> to vector<32x128xf32>
    %393 = arith.mulf %391, %392 : vector<32x128xf32>
    %394 = vector.broadcast %373 : vector<1x128xf32> to vector<32x128xf32>
    %395 = arith.addf %393, %394 : vector<32x128xf32>
    %396 = arith.truncf %395 : vector<32x128xf32> to vector<32x128xbf16>
    %c0_195 = arith.constant 0 : index
    %c0_196 = arith.constant 0 : index
    %397 = vector.load %arg21[%c0_195, %c0_196] : memref<128x128xbf16, #tpu.memory_space<vmem>>, vector<128x128xbf16>
    %cst_197 = arith.constant dense<0.000000e+00> : vector<32x128xf32>
    %398 = tpu.matmul %396, %397, %cst_197 {dimension_numbers = #tpu.dot_dimension_numbers<[1], [0], [0], [1], [0, 0, 1, 1], [], []>} : vector<32x128xbf16>, vector<128x128xbf16>, vector<32x128xf32> -> vector<32x128xf32>
    %c0_198 = arith.constant 0 : index
    %c0_199 = arith.constant 0 : index
    %399 = vector.load %arg22[%c0_198, %c0_199] : memref<1x128xf32, #tpu.memory_space<vmem>>, vector<1x128xf32>
    %400 = vector.broadcast %399 : vector<1x128xf32> to vector<32x128xf32>
    %401 = arith.addf %398, %400 : vector<32x128xf32>
    %c0_200 = arith.constant 0 : index
    %c0_201 = arith.constant 0 : index
    %c0_202 = arith.constant 0 : index
    %402 = vector.load %arg23[%c0_200, %c0_201, %c0_202] : memref<1x32x128xf32, #tpu.memory_space<vmem>>, vector<1x32x128xf32>
    %403 = vector.shape_cast %402 : vector<1x32x128xf32> to vector<32x128xf32>
    %404 = vector.shape_cast %401 : vector<32x128xf32> to vector<1x32x128xf32>
    tpu.vector_store %arg23[%c0_200, %c0_201, %c0_202], %404 {strides = array<i32>} : memref<1x32x128xf32, #tpu.memory_space<vmem>>, vector<1x32x128xf32>,
    return
  }
  func.func @transform_0(%arg0: i32) -> (i32, i32, i32) {
    %c0_i32 = arith.constant 0 : i32
    %c0_i32_0 = arith.constant 0 : i32
    %c0_i32_1 = arith.constant 0 : i32
    return %arg0, %c0_i32, %c0_i32_0 : i32, i32, i32
  }
  func.func @transform_1(%arg0: i32) -> (i32, i32) {
    %c0_i32 = arith.constant 0 : i32
    %c0_i32_0 = arith.constant 0 : i32
    %c0_i32_1 = arith.constant 0 : i32
    return %c0_i32, %c0_i32_0 : i32, i32
  }
  func.func @transform_2(%arg0: i32) -> (i32, i32) {
    %c0_i32 = arith.constant 0 : i32
    %c0_i32_0 = arith.constant 0 : i32
    %c0_i32_1 = arith.constant 0 : i32
    return %c0_i32, %c0_i32_0 : i32, i32
  }
  func.func @transform_3(%arg0: i32) -> (i32, i32) {
    %c0_i32 = arith.constant 0 : i32
    %c0_i32_0 = arith.constant 0 : i32
    %c0_i32_1 = arith.constant 0 : i32
    return %c0_i32, %c0_i32_0 : i32, i32
  }
  func.func @transform_4(%arg0: i32) -> (i32, i32) {
    %c0_i32 = arith.constant 0 : i32
    %c0_i32_0 = arith.constant 0 : i32
    %c0_i32_1 = arith.constant 0 : i32
    return %c0_i32, %c0_i32_0 : i32, i32
  }
  func.func @transform_5(%arg0: i32) -> (i32, i32) {
    %c0_i32 = arith.constant 0 : i32
    %c0_i32_0 = arith.constant 0 : i32
    %c0_i32_1 = arith.constant 0 : i32
    return %c0_i32, %c0_i32_0 : i32, i32
  }
  func.func @transform_6(%arg0: i32) -> (i32, i32, i32) {
    %c0_i32 = arith.constant 0 : i32
    %c0_i32_0 = arith.constant 0 : i32
    %c0_i32_1 = arith.constant 0 : i32
    %c0_i32_2 = arith.constant 0 : i32
    return %c0_i32, %c0_i32_0, %c0_i32_1 : i32, i32, i32
  }
  func.func @transform_7(%arg0: i32) -> (i32, i32, i32) {
    %c0_i32 = arith.constant 0 : i32
    %c0_i32_0 = arith.constant 0 : i32
    %c0_i32_1 = arith.constant 0 : i32
    %c0_i32_2 = arith.constant 0 : i32
    return %c0_i32, %c0_i32_0, %c0_i32_1 : i32, i32, i32
  }
  func.func @transform_8(%arg0: i32) -> (i32, i32, i32) {
    %c0_i32 = arith.constant 0 : i32
    %c0_i32_0 = arith.constant 0 : i32
    %c0_i32_1 = arith.constant 0 : i32
    %c0_i32_2 = arith.constant 0 : i32
    return %c0_i32, %c0_i32_0, %c0_i32_1 : i32, i32, i32
  }
  func.func @transform_9(%arg0: i32) -> (i32, i32, i32) {
    %c0_i32 = arith.constant 0 : i32
    %c0_i32_0 = arith.constant 0 : i32
    %c0_i32_1 = arith.constant 0 : i32
    %c0_i32_2 = arith.constant 0 : i32
    return %c0_i32, %c0_i32_0, %c0_i32_1 : i32, i32, i32
  }
  func.func @transform_10(%arg0: i32) -> (i32, i32, i32) {
    %c0_i32 = arith.constant 0 : i32
    %c0_i32_0 = arith.constant 0 : i32
    %c0_i32_1 = arith.constant 0 : i32
    %c0_i32_2 = arith.constant 0 : i32
    return %c0_i32, %c0_i32_0, %c0_i32_1 : i32, i32, i32
  }
  func.func @transform_11(%arg0: i32) -> (i32, i32, i32) {
    %c0_i32 = arith.constant 0 : i32
    %c0_i32_0 = arith.constant 0 : i32
    %c0_i32_1 = arith.constant 0 : i32
    %c0_i32_2 = arith.constant 0 : i32
    return %c0_i32, %c0_i32_0, %c0_i32_1 : i32, i32, i32
  }
  func.func @transform_12(%arg0: i32) -> (i32, i32, i32) {
    %c0_i32 = arith.constant 0 : i32
    %c0_i32_0 = arith.constant 0 : i32
    %c0_i32_1 = arith.constant 0 : i32
    %c0_i32_2 = arith.constant 0 : i32
    return %c0_i32, %c0_i32_0, %c0_i32_1 : i32, i32, i32
  }
  func.func @transform_13(%arg0: i32) -> (i32, i32, i32) {
    %c0_i32 = arith.constant 0 : i32
    %c0_i32_0 = arith.constant 0 : i32
    %c0_i32_1 = arith.constant 0 : i32
    %c0_i32_2 = arith.constant 0 : i32
    return %c0_i32, %c0_i32_0, %c0_i32_1 : i32, i32, i32
  }
  func.func @transform_14(%arg0: i32) -> (i32, i32, i32) {
    %c0_i32 = arith.constant 0 : i32
    %c0_i32_0 = arith.constant 0 : i32
    %c0_i32_1 = arith.constant 0 : i32
    %c0_i32_2 = arith.constant 0 : i32
    return %c0_i32, %c0_i32_0, %c0_i32_1 : i32, i32, i32
  }
  func.func @transform_15(%arg0: i32) -> (i32, i32, i32) {
    %c0_i32 = arith.constant 0 : i32
    %c0_i32_0 = arith.constant 0 : i32
    %c0_i32_1 = arith.constant 0 : i32
    %c0_i32_2 = arith.constant 0 : i32
    return %c0_i32, %c0_i32_0, %c0_i32_1 : i32, i32, i32
  }
  func.func @transform_16(%arg0: i32) -> (i32, i32, i32) {
    %c0_i32 = arith.constant 0 : i32
    %c0_i32_0 = arith.constant 0 : i32
    %c0_i32_1 = arith.constant 0 : i32
    %c0_i32_2 = arith.constant 0 : i32
    return %c0_i32, %c0_i32_0, %c0_i32_1 : i32, i32, i32
  }
  func.func @transform_17(%arg0: i32) -> (i32, i32, i32) {
    %c0_i32 = arith.constant 0 : i32
    %c0_i32_0 = arith.constant 0 : i32
    %c0_i32_1 = arith.constant 0 : i32
    %c0_i32_2 = arith.constant 0 : i32
    return %c0_i32, %c0_i32_0, %c0_i32_1 : i32, i32, i32
  }
  func.func @transform_18(%arg0: i32) -> (i32, i32) {
    %c0_i32 = arith.constant 0 : i32
    %c0_i32_0 = arith.constant 0 : i32
    %c0_i32_1 = arith.constant 0 : i32
    return %c0_i32, %c0_i32_0 : i32, i32
  }
  func.func @transform_19(%arg0: i32) -> (i32, i32) {
    %c0_i32 = arith.constant 0 : i32
    %c0_i32_0 = arith.constant 0 : i32
    %c0_i32_1 = arith.constant 0 : i32
    return %c0_i32, %c0_i32_0 : i32, i32
  }
  func.func @transform_20(%arg0: i32) -> (i32, i32) {
    %c0_i32 = arith.constant 0 : i32
    %c0_i32_0 = arith.constant 0 : i32
    %c0_i32_1 = arith.constant 0 : i32
    return %c0_i32, %c0_i32_0 : i32, i32
  }
  func.func @transform_21(%arg0: i32) -> (i32, i32) {
    %c0_i32 = arith.constant 0 : i32
    %c0_i32_0 = arith.constant 0 : i32
    %c0_i32_1 = arith.constant 0 : i32
    return %c0_i32, %c0_i32_0 : i32, i32
  }
  func.func @transform_22(%arg0: i32) -> (i32, i32, i32) {
    %c0_i32 = arith.constant 0 : i32
    %c0_i32_0 = arith.constant 0 : i32
    %c0_i32_1 = arith.constant 0 : i32
    return %arg0, %c0_i32, %c0_i32_0 : i32, i32, i32
  }
}

</mosaic_0001>

<bundles_post_ra>
// kernel: decision_transformer_forward.1
= control target key start
LH: loop header
LB: loop body
LE: loop exit
PB: predicated region body
PF: predicated region fallthrough
CT: control target
= control target key end

     0   :  { %s9525_s0 = inlined_call_operand.hbm [shape: f32[2,32,128], index: 0, kind: input, shape index: {}]   ;;  %s9526_s1 = inlined_call_operand.hbm [shape: bf16[128,128], index: 1, kind: input, shape index: {}]   ;;  %s9527_s2 = inlined_call_operand.hbm [shape: f32[32,128], index: 2, kind: input, shape index: {}]   ;;  %s9528_s3 = inlined_call_operand.hbm [shape: f32[32,128], index: 3, kind: input, shape index: {}]   ;;  %s9529_s4 = inlined_call_operand.hbm [shape: f32[1,128], index: 4, kind: input, shape index: {}]   ;;  %s9530_s5 = inlined_call_operand.hbm [shape: f32[1,128], index: 5, kind: input, shape index: {}]   ;;  %s9531_s6 = inlined_call_operand.hbm [shape: f32[3,1,128], index: 6, kind: input, shape index: {}]   ;;  %s9532_s7 = inlined_call_operand.hbm [shape: f32[3,1,128], index: 7, kind: input, shape index: {}]   ;;  %s9533_s8 = inlined_call_operand.hbm [shape: bf16[3,128,384], index: 8, kind: input, shape index: {}]   ;;  %s9534_s9 = inlined_call_operand.hbm [shape: f32[3,1,384], index: 9, kind: input, shape index: {}]   ;;  %s9535_s10 = inlined_call_operand.hbm [shape: bf16[3,128,128], index: 10, kind: input, shape index: {}]   ;;  %s9536_s11 = inlined_call_operand.hbm [shape: f32[3,1,128], index: 11, kind: input, shape index: {}]   ;;  %s9537_s12 = inlined_call_operand.hbm [shape: f32[3,1,128], index: 12, kind: input, shape index: {}]   ;;  %s9538_s13 = inlined_call_operand.hbm [shape: f32[3,1,128], index: 13, kind: input, shape index: {}]   ;;  %s9539_s14 = inlined_call_operand.hbm [shape: bf16[3,128,512], index: 14, kind: input, shape index: {}]   ;;  %s9540_s15 = inlined_call_operand.hbm [shape: f32[3,1,512], index: 15, kind: input, shape index: {}]   ;;  %s9541_s16 = inlined_call_operand.hbm [shape: bf16[3,512,128], index: 16, kind: input, shape index: {}]   ;;  %s9542_s17 = inlined_call_operand.hbm [shape: f32[3,1,128], index: 17, kind: input, shape index: {}]   ;;  %s9543_s18 = inlined_call_operand.hbm [shape: f32[1,128], index: 18, kind: input, shape index: {}]   ;;  %s9544_s19 = inlined_call_operand.hbm [shape: f32[1,128], index: 19, kind: input, shape index: {}]   ;;  %s9545_s20 = inlined_call_operand.hbm [shape: bf16[128,128], index: 20, kind: input, shape index: {}]   ;;  %s9546_s21 = inlined_call_operand.hbm [shape: f32[1,128], index: 21, kind: input, shape index: {}]   ;;  %s9547_s22 = inlined_call_operand.hbm [shape: f32[2,32,128], index: 22, kind: output, shape index: {}]  }
   0x1   :  { %9585 = sst [smem:[#allocation57_spill]] %s9525_s0 }
   0x2   :  { %9586 = sst [smem:[#allocation58_spill]] %s9526_s1 }
   0x3   :  { %9587 = sst [smem:[#allocation59_spill]] %s9527_s2 }
   0x4   :  { %9588 = sst [smem:[#allocation60_spill]] %s9528_s3 }
   0x5   :  { %9589 = sst [smem:[#allocation61_spill]] %s9529_s4 }
   0x6   :  { %9590 = sst [smem:[#allocation62_spill]] %s9530_s5 }
   0x7   :  { %9591 = sst [smem:[#allocation63_spill]] %s9531_s6 }
   0x8   :  { %9592 = sst [smem:[#allocation64_spill]] %s9532_s7 }
   0x9   :  { %9593 = sst [smem:[#allocation65_spill]] %s9534_s9 }
   0xa   :  { %9594 = sst [smem:[#allocation66_spill]] %s9536_s11 }
   0xb   :  { %9595 = sst [smem:[#allocation67_spill]] %s9538_s13 }
   0xc   :  { %9596 = sst [smem:[#allocation68_spill]] %s9540_s15 }
   0xd   :  { %9597 = sst [smem:[#allocation69_spill]] %s9542_s17 }
   0xe   :  { %9598 = sst [smem:[#allocation70_spill]] %s9543_s18 }
   0xf   :  { %9599 = sst [smem:[#allocation71_spill]] %s9545_s20 }
  0x10   :  { %9600 = sst [smem:[#allocation72_spill]] %s9546_s21 }
  0x11   :  { %9601 = sst [smem:[#allocation73_spill]] %s9547_s22 }
  0x12   :  { %27 = vsyncpa [#allocation3], 0 }
  0x13   :  { %29 = vsyncpa [#allocation3 + $0x1], 0 }
  0x14   :  { %30 = vsyncpa [#allocation6], 0 }
  0x15   :  { %31 = vsyncpa [#allocation9], 0 }
  0x16   :  { %32 = vsyncpa [#allocation12], 0 }
  0x17   :  { %33 = vsyncpa [#allocation15], 0 }
  0x18   :  { %34 = vsyncpa [#allocation18], 0 }
  0x19   :  { %35 = vsyncpa [#allocation21], 0 }
  0x1a   :  { %36 = vsyncpa [#allocation24], 0 }
  0x1b   :  { %37 = vsyncpa [#allocation27], 0 }
  0x1c   :  { %38 = vsyncpa [#allocation30], 0 }
  0x1d   :  { %39 = vsyncpa [#allocation33], 0 }
  0x1e   :  { %40 = vsyncpa [#allocation36], 0 }
  0x1f   :  { %41 = vsyncpa [#allocation4], 0 }
  0x20   :  { %43 = vsyncpa [#allocation4 + $0x1], 0  ;;  %s8470_s3 = smov 0   ;;  %s8472_s28 = smov 0  }
  0x21   :  { %s8474_s29 = smov 0   ;;  %s8476_s30 = smov 0  }
  0x22 LB: > { %9602 = sst [smem:[#allocation51_spill]] %s8304_s3  ;;  %s8318_s4 = smov [#allocation5]   ;;  %s8316_s30 = sphi %s8476_s30, %s9688_s30   ;;  %s8312_s29 = sphi %s8474_s29, %s9687_s29   ;;  %s8308_s28 = sphi %s8472_s28, %s9686_s28   ;;  %s8304_s3 = sphi %s8470_s3, %s9685_s3  }
  0x23   : > { %9603 = sst [smem:[#allocation52_spill]] %s8308_s28  ;;  %s559_s0 = sshll.u32 %s8318_s4, 4  ;;  %s8496_s0 = int_to_ptr.vmem [resolvable:$true] %s559_s0 }
  0x24   : > { %9604 = sst [smem:[#allocation53_spill]] %s8312_s29  ;;  %s8491_s23 = sadd.s32 4294967295, %s8316_s30  }
  0x25   : > { %9605 = sst [smem:[#allocation54_spill]] %s8316_s30  ;;  %p5959_p0 = scmp.ge.s32.totalorder %s8316_s30, 1 }
  0x26   : > { %9606 = sst [smem:[#allocation55_spill]] %s8491_s23  ;;  %p9569_p1 = scmp.eq.s32.totalorder %s8491_s23, 0 }
  0x27   : > { %p547_p2 = scmp.lt.s32.totalorder %s8316_s30, 3  ;;  %s8319_s24 = smov [#allocation8]  }
  0x28   : > { %s585_s6 = sshll.u32 %s8319_s24, 4  ;;  %s8320_s25 = smov [#allocation11]   ;;  %s8511_s6 = int_to_ptr.vmem [resolvable:$true] %s585_s6 }
  0x29   : > { %p8498_p3 = pnand %p5959_p0, %p547_p2  ;;  %s8513_s26 = sshll.u32 %s8320_s25, 4  ;;  %s611_s26 = int_to_ptr.vmem [resolvable:$true] %s8513_s26 }
  0x2a   : > { %s9610_s4 = sld [smem:[#allocation58_spill]] }
  0x2b   : > { %s9607_s1 = scalar_select %p8498_p3, 1, 0 }
  0x2c   : > { %p6917_p5 = pneg %p8498_p3 }
  0x2d   : > { %9608 = sst [smem:[#allocation56_spill]] %s9607_s1 }
  0x2e   : > { %p8507_p6 = pnand %p6917_p5, %p9569_p1 }
  0x30   : > { %s7588_s22 = scalar_lea.hbm %s9610_s4, 1024  ;;  %p8523_p8 = pneg %p8507_p6 }
  0x31   : > { %p7589_p7 = scmp.ne.s32.totalorder %s9610_s4, %s7588_s22  ;;  %p7595_p11 = scmp.lt.u32.totalorder %s7588_s22, %s9610_s4 }
  0x33   : > { %p7591_p9 = pnand %p8523_p8, %p7589_p7 }
  0x35   : > { %p7592_p10 = pneg %p7591_p9 }
  0x37   : > { %p7597_p12 = pnand %p7595_p11, %p7592_p10 }
  0x39   : > { %7600 = shalt.err (!%p7597_p12)
}
  0x3a   : > { %s7601_s3 = scalar_lea.vmem %s8496_s0, 1024  ;;  %p7609_p5 = scmp.lt.s32.totalorder %s8496_s0, %s8496_s0 }
  0x3b   : > { %p7602_p13 = scmp.ne.s32.totalorder %s8496_s0, %s7601_s3  ;;  %p7610_p4 = scmp.lt.s32.totalorder %s7601_s3, %s7601_s3 }
  0x3d   : > { %p7604_p0 = pnand %p7602_p13, %p8523_p8  ;;  %p7611_p7 = por %p7610_p4, %p7609_p5 }
  0x3f   : > { %p7605_p2 = pneg %p7604_p0 }
  0x41   : > { %p7612_p9 = pnand %p7611_p7, %p7605_p2 }
  0x43   : > { %7615 = shalt.err (!%p7612_p9)
}
  0x44   : > { %s9567_s1 = smov 64   ;;  %s9575_s22 = smov 4  }
  0x45   : > { %6920 = dma.hbm_to_vmem [thread:$0]  (!%p8507_p6), %s9610_s4, 1024, %s8496_s0, [#allocation6], %s9567_s1, %s9567_s1, %s9575_s22  }
  0x46   : > { %s9612_s28 = sld [smem:[#allocation60_spill]] }
  0x4c   : > { %s9613_s21 = smov %s9612_s28  ;;  %s7616_s3 = scalar_lea.hbm %s9612_s28, 512 }
  0x4d   : > { %p7617_p4 = scmp.ne.s32.totalorder %s9613_s21, %s7616_s3  ;;  %p7623_p12 = scmp.lt.u32.totalorder %s7616_s3, %s9613_s21 }
  0x4f   : > { %p7619_p10 = pnand %p7617_p4, %p8523_p8 }
  0x51   : > { %p7620_p11 = pneg %p7619_p10 }
  0x53   : > { %p7625_p13 = pnand %p7623_p12, %p7620_p11 }
  0x55   : > { %7628 = shalt.err (!%p7625_p13)
}
  0x56   : > { %s7629_s0 = scalar_lea.vmem %s8511_s6, 512  ;;  %p7637_p7 = scmp.lt.s32.totalorder %s8511_s6, %s8511_s6 }
  0x57   : > { %p7630_p0 = scmp.ne.s32.totalorder %s8511_s6, %s7629_s0  ;;  %p7638_p9 = scmp.lt.s32.totalorder %s7629_s0, %s7629_s0 }
  0x59   : > { %p7632_p2 = pnand %p7630_p0, %p8523_p8  ;;  %p7639_p4 = por %p7638_p9, %p7637_p7 }
  0x5b   : > { %p7633_p5 = pneg %p7632_p2 }
  0x5d   : > { %p7640_p10 = pnand %p7639_p4, %p7633_p5 }
  0x5f   : > { %7643 = shalt.err (!%p7640_p10)
}
  0x60   : > { %s9571_s28 = smov 128   ;;  %s9573_s18 = smov 8  }
  0x61   : > { %6926 = dma.hbm_to_vmem [thread:$0]  (!%p8507_p6), %s9613_s21, 512, %s8511_s6, [#allocation9], %s9571_s28, %s9571_s28, %s9573_s18  }
  0x62   : > { %s9614_s27 = sld [smem:[#allocation62_spill]] }
  0x68   : > { %s7644_s24 = scalar_lea.hbm %s9614_s27, 16 }
  0x69   : > { %p7645_p11 = scmp.ne.s32.totalorder %s9614_s27, %s7644_s24  ;;  %p7651_p0 = scmp.lt.u32.totalorder %s7644_s24, %s9614_s27 }
  0x6b   : > { %p7647_p12 = pnand %p7645_p11, %p8523_p8 }
  0x6d   : > { %p7648_p13 = pneg %p7647_p12 }
  0x6f   : > { %p7653_p2 = pnand %p7651_p0, %p7648_p13 }
  0x71   : > { %7656 = shalt.err (!%p7653_p2)
}
  0x72   : > { %s7657_s20 = scalar_lea.vmem %s611_s26, 16  ;;  %s7664_s6 = scalar_lea.vmem %s611_s26, 32 }
  0x73   : > { %p7658_p5 = scmp.ne.s32.totalorder %s611_s26, %s7657_s20  ;;  %p7665_p4 = scmp.lt.s32.totalorder %s611_s26, %s611_s26 }
  0x74   : > { %p7666_p10 = scmp.lt.s32.totalorder %s7664_s6, %s7657_s20 }
  0x75   : > { %p7660_p7 = pnand %p7658_p5, %p8523_p8 }
  0x76   : > { %p7667_p1 = por %p7666_p10, %p7665_p4 }
  0x77   : > { %p7661_p9 = pneg %p7660_p7 }
  0x79   : > { %p7668_p3 = pnand %p7667_p1, %p7661_p9 }
  0x7b   : > { %7671 = shalt.err (!%p7668_p3)
}
  0x7c   : > { %6932 = dma.hbm_to_vmem [thread:$0]  (!%p8507_p6), %s9614_s27, 16, %s611_s26, [#allocation12]  }
  0x7d   : > { %s8325_s1 = smov [#allocation14]   ;;  %s8326_s24 = smov [#allocation17]  }
  0x7e   : > { %s633_s2 = sshll.u32 %s8325_s1, 4  ;;  %s659_s25 = sshll.u32 %s8326_s24, 4  ;;  %s634_s2 = int_to_ptr.vmem [resolvable:$true] %s633_s2  ;;  %s660_s25 = int_to_ptr.vmem [resolvable:$true] %s659_s25 }
  0x7f   : > { %s9615_s7 = sld [smem:[#allocation64_spill]] }
  0x85   : > { %s7672_s28 = scalar_lea.hbm %s9615_s7, 48 }
  0x86   : > { %p7673_p1 = scmp.ne.s32.totalorder %s9615_s7, %s7672_s28  ;;  %p7679_p12 = scmp.lt.u32.totalorder %s7672_s28, %s9615_s7 }
  0x88   : > { %p7675_p3 = pnand %p7673_p1, %p8523_p8 }
  0x8a   : > { %p7676_p11 = pneg %p7675_p3 }
  0x8c   : > { %p7681_p13 = pnand %p7679_p12, %p7676_p11 }
  0x8e   : > { %7684 = shalt.err (!%p7681_p13)
}
  0x8f   : > { %s7685_s26 = scalar_lea.vmem %s634_s2, 48  ;;  %s7692_s30 = scalar_lea.vmem %s634_s2, 64 }
  0x90   : > { %p7686_p0 = scmp.ne.s32.totalorder %s634_s2, %s7685_s26  ;;  %p7693_p7 = scmp.lt.s32.totalorder %s634_s2, %s634_s2 }
  0x91   : > { %p7694_p9 = scmp.lt.s32.totalorder %s7692_s30, %s7685_s26 }
  0x92   : > { %p7688_p2 = pnand %p7686_p0, %p8523_p8 }
  0x93   : > { %p7695_p4 = por %p7694_p9, %p7693_p7 }
  0x94   : > { %p7689_p5 = pneg %p7688_p2 }
  0x96   : > { %p7696_p10 = pnand %p7695_p4, %p7689_p5 }
  0x98   : > { %7699 = shalt.err (!%p7696_p10)
}
  0x99   : > { %s9577_s1 = smov 16   ;;  %s9579_s24 = smov 1  }
  0x9a   : > { %6938 = dma.hbm_to_vmem [thread:$0]  (!%p8507_p6), %s9615_s7, 48, %s634_s2, [#allocation15], %s9577_s1, %s9577_s1, %s9579_s24  }
  0x9b   : > { %s9616_s9 = sld [smem:[#allocation65_spill]] }
  0xa1   : > { %s7700_s20 = scalar_lea.hbm %s9616_s9, 144 }
  0xa2   : > { %p7701_p1 = scmp.ne.s32.totalorder %s9616_s9, %s7700_s20  ;;  %p7707_p12 = scmp.lt.u32.totalorder %s7700_s20, %s9616_s9 }
  0xa4   : > { %p7703_p3 = pnand %p7701_p1, %p8523_p8 }
  0xa6   : > { %p7704_p11 = pneg %p7703_p3 }
  0xa8   : > { %p7709_p13 = pnand %p7707_p12, %p7704_p11 }
  0xaa   : > { %7712 = shalt.err (!%p7709_p13)
}
  0xab   : > { %s7713_s28 = scalar_lea.vmem %s660_s25, 144  ;;  %s7720_s2 = scalar_lea.vmem %s660_s25, 160 }
  0xac   : > { %p7714_p0 = scmp.ne.s32.totalorder %s660_s25, %s7713_s28  ;;  %p7721_p7 = scmp.lt.s32.totalorder %s660_s25, %s660_s25 }
  0xad   : > { %p7722_p9 = scmp.lt.s32.totalorder %s7720_s2, %s7713_s28 }
  0xae   : > { %p7716_p2 = pnand %p7714_p0, %p8523_p8 }
  0xaf   : > { %p7723_p4 = por %p7722_p9, %p7721_p7 }
  0xb0   : > { %p7717_p5 = pneg %p7716_p2 }
  0xb2   : > { %p7724_p10 = pnand %p7723_p4, %p7717_p5 }
  0xb4   : > { %7727 = shalt.err (!%p7724_p10)
}
  0xb5   : > { %s8329_s18 = smov 48   ;;  %s8330_s3 = smov 3  }
  0xb6   : > { %6944 = dma.hbm_to_vmem [thread:$0]  (!%p8507_p6), %s9616_s9, 144, %s660_s25, [#allocation18], %s8329_s18, %s8329_s18, %s8330_s3  }
  0xb7   : > { %s8331_s6 = smov [#allocation20]   ;;  %s8332_s26 = smov [#allocation23]  }
  0xb8   : > { %s685_s29 = sshll.u32 %s8331_s6, 4  ;;  %s711_s30 = sshll.u32 %s8332_s26, 4  ;;  %s686_s29 = int_to_ptr.vmem [resolvable:$true] %s685_s29  ;;  %s712_s30 = int_to_ptr.vmem [resolvable:$true] %s711_s30 }
  0xb9   : > { %s9617_s11 = sld [smem:[#allocation66_spill]] }
  0xbf   : > { %s7728_s28 = scalar_lea.hbm %s9617_s11, 48 }
  0xc0   : > { %p7729_p1 = scmp.ne.s32.totalorder %s9617_s11, %s7728_s28  ;;  %p7735_p12 = scmp.lt.u32.totalorder %s7728_s28, %s9617_s11 }
  0xc2   : > { %p7731_p3 = pnand %p7729_p1, %p8523_p8 }
  0xc4   : > { %p7732_p11 = pneg %p7731_p3 }
  0xc6   : > { %p7737_p13 = pnand %p7735_p12, %p7732_p11 }
  0xc8   : > { %7740 = shalt.err (!%p7737_p13)
}
  0xc9   : > { %s7741_s25 = scalar_lea.vmem %s686_s29, 48  ;;  %s7748_s22 = scalar_lea.vmem %s686_s29, 64 }
  0xca   : > { %p7742_p0 = scmp.ne.s32.totalorder %s686_s29, %s7741_s25  ;;  %p7749_p7 = scmp.lt.s32.totalorder %s686_s29, %s686_s29 }
  0xcb   : > { %p7750_p9 = scmp.lt.s32.totalorder %s7748_s22, %s7741_s25 }
  0xcc   : > { %p7744_p2 = pnand %p7742_p0, %p8523_p8 }
  0xcd   : > { %p7751_p4 = por %p7750_p9, %p7749_p7 }
  0xce   : > { %p7745_p5 = pneg %p7744_p2 }
  0xd0   : > { %p7752_p10 = pnand %p7751_p4, %p7745_p5 }
  0xd2   : > { %7755 = shalt.err (!%p7752_p10)
}
  0xd3   : > { %s9618_s1 = smov 1   ;;  %s9619_s24 = smov 16  }
  0xd4   : > { %6950 = dma.hbm_to_vmem [thread:$0]  (!%p8507_p6), %s9617_s11, 48, %s686_s29, [#allocation21], %s9619_s24, %s9619_s24, %s9618_s1  }
  0xd5   : > { %s9620_s13 = sld [smem:[#allocation67_spill]] }
  0xdb   : > { %s7756_s0 = scalar_lea.hbm %s9620_s13, 48 }
  0xdc   : > { %p7757_p1 = scmp.ne.s32.totalorder %s9620_s13, %s7756_s0  ;;  %p7763_p12 = scmp.lt.u32.totalorder %s7756_s0, %s9620_s13 }
  0xde   : > { %p7759_p3 = pnand %p7757_p1, %p8523_p8 }
  0xe0   : > { %p7760_p11 = pneg %p7759_p3 }
  0xe2   : > { %p7765_p13 = pnand %p7763_p12, %p7760_p11 }
  0xe4   : > { %7768 = shalt.err (!%p7765_p13)
}
  0xe5   : > { %s7769_s2 = scalar_lea.vmem %s712_s30, 48  ;;  %s7776_s29 = scalar_lea.vmem %s712_s30, 64 }
  0xe6   : > { %p7770_p0 = scmp.ne.s32.totalorder %s712_s30, %s7769_s2  ;;  %p7777_p7 = scmp.lt.s32.totalorder %s712_s30, %s712_s30 }
  0xe7   : > { %p7778_p9 = scmp.lt.s32.totalorder %s7776_s29, %s7769_s2 }
  0xe8   : > { %p7772_p2 = pnand %p7770_p0, %p8523_p8 }
  0xe9   : > { %p7779_p4 = por %p7778_p9, %p7777_p7 }
  0xea   : > { %p7773_p5 = pneg %p7772_p2 }
  0xec   : > { %p7780_p10 = pnand %p7779_p4, %p7773_p5 }
  0xee   : > { %7783 = shalt.err (!%p7780_p10)
}
  0xef   : > { %6956 = dma.hbm_to_vmem [thread:$0]  (!%p8507_p6), %s9620_s13, 48, %s712_s30, [#allocation24], %s9619_s24, %s9619_s24, %s9618_s1  }
  0xf0   : > { %s8333_s7 = smov [#allocation26]   ;;  %s8334_s18 = smov [#allocation29]  }
  0xf1   : > { %s737_s4 = sshll.u32 %s8333_s7, 4  ;;  %s763_s3 = sshll.u32 %s8334_s18, 4  ;;  %s738_s4 = int_to_ptr.vmem [resolvable:$true] %s737_s4  ;;  %s764_s3 = int_to_ptr.vmem [resolvable:$true] %s763_s3 }
  0xf2   : > { %s9621_s15 = sld [smem:[#allocation68_spill]] }
  0xf8   : > { %s7784_s6 = scalar_lea.hbm %s9621_s15, 192 }
  0xf9   : > { %p7785_p1 = scmp.ne.s32.totalorder %s9621_s15, %s7784_s6  ;;  %p7791_p12 = scmp.lt.u32.totalorder %s7784_s6, %s9621_s15 }
  0xfb   : > { %p7787_p3 = pnand %p7785_p1, %p8523_p8 }
  0xfd   : > { %p7788_p11 = pneg %p7787_p3 }
  0xff   : > { %p7793_p13 = pnand %p7791_p12, %p7788_p11 }
 0x101   : > { %7796 = shalt.err (!%p7793_p13)
}
 0x102   : > { %s7797_s30 = scalar_lea.vmem %s738_s4, 192  ;;  %p7805_p7 = scmp.lt.s32.totalorder %s738_s4, %s738_s4 }
 0x103   : > { %p7798_p0 = scmp.ne.s32.totalorder %s738_s4, %s7797_s30  ;;  %p7806_p9 = scmp.lt.s32.totalorder %s7797_s30, %s7797_s30 }
 0x105   : > { %p7800_p2 = pnand %p7798_p0, %p8523_p8  ;;  %p7807_p4 = por %p7806_p9, %p7805_p7 }
 0x107   : > { %p7801_p5 = pneg %p7800_p2 }
 0x109   : > { %p7808_p10 = pnand %p7807_p4, %p7801_p5 }
 0x10b   : > { %7811 = shalt.err (!%p7808_p10)
}
 0x10c   : > { %s9622_s25 = smov 4   ;;  %s9623_s22 = smov 64  }
 0x10d   : > { %6962 = dma.hbm_to_vmem [thread:$0]  (!%p8507_p6), %s9621_s15, 192, %s738_s4, [#allocation27], %s9623_s22, %s9623_s22, %s9622_s25  }
 0x10e   : > { %s9624_s17 = sld [smem:[#allocation69_spill]] }
 0x114   : > { %s7812_s6 = scalar_lea.hbm %s9624_s17, 48 }
 0x115   : > { %p7813_p1 = scmp.ne.s32.totalorder %s9624_s17, %s7812_s6  ;;  %p7819_p12 = scmp.lt.u32.totalorder %s7812_s6, %s9624_s17 }
 0x117   : > { %p7815_p3 = pnand %p7813_p1, %p8523_p8 }
 0x119   : > { %p7816_p11 = pneg %p7815_p3 }
 0x11b   : > { %p7821_p13 = pnand %p7819_p12, %p7816_p11 }
 0x11d   : > { %7824 = shalt.err (!%p7821_p13)
}
 0x11e   : > { %s7825_s30 = scalar_lea.vmem %s764_s3, 48  ;;  %s7832_s4 = scalar_lea.vmem %s764_s3, 64 }
 0x11f   : > { %p7826_p0 = scmp.ne.s32.totalorder %s764_s3, %s7825_s30  ;;  %p7833_p7 = scmp.lt.s32.totalorder %s764_s3, %s764_s3 }
 0x120   : > { %p7834_p9 = scmp.lt.s32.totalorder %s7832_s4, %s7825_s30 }
 0x121   : > { %p7828_p2 = pnand %p7826_p0, %p8523_p8 }
 0x122   : > { %p7835_p4 = por %p7834_p9, %p7833_p7 }
 0x123   : > { %p7829_p5 = pneg %p7828_p2 }
 0x125   : > { %p7836_p10 = pnand %p7835_p4, %p7829_p5 }
 0x127   : > { %7839 = shalt.err (!%p7836_p10)
}
 0x128   : > { %6968 = dma.hbm_to_vmem [thread:$0]  (!%p8507_p6), %s9624_s17, 48, %s764_s3, [#allocation30], %s9619_s24, %s9619_s24, %s9618_s1  }
 0x129   : > { %s8335_s0 = smov [#allocation32]   ;;  %s8336_s6 = smov [#allocation7]  }
 0x12a   : > { %s788_s20 = sshll.u32 %s8335_s0, 4  ;;  %s572_s26 = sshll.u32 %s8336_s6, 4  ;;  %s789_s20 = int_to_ptr.vmem [resolvable:$true] %s788_s20  ;;  %s573_s26 = int_to_ptr.vmem [resolvable:$true] %s572_s26 }
 0x12b   : > { %s7840_s29 = scalar_lea.hbm %s9544_s19, 16 }
 0x12c   : > { %p7841_p1 = scmp.ne.s32.totalorder %s9544_s19, %s7840_s29  ;;  %p7847_p12 = scmp.lt.u32.totalorder %s7840_s29, %s9544_s19 }
 0x12e   : > { %p7843_p3 = pnand %p7841_p1, %p8523_p8 }
 0x130   : > { %p7844_p11 = pneg %p7843_p3 }
 0x132   : > { %p7849_p13 = pnand %p7847_p12, %p7844_p11 }
 0x134   : > { %7852 = shalt.err (!%p7849_p13)
}
 0x135   : > { %s7853_s3 = scalar_lea.vmem %s789_s20, 16  ;;  %s7860_s18 = scalar_lea.vmem %s789_s20, 32 }
 0x136   : > { %p7854_p0 = scmp.ne.s32.totalorder %s789_s20, %s7853_s3  ;;  %p7861_p7 = scmp.lt.s32.totalorder %s789_s20, %s789_s20 }
 0x137   : > { %p7862_p9 = scmp.lt.s32.totalorder %s7860_s18, %s7853_s3 }
 0x138   : > { %p7856_p2 = pnand %p7854_p0, %p8523_p8 }
 0x139   : > { %p7863_p4 = por %p7862_p9, %p7861_p7 }
 0x13a   : > { %p7857_p5 = pneg %p7856_p2 }
 0x13c   : > { %p7864_p10 = pnand %p7863_p4, %p7857_p5 }
 0x13e   : > { %7867 = shalt.err (!%p7864_p10)
}
 0x13f   : > { %6974 = dma.hbm_to_vmem [thread:$0]  (!%p8507_p6), %s9544_s19, 16, %s789_s20, [#allocation33]  }
 0x140   : > { %s9625_s2 = sld [smem:[#allocation59_spill]] }
 0x146   : > { %s7868_s29 = scalar_lea.hbm %s9625_s2, 512 }
 0x147   : > { %p7869_p1 = scmp.ne.s32.totalorder %s9625_s2, %s7868_s29  ;;  %p7875_p12 = scmp.lt.u32.totalorder %s7868_s29, %s9625_s2 }
 0x149   : > { %p7871_p3 = pnand %p7869_p1, %p8523_p8 }
 0x14b   : > { %p7872_p11 = pneg %p7871_p3 }
 0x14d   : > { %p7877_p13 = pnand %p7875_p12, %p7872_p11 }
 0x14f   : > { %7880 = shalt.err (!%p7877_p13)
}
 0x150   : > { %s7881_s18 = scalar_lea.vmem %s573_s26, 512  ;;  %p7889_p7 = scmp.lt.s32.totalorder %s573_s26, %s573_s26 }
 0x151   : > { %p7882_p0 = scmp.ne.s32.totalorder %s573_s26, %s7881_s18  ;;  %p7890_p9 = scmp.lt.s32.totalorder %s7881_s18, %s7881_s18 }
 0x153   : > { %p7884_p2 = pnand %p7882_p0, %p8523_p8  ;;  %p7891_p4 = por %p7890_p9, %p7889_p7 }
 0x155   : > { %p7885_p5 = pneg %p7884_p2 }
 0x157   : > { %p7892_p10 = pnand %p7891_p4, %p7885_p5 }
 0x159   : > { %7895 = shalt.err (!%p7892_p10)
}
 0x15a   : > { %s9626_s20 = smov 8   ;;  %s9627_s0 = smov 128  }
 0x15b   : > { %6923 = dma.hbm_to_vmem [thread:$0]  (!%p8507_p6), %s9625_s2, 512, %s573_s26, [#allocation6], %s9627_s0, %s9627_s0, %s9626_s20  }
 0x15c   : > { %s8337_s28 = smov [#allocation10]   ;;  %s8338_s30 = smov [#allocation13]  }
 0x15d   : > { %s599_s29 = sshll.u32 %s8337_s28, 4  ;;  %s620_s4 = sshll.u32 %s8338_s30, 4  ;;  %s600_s29 = int_to_ptr.vmem [resolvable:$true] %s599_s29  ;;  %s621_s4 = int_to_ptr.vmem [resolvable:$true] %s620_s4 }
 0x15e   : > { %s9628_s18 = sld [smem:[#allocation61_spill]] }
 0x164   : > { %s7896_s11 = scalar_lea.hbm %s9628_s18, 16 }
 0x165   : > { %p7897_p1 = scmp.ne.s32.totalorder %s9628_s18, %s7896_s11  ;;  %p7903_p12 = scmp.lt.u32.totalorder %s7896_s11, %s9628_s18 }
 0x167   : > { %p7899_p3 = pnand %p7897_p1, %p8523_p8 }
 0x169   : > { %p7900_p11 = pneg %p7899_p3 }
 0x16b   : > { %p7905_p13 = pnand %p7903_p12, %p7900_p11 }
 0x16d   : > { %7908 = shalt.err (!%p7905_p13)
}
 0x16e   : > { %s7909_s26 = scalar_lea.vmem %s600_s29, 16  ;;  %s7916_s9 = scalar_lea.vmem %s600_s29, 32 }
 0x16f   : > { %p7910_p0 = scmp.ne.s32.totalorder %s600_s29, %s7909_s26  ;;  %p7917_p7 = scmp.lt.s32.totalorder %s600_s29, %s600_s29 }
 0x170   : > { %p7918_p9 = scmp.lt.s32.totalorder %s7916_s9, %s7909_s26 }
 0x171   : > { %p7912_p2 = pnand %p7910_p0, %p8523_p8 }
 0x172   : > { %p7919_p4 = por %p7918_p9, %p7917_p7 }
 0x173   : > { %p7913_p5 = pneg %p7912_p2 }
 0x175   : > { %p7920_p10 = pnand %p7919_p4, %p7913_p5 }
 0x177   : > { %7923 = shalt.err (!%p7920_p10)
}
 0x178   : > { %6929 = dma.hbm_to_vmem [thread:$0]  (!%p8507_p6), %s9628_s18, 16, %s600_s29, [#allocation9]  }
 0x179   : > { %s9629_s28 = sld [smem:[#allocation63_spill]] }
 0x17f   : > { %s9630_s7 = smov %s9629_s28  ;;  %s7924_s30 = scalar_lea.hbm %s9629_s28, 48 }
 0x180   : > { %p7925_p1 = scmp.ne.s32.totalorder %s9630_s7, %s7924_s30  ;;  %p7931_p12 = scmp.lt.u32.totalorder %s7924_s30, %s9630_s7 }
 0x182   : > { %p7927_p3 = pnand %p7925_p1, %p8523_p8 }
 0x184   : > { %p7928_p11 = pneg %p7927_p3 }
 0x186   : > { %p7933_p13 = pnand %p7931_p12, %p7928_p11 }
 0x188   : > { %7936 = shalt.err (!%p7933_p13)
}
 0x189   : > { %s7937_s13 = scalar_lea.vmem %s621_s4, 48  ;;  %s7944_s29 = scalar_lea.vmem %s621_s4, 64 }
 0x18a   : > { %p7938_p0 = scmp.ne.s32.totalorder %s621_s4, %s7937_s13  ;;  %p7945_p7 = scmp.lt.s32.totalorder %s621_s4, %s621_s4 }
 0x18b   : > { %p7946_p9 = scmp.lt.s32.totalorder %s7944_s29, %s7937_s13 }
 0x18c   : > { %p7940_p2 = pnand %p7938_p0, %p8523_p8 }
 0x18d   : > { %p7947_p4 = por %p7946_p9, %p7945_p7 }
 0x18e   : > { %p7941_p5 = pneg %p7940_p2 }
 0x190   : > { %p7948_p10 = pnand %p7947_p4, %p7941_p5 }
 0x192   : > { %7951 = shalt.err (!%p7948_p10)
}
 0x193   : > { %6935 = dma.hbm_to_vmem [thread:$0]  (!%p8507_p6), %s9630_s7, 48, %s621_s4, [#allocation12], %s9619_s24, %s9619_s24, %s9618_s1  }
 0x194   : > { %s8339_s17 = smov [#allocation16]   ;;  %s7952_s6 = scalar_lea.hbm %s9533_s8, 9216 }
 0x195   : > { %s646_s28 = sshll.u32 %s8339_s17, 4  ;;  %p7953_p1 = scmp.ne.s32.totalorder %s9533_s8, %s7952_s6  ;;  %s647_s28 = int_to_ptr.vmem [resolvable:$true] %s646_s28 }
 0x196   : > { %p7959_p12 = scmp.lt.u32.totalorder %s7952_s6, %s9533_s8 }
 0x197   : > { %p7955_p3 = pnand %p7953_p1, %p8523_p8 }
 0x199   : > { %p7956_p11 = pneg %p7955_p3 }
 0x19b   : > { %p7961_p13 = pnand %p7959_p12, %p7956_p11 }
 0x19d   : > { %7964 = shalt.err (!%p7961_p13)
}
 0x19e   : > { %s7965_s4 = scalar_lea.vmem %s647_s28, 9216  ;;  %p7973_p7 = scmp.lt.s32.totalorder %s647_s28, %s647_s28 }
 0x19f   : > { %p7966_p0 = scmp.ne.s32.totalorder %s647_s28, %s7965_s4  ;;  %p7974_p9 = scmp.lt.s32.totalorder %s7965_s4, %s7965_s4 }
 0x1a1   : > { %p7968_p2 = pnand %p7966_p0, %p8523_p8  ;;  %p7975_p4 = por %p7974_p9, %p7973_p7 }
 0x1a3   : > { %p7969_p5 = pneg %p7968_p2 }
 0x1a5   : > { %p7976_p10 = pnand %p7975_p4, %p7969_p5 }
 0x1a7   : > { %7979 = shalt.err (!%p7976_p10)
}
 0x1a8   : > { %s8340_s15 = smov 192   ;;  %s8341_s11 = smov 12  }
 0x1a9   : > { %6941 = dma.hbm_to_vmem [thread:$0]  (!%p8507_p6), %s9533_s8, 9216, %s647_s28, [#allocation15], %s8340_s15, %s8340_s15, %s8341_s11  }
 0x1aa   : > { %s8342_s3 = smov [#allocation19]   ;;  %s8343_s26 = smov [#allocation22]  }
 0x1ab   : > { %s672_s6 = sshll.u32 %s8342_s3, 4  ;;  %s698_s9 = sshll.u32 %s8343_s26, 4  ;;  %s673_s6 = int_to_ptr.vmem [resolvable:$true] %s672_s6  ;;  %s8811_s9 = int_to_ptr.vmem [resolvable:$true] %s698_s9 }
 0x1ac   : > { %s7980_s4 = scalar_lea.hbm %s9535_s10, 3072 }
 0x1ad   : > { %p7981_p1 = scmp.ne.s32.totalorder %s9535_s10, %s7980_s4  ;;  %p7987_p12 = scmp.lt.u32.totalorder %s7980_s4, %s9535_s10 }
 0x1af   : > { %p7983_p3 = pnand %p7981_p1, %p8523_p8 }
 0x1b1   : > { %p7984_p11 = pneg %p7983_p3 }
 0x1b3   : > { %p7989_p13 = pnand %p7987_p12, %p7984_p11 }
 0x1b5   : > { %7992 = shalt.err (!%p7989_p13)
}
 0x1b6   : > { %s7993_s15 = scalar_lea.vmem %s673_s6, 3072  ;;  %p8001_p7 = scmp.lt.s32.totalorder %s673_s6, %s673_s6 }
 0x1b7   : > { %p7994_p0 = scmp.ne.s32.totalorder %s673_s6, %s7993_s15  ;;  %p8002_p9 = scmp.lt.s32.totalorder %s7993_s15, %s7993_s15 }
 0x1b9   : > { %p7996_p2 = pnand %p7994_p0, %p8523_p8  ;;  %p8003_p4 = por %p8002_p9, %p8001_p7 }
 0x1bb   : > { %p7997_p5 = pneg %p7996_p2 }
 0x1bd   : > { %p8004_p10 = pnand %p8003_p4, %p7997_p5 }
 0x1bf   : > { %8007 = shalt.err (!%p8004_p10)
}
 0x1c0   : > { %6947 = dma.hbm_to_vmem [thread:$0]  (!%p8507_p6), %s9535_s10, 3072, %s673_s6, [#allocation18], %s9623_s22, %s9623_s22, %s9622_s25  }
 0x1c1   : > { %s8008_s3 = scalar_lea.hbm %s9537_s12, 48 }
 0x1c2   : > { %p8009_p1 = scmp.ne.s32.totalorder %s9537_s12, %s8008_s3  ;;  %p8015_p12 = scmp.lt.u32.totalorder %s8008_s3, %s9537_s12 }
 0x1c4   : > { %p8011_p3 = pnand %p8009_p1, %p8523_p8 }
 0x1c6   : > { %p8012_p11 = pneg %p8011_p3 }
 0x1c8   : > { %p8017_p13 = pnand %p8015_p12, %p8012_p11 }
 0x1ca   : > { %8020 = shalt.err (!%p8017_p13)
}
 0x1cb   : > { %s8021_s6 = scalar_lea.vmem %s8811_s9, 48  ;;  %s8028_s17 = scalar_lea.vmem %s8811_s9, 64 }
 0x1cc   : > { %p8022_p0 = scmp.ne.s32.totalorder %s8811_s9, %s8021_s6  ;;  %p8029_p7 = scmp.lt.s32.totalorder %s8811_s9, %s8811_s9 }
 0x1cd   : > { %p8030_p9 = scmp.lt.s32.totalorder %s8028_s17, %s8021_s6 }
 0x1ce   : > { %p8024_p2 = pnand %p8022_p0, %p8523_p8 }
 0x1cf   : > { %p8031_p4 = por %p8030_p9, %p8029_p7 }
 0x1d0   : > { %p8025_p5 = pneg %p8024_p2 }
 0x1d2   : > { %p8032_p10 = pnand %p8031_p4, %p8025_p5 }
 0x1d4   : > { %8035 = shalt.err (!%p8032_p10)
}
 0x1d5   : > { %6953 = dma.hbm_to_vmem [thread:$0]  (!%p8507_p6), %s9537_s12, 48, %s8811_s9, [#allocation21], %s9619_s24, %s9619_s24, %s9618_s1  }
 0x1d6   : > { %s8344_s2 = smov [#allocation25]   ;;  %s8345_s11 = smov [#allocation28]  }
 0x1d7   : > { %s724_s7 = sshll.u32 %s8344_s2, 4  ;;  %s750_s30 = sshll.u32 %s8345_s11, 4  ;;  %s725_s7 = int_to_ptr.vmem [resolvable:$true] %s724_s7  ;;  %s751_s30 = int_to_ptr.vmem [resolvable:$true] %s750_s30 }
 0x1d8   : > { %s8036_s13 = scalar_lea.hbm %s9539_s14, 12288 }
 0x1d9   : > { %p8037_p1 = scmp.ne.s32.totalorder %s9539_s14, %s8036_s13  ;;  %p8043_p12 = scmp.lt.u32.totalorder %s8036_s13, %s9539_s14 }
 0x1db   : > { %p8039_p3 = pnand %p8037_p1, %p8523_p8 }
 0x1dd   : > { %p8040_p11 = pneg %p8039_p3 }
 0x1df   : > { %p8045_p13 = pnand %p8043_p12, %p8040_p11 }
 0x1e1   : > { %8048 = shalt.err (!%p8045_p13)
}
 0x1e2   : > { %s8049_s1 = scalar_lea.vmem %s725_s7, 12288  ;;  %p8057_p7 = scmp.lt.s32.totalorder %s725_s7, %s725_s7 }
 0x1e3   : > { %p8050_p0 = scmp.ne.s32.totalorder %s725_s7, %s8049_s1  ;;  %p8058_p9 = scmp.lt.s32.totalorder %s8049_s1, %s8049_s1 }
 0x1e5   : > { %p8052_p2 = pnand %p8050_p0, %p8523_p8  ;;  %p8059_p4 = por %p8058_p9, %p8057_p7 }
 0x1e7   : > { %p8053_p5 = pneg %p8052_p2 }
 0x1e9   : > { %p8060_p10 = pnand %p8059_p4, %p8053_p5 }
 0x1eb   : > { %8063 = shalt.err (!%p8060_p10)
}
 0x1ec   : > { %s8346_s9 = smov 256   ;;  %s8064_s3 = scalar_lea.hbm %s9541_s16, 12288 }
 0x1ed   : > { %6959 = dma.hbm_to_vmem [thread:$0]  (!%p8507_p6), %s9539_s14, 12288, %s725_s7, [#allocation24], %s8346_s9, %s8346_s9, %s9619_s24  }
 0x1ee   : > { %p8065_p1 = scmp.ne.s32.totalorder %s9541_s16, %s8064_s3  ;;  %p8071_p12 = scmp.lt.u32.totalorder %s8064_s3, %s9541_s16 }
 0x1f0   : > { %p8067_p3 = pnand %p8065_p1, %p8523_p8 }
 0x1f2   : > { %p8068_p11 = pneg %p8067_p3 }
 0x1f4   : > { %p8073_p13 = pnand %p8071_p12, %p8068_p11 }
 0x1f6   : > { %8076 = shalt.err (!%p8073_p13)
}
 0x1f7   : > { %s8077_s6 = scalar_lea.vmem %s751_s30, 12288  ;;  %p8085_p7 = scmp.lt.s32.totalorder %s751_s30, %s751_s30 }
 0x1f8   : > { %p8078_p0 = scmp.ne.s32.totalorder %s751_s30, %s8077_s6  ;;  %p8086_p9 = scmp.lt.s32.totalorder %s8077_s6, %s8077_s6 }
 0x1fa   : > { %p8080_p2 = pnand %p8078_p0, %p8523_p8  ;;  %p8087_p4 = por %p8086_p9, %p8085_p7 }
 0x1fc   : > { %p8081_p5 = pneg %p8080_p2 }
 0x1fe   : > { %p8088_p10 = pnand %p8087_p4, %p8081_p5 }
 0x200   : > { %8091 = shalt.err (!%p8088_p10)
}
 0x201   : > { %6965 = dma.hbm_to_vmem [thread:$0]  (!%p8507_p6), %s9541_s16, 12288, %s751_s30, [#allocation27], %s9623_s22, %s9623_s22, %s9622_s25  }
 0x202   : > { %s8347_s17 = smov [#allocation31]   ;;  %s8348_s9 = smov [#allocation34]  }
 0x203   : > { %s777_s1 = sshll.u32 %s8347_s17, 4  ;;  %s798_s28 = sshll.u32 %s8348_s9, 4  ;;  %s778_s1 = int_to_ptr.vmem [resolvable:$true] %s777_s1  ;;  %s799_s28 = int_to_ptr.vmem [resolvable:$true] %s798_s28 }
 0x204   : > { %s9631_s11 = sld [smem:[#allocation70_spill]] }
 0x20a   : > { %s8092_s3 = scalar_lea.hbm %s9631_s11, 16 }
 0x20b   : > { %p8093_p1 = scmp.ne.s32.totalorder %s9631_s11, %s8092_s3  ;;  %p8099_p12 = scmp.lt.u32.totalorder %s8092_s3, %s9631_s11 }
 0x20d   : > { %p8095_p3 = pnand %p8093_p1, %p8523_p8 }
 0x20f   : > { %p8096_p11 = pneg %p8095_p3 }
 0x211   : > { %p8101_p13 = pnand %p8099_p12, %p8096_p11 }
 0x213   : > { %8104 = shalt.err (!%p8101_p13)
}
 0x214   : > { %s8105_s30 = scalar_lea.vmem %s778_s1, 16  ;;  %s8112_s6 = scalar_lea.vmem %s778_s1, 32 }
 0x215   : > { %p8106_p0 = scmp.ne.s32.totalorder %s778_s1, %s8105_s30  ;;  %p8113_p7 = scmp.lt.s32.totalorder %s778_s1, %s778_s1 }
 0x216   : > { %p8114_p9 = scmp.lt.s32.totalorder %s8112_s6, %s8105_s30 }
 0x217   : > { %p8108_p2 = pnand %p8106_p0, %p8523_p8 }
 0x218   : > { %p8115_p4 = por %p8114_p9, %p8113_p7 }
 0x219   : > { %p8109_p5 = pneg %p8108_p2 }
 0x21b   : > { %p8116_p10 = pnand %p8115_p4, %p8109_p5 }
 0x21d   : > { %8119 = shalt.err (!%p8116_p10)
}
 0x21e   : > { %6971 = dma.hbm_to_vmem [thread:$0]  (!%p8507_p6), %s9631_s11, 16, %s778_s1, [#allocation30]  }
 0x21f   : > { %s9632_s15 = sld [smem:[#allocation71_spill]] }
 0x225   : > { %s8120_s2 = scalar_lea.hbm %s9632_s15, 1024 }
 0x226   : > { %p8121_p1 = scmp.ne.s32.totalorder %s9632_s15, %s8120_s2  ;;  %p8127_p12 = scmp.lt.u32.totalorder %s8120_s2, %s9632_s15 }
 0x228   : > { %p8123_p3 = pnand %p8121_p1, %p8523_p8 }
 0x22a   : > { %p8124_p11 = pneg %p8123_p3 }
 0x22c   : > { %p8129_p13 = pnand %p8127_p12, %p8124_p11 }
 0x22e   : > { %8132 = shalt.err (!%p8129_p13)
}
 0x22f   : > { %s8133_s4 = scalar_lea.vmem %s799_s28, 1024  ;;  %p8141_p7 = scmp.lt.s32.totalorder %s799_s28, %s799_s28 }
 0x230   : > { %p8134_p0 = scmp.ne.s32.totalorder %s799_s28, %s8133_s4  ;;  %p8142_p9 = scmp.lt.s32.totalorder %s8133_s4, %s8133_s4 }
 0x232   : > { %p8136_p2 = pnand %p8134_p0, %p8523_p8  ;;  %p8143_p4 = por %p8142_p9, %p8141_p7 }
 0x234   : > { %p8137_p5 = pneg %p8136_p2 }
 0x236   : > { %p8144_p10 = pnand %p8143_p4, %p8137_p5 }
 0x238   : > { %8147 = shalt.err (!%p8144_p10)
}
 0x239   : > { %6977 = dma.hbm_to_vmem [thread:$0]  (!%p8507_p6), %s9632_s15, 1024, %s799_s28, [#allocation33], %s9623_s22, %s9623_s22, %s9622_s25  }
 0x23a   : > { %s8349_s6 = smov [#allocation35]   ;;  %s9633_s9 = sld [smem:[#allocation72_spill]] }
 0x23b   : > { %s812_s24 = sshll.u32 %s8349_s6, 4  ;;  %s813_s24 = int_to_ptr.vmem [resolvable:$true] %s812_s24 }
 0x240   : > { %s8148_s2 = scalar_lea.hbm %s9633_s9, 16 }
 0x241   : > { %p8149_p1 = scmp.ne.s32.totalorder %s9633_s9, %s8148_s2  ;;  %p8155_p12 = scmp.lt.u32.totalorder %s8148_s2, %s9633_s9 }
 0x243   : > { %p8151_p3 = pnand %p8149_p1, %p8523_p8 }
 0x245   : > { %p8152_p11 = pneg %p8151_p3 }
 0x247   : > { %p8157_p13 = pnand %p8155_p12, %p8152_p11 }
 0x249   : > { %8160 = shalt.err (!%p8157_p13)
}
 0x24a   : > { %s8161_s25 = scalar_lea.vmem %s813_s24, 16  ;;  %s8168_s22 = scalar_lea.vmem %s813_s24, 32 }
 0x24b   : > { %p8162_p0 = scmp.ne.s32.totalorder %s813_s24, %s8161_s25  ;;  %p8169_p7 = scmp.lt.s32.totalorder %s813_s24, %s813_s24 }
 0x24c   : > { %p8170_p9 = scmp.lt.s32.totalorder %s8168_s22, %s8161_s25 }
 0x24d   : > { %p8164_p2 = pnand %p8162_p0, %p8523_p8 }
 0x24e   : > { %p8171_p4 = por %p8170_p9, %p8169_p7 }
 0x24f   : > { %p8165_p5 = pneg %p8164_p2 }
 0x251   : > { %p8172_p10 = pnand %p8171_p4, %p8165_p5 }
 0x253   : > { %8175 = shalt.err (!%p8172_p10)
}
 0x254   : > { %s9634_s1 = sld [smem:[#allocation54_spill]]  ;;  %s9635_s30 = sld [smem:[#allocation53_spill]] }
 0x255   : > { %s9636_s6 = sld [smem:[#allocation52_spill]]  ;;  %s9637_s23 = sld [smem:[#allocation51_spill]] }
 0x256   : > { %s9638_s7 = sld [smem:[#allocation55_spill]] }
 0x257   : > { %6980 = dma.hbm_to_vmem [thread:$0]  (!%p8507_p6), %s9633_s9, 16, %s813_s24, [#allocation36]  }
 0x25a   : > { %s5958_s17 = sadd.s32 4294967294, %s9634_s1   ;;  %s8960_s5 = sadd.s32 1, %s9634_s1  }
 0x25b   : > { %s53_s2 = ssub.s32 %s9634_s1, %s8960_s5  ;;  %s56_s3 = sadd.s32 1, %s9635_s30 }
 0x25c   : > { %p54_p8 = scmp.eq.s32.totalorder %s53_s2, 0  ;;  %p63_p1 = scmp.ne.s32.totalorder %s9635_s30, %s9636_s6 }
 0x25d   : > { %p64_p3 = scmp.eq.s32.totalorder %s9634_s1, 0  ;;  %p69_p11 = scmp.ne.s32.totalorder %s9636_s6, %s9637_s23 }
 0x25e   : > { %s8971_s26 = scalar_select %p54_p8, %s9635_s30, %s56_s3  }
 0x25f   : > { %p8973_p12 = por %p64_p3, %p63_p1  ;;  %p9640_p13 = scmp.eq.s32.totalorder %s9638_s7, 0 }
 0x260   : > { %p534_p0 = scmp.eq.s32.totalorder %s9638_s7, 1  ;;  %p540_p2 = scmp.eq.s32.totalorder %s5958_s17, 1 }
 0x261   : > { %p8979_p6 = por %p9640_p13, %p69_p11  ;;  %p7010_p5 = scmp.lt.s32.totalorder %s9634_s1, 2 }
 0x262   : > { %s823_s29 = sand.u32 1, %s9635_s30   ;;  %p8986_p7 = por %p534_p0, %p63_p1 }
 0x263   : > { %p8990_p9 = por %p540_p2, %p69_p11  ;;  %s5982_s28 = sshll.u32 %s823_s29, 5 }
 0x264   : > { %s9642_s25 = scalar_select %p8986_p7, 1, 0 }
 0x265   : > { %s9643_s22 = scalar_select %p8990_p9, 1, 0 }
 0x266   : > { %s6347_s4 = sshll.u32 %s9634_s1, 9  ;;  %s9644_s2 = sld [smem:[#allocation57_spill]] }
 0x267   : > { %s827_s30 = scalar_lea.vmem [#allocation2], %s5982_s28  ;;  %p9004_p4 = pnand %p7010_p5, %p8973_p12 }
 0x268   : > { %s834_s7 = sshll.u32 %s827_s30, 4  ;;  %s9008_s1 = scalar_lea.sflag [#allocation3], %s823_s29  ;;  %s9000_s7 = int_to_ptr.vmem [resolvable:$true] %s834_s7 }
 0x269   : > { %p8178_p8 = pneg %p9004_p4 }
 0x26c   : > { %s8998_s3 = scalar_lea.hbm %s9644_s2, %s6347_s4  ;;  %s8181_s13 = scalar_lea.hbm %s9644_s2, 1024 }
 0x26d   : > { %s8176_s6 = scalar_lea.hbm %s8998_s3, 512  ;;  %p8182_p11 = scmp.lt.u32.totalorder %s8998_s3, %s9644_s2 }
 0x26e   : > { %p8177_p10 = scmp.ne.s32.totalorder %s8998_s3, %s8176_s6  ;;  %p8183_p12 = scmp.lt.u32.totalorder %s8181_s13, %s8176_s6 }
 0x26f   : > { %p8185_p0 = scmp.lt.u32.totalorder %s8176_s6, %s8998_s3 }
 0x270   : > { %p8179_p1 = pnand %p8178_p8, %p8177_p10  ;;  %p8184_p13 = por %p8183_p12, %p8182_p11 }
 0x272   : > { %p8180_p3 = pneg %p8179_p1  ;;  %p8186_p2 = por %p8185_p0, %p8184_p13 }
 0x274   : > { %p8187_p5 = pnand %p8186_p2, %p8180_p3 }
 0x276   : > { %8190 = shalt.err (!%p8187_p5)
}
 0x277   : > { %s8191_s29 = scalar_lea.vmem %s9000_s7, 512  ;;  %s8350_s28 = smov [#allocation2]  }
 0x278   : > { %p8192_p10 = scmp.ne.s32.totalorder %s9000_s7, %s8191_s29  ;;  %s8196_s4 = sshll.u32 %s8350_s28, 4  ;;  %s8197_s4 = int_to_ptr.vmem [resolvable:$false] %s8196_s4 }
 0x279   : > { %s8198_s23 = scalar_lea.vmem %s8197_s4, 1024  ;;  %p8199_p7 = scmp.lt.s32.totalorder %s9000_s7, %s8197_s4 }
 0x27a   : > { %p8194_p1 = pnand %p8192_p10, %p8178_p8  ;;  %p8200_p11 = scmp.lt.s32.totalorder %s8198_s23, %s8191_s29 }
 0x27c   : > { %p8195_p9 = pneg %p8194_p1  ;;  %p8201_p12 = por %p8200_p11, %p8199_p7 }
 0x27e   : > { %p8202_p13 = pnand %p8201_p12, %p8195_p9 }
 0x280   : > { %8205 = shalt.err (!%p8202_p13)
}
 0x281   : > { %6984 = dma.hbm_to_vmem [thread:$0]  (!%p9004_p4), %s8998_s3, 512, %s9000_s7, %s9008_s1, %s9627_s0, %s9627_s0, %s9626_s20  }
 0x282   : > { %s9646_s6 = sld [smem:[#allocation56_spill]] }
 0x288   : > { %p9647_p8 = scmp.ne.s32.totalorder %s9646_s6, 0 }
 0x289   : > { %s9648_s13 = sld [smem:[#allocation52_spill]] (!%p9647_p8) }
 0x28a   : > { %846 = sbr.rel (%p9647_p8) target bundleno = 8660 (0x21d4), region = 108 }
 0x28f   : > { %s9042_s30 = sand.u32 (!%p9647_p8), 1, %s9648_s13  }
 0x290   : > { %s5986_s29 = sshll.u32 (!%p9647_p8), %s9042_s30, 5  ;;  %s849_s28 = scalar_lea.sflag (!%p9647_p8), [#allocation3], %s9042_s30 }
 0x291   : > { %s9048_s17 = scalar_lea.vmem [#allocation2], %s5986_s29 }
 0x292   : > { %8251 = dma.done.wait (%p8979_p6), %s849_s28, 512  }
 0x293   : > { %8253 = vsyncadd (%p8979_p6), %s849_s28, 4294966784  ;;  %s9649_s20 = sld [smem:[#allocation55_spill]] }
 0x299   : > { %p9650_p7 = scmp.eq.s32.totalorder %s9649_s20, 0 }
 0x29b   : > { %8255 = dma.done.wait (%p9650_p7), [#allocation6], 1536   ;;  %p9651_p9 = pmov %p9650_p7 }
 0x29c   : > { %p9652_p4 = pmov %p9650_p7 }
 0x29d   : > { %8257 = vsyncadd (%p9651_p9), [#allocation6], 4294965760 }
 0x29e   : > { %8259 = dma.done.wait (%p9652_p4), [#allocation9], 528   ;;  %p9653_p3 = pmov %p9652_p4 }
 0x2a0   : > { %8261 = vsyncadd (%p9653_p3), [#allocation9], 4294966768  ;;  %p9654_p0 = pmov %p9653_p3 }
 0x2a2   : > { %8263 = dma.done.wait (%p9654_p0), [#allocation12], 64   ;;  %p9655_p2 = pmov %p9654_p0 }
 0x2a3   : > { %p9656_p6 = pmov %p9654_p0 }
 0x2a4   : > { %8265 = vsyncadd (%p9655_p2), [#allocation12], 4294967232 }
 0x2a5   : > { %8267 = dma.done.wait (%p9656_p6), [#allocation15], 9264   ;;  %p9657_p5 = pmov %p9654_p0 }
 0x2a6   : > { %p9658_p10 = pmov %p9654_p0 }
 0x2a7   : > { %8269 = vsyncadd (%p9657_p5), [#allocation15], 4294958032 }
 0x2a8   : > { %8271 = dma.done.wait (%p9658_p10), [#allocation18], 3216   ;;  %p9659_p1 = pmov %p9654_p0 }
 0x2a9   : > { %p9660_p11 = pmov %p9654_p0 }
 0x2aa   : > { %8273 = vsyncadd (%p9659_p1), [#allocation18], 4294964080 }
 0x2ab   : > { %8275 = dma.done.wait (%p9660_p11), [#allocation21], 96   ;;  %p9661_p12 = pmov %p9654_p0 }
 0x2ac   : > { %p9662_p13 = pmov %p9654_p0 }
 0x2ad   : > { %8277 = vsyncadd (%p9661_p12), [#allocation21], 4294967200 }
 0x2ae   : > { %8279 = dma.done.wait (%p9662_p13), [#allocation24], 12336   ;;  %p9663_p8 = pmov %p9654_p0 }
 0x2af   : > { %p9664_p7 = pmov %p9654_p0 }
 0x2b0   : > { %8281 = vsyncadd (%p9663_p8), [#allocation24], 4294954960 }
 0x2b1   : > { %8283 = dma.done.wait (%p9664_p7), [#allocation27], 12480   ;;  %p9665_p9 = pmov %p9654_p0 }
 0x2b2   : > { %p9666_p4 = pmov %p9654_p0 }
 0x2b3   : > { %8285 = vsyncadd (%p9665_p9), [#allocation27], 4294954816 }
 0x2b4   : > { %8287 = dma.done.wait (%p9666_p4), [#allocation30], 64   ;;  %p9667_p3 = pmov %p9654_p0 }
 0x2b6   : > { %8289 = vsyncadd (%p9667_p3), [#allocation30], 4294967232 }
 0x2b7   : > { %8291 = dma.done.wait (%p9654_p0), [#allocation33], 1040   ;;  %p9668_p2 = pmov %p9654_p0 }
 0x2b8   : > { %p9669_p6 = pmov %p9654_p0 }
 0x2b9   : > { %8293 = vsyncadd (%p9668_p2), [#allocation33], 4294966256 }
 0x2ba   : > { %8295 = dma.done.wait (%p9669_p6), [#allocation36], 16   ;;  %p9670_p5 = pmov %p9654_p0 }
 0x2bb   : > { %v7100_v0 = vld [vmem:[#allocation5] sm:$0xff]   ;;  %v7101_v1 = vld [vmem:[#allocation5 + $0x8] sm:$0xff]   ;;  %v7102_v2 = vld [vmem:[#allocation5 + $0x10] sm:$0xff]   ;;  %vm1620_vm5 = vcmask 261120   ;;  %s996_s0 = scalar_lea.vmem [#allocation37], %s5986_s29  ;;  %s6348_s3 = sshll.u32 %s9649_s20, 9 }
 0x2bc   : > { %8297 = vsyncadd (%p9670_p5), [#allocation36], 4294967280  ;;  %6621 = vmatprep.subr.bf16.mxu0 %v7100_v0  ;;  %v7103_v3 = vld [vmem:[#allocation5 + $0x18] sm:$0xff]   ;;  %v998_v4 = vld [vmem:[%s9048_s17] sm:$0xff]  ;;  %s5685_s24 = sshll.u32 %s996_s0, 4  ;;  %s9679_s4 = sld [smem:[#allocation73_spill]]  ;;  %s9476_s24 = int_to_ptr.vmem [resolvable:$true] %s5685_s24 }
 0x2bd   : > { %6622 = vmatpush3.bf16.msra.mxu0 %v7100_v0  ;;  %v999_v5 = vld [vmem:[%s9048_s17 + $0x8] sm:$0xff]  ;;  %v7104_v7 = vld [vmem:[#allocation5 + $0x20] sm:$0xff]   ;;  %v7106_v9 = vld [vmem:[#allocation5 + $0x30] sm:$0xff]   ;;  %s5672_s6 = scalar_lea.sflag [#allocation4], %s9042_s30  ;;  %s8206_s13 = scalar_lea.vmem %s9476_s24, 512 }
 0x2be   : > { %6623 = vmatprep.subr.bf16.mxu0 %v7101_v1  ;;  %v1002_v6 = vpack.c.bf16 %v999_v5, %v998_v4  ;;  %v7105_v8 = vld [vmem:[#allocation5 + $0x28] sm:$0xff]   ;;  %v7107_v10 = vld [vmem:[#allocation5 + $0x38] sm:$0xff]   ;;  %v1000_v11 = vld [vmem:[%s9048_s17 + $0x10] sm:$0xff]  ;;  %p8207_p10 = scmp.ne.s32.totalorder %s9476_s24, %s8206_s13  ;;  %p9680_p1 = scmp.ne.s32.totalorder %s9642_s25, 0 }
 0x2bf   : > { %v1001_v12 = vld [vmem:[%s9048_s17 + $0x18] sm:$0xff]  ;;  %v1022_v14 = vld [vmem:[#allocation7 + $0x10] sm:$0xff]  ;;  %v1020_v15 = vld [vmem:[#allocation7] sm:$0xff]  ;;  %s8352_s29 = smov [#allocation37]  }
 0x2c0   : > { %6637 = vmatprep.mubr.bf16.mxu0 %v1002_v6  ;;  %v1003_v13 = vpack.c.bf16 %v1001_v12, %v1000_v11  ;;  %v1023_v20 = vld [vmem:[#allocation7 + $0x18] sm:$0xff]  ;;  %v1021_v23 = vld [vmem:[#allocation7 + $0x8] sm:$0xff]  ;;  %v6017_v55 = vld [vmem:[#allocation10] ss:$0 sm:$0xff]  ;;  %p8208_p11 = pnand %p8207_p10, %p9680_p1  ;;  %s8210_s28 = sshll.u32 %s8352_s29, 4  ;;  %s8211_s28 = int_to_ptr.vmem [resolvable:$false] %s8210_s28 }
 0x2c1   : > { %6624 = vmatpush3.bf16.msra.mxu0 %v7101_v1  ;;  %v6018_v57 = vld [vmem:[#allocation11] ss:$0 sm:$0xff]  ;;  %v1189_v4 = vld [vmem:[#allocation8 + $0x8] sm:$0xff]  ;;  %s8212_s17 = scalar_lea.vmem %s8211_s28, 1024  ;;  %p8213_p13 = scmp.lt.s32.totalorder %s9476_s24, %s8211_s28 }
 0x2c2   : > { %6625 = vmatprep.subr.bf16.mxu0 %v7102_v2  ;;  %v1188_v60 = vld [vmem:[#allocation8] sm:$0xff]  ;;  %s9481_s23 = scalar_lea.hbm %s9679_s4, %s6348_s3  ;;  %p8209_p12 = pneg %p8208_p11 }
 0x2c3   : > { %p8214_p8 = scmp.lt.s32.totalorder %s8212_s17, %s8206_s13 }
 0x2c5   : > { %6626 = vmatpush3.bf16.msra.mxu0 %v7102_v2  ;;  %p8215_p7 = por %p8214_p8, %p8213_p13 }
 0x2c6   : > { %6627 = vmatprep.subr.bf16.mxu0 %v7103_v3 }
 0x2c7   : > { %p8216_p9 = pnand %p8215_p7, %p8209_p12 }
 0x2c9   : > { %6628 = vmatpush3.bf16.msra.mxu0 %v7103_v3 }
 0x2ca   : > { %6629 = vmatprep.subr.bf16.mxu0 %v7104_v7 }
 0x2cd   : > { %6630 = vmatpush3.bf16.msra.mxu0 %v7104_v7  ;;  %v1190_v7 = vld [vmem:[#allocation8 + $0x10] sm:$0xff] }
 0x2ce   : > { %6631 = vmatprep.subr.bf16.mxu0 %v7105_v8 }
 0x2d1   : > { %6632 = vmatpush3.bf16.msra.mxu0 %v7105_v8 }
 0x2d2   : > { %6633 = vmatprep.subr.bf16.mxu0 %v7106_v9 }
 0x2d5   : > { %6634 = vmatpush3.bf16.msra.mxu0 %v7106_v9 }
 0x2d6   : > { %6635 = vmatprep.subr.bf16.mxu0 %v7107_v10 }
 0x2d9   : > { %6636 = vmatpush3.bf16.msra.mxu0 %v7107_v10 }
 0x2dc   : > { %6638 = vmatmul.mubr.bf16.vlgmr.msra.gmra.mrb[0].mxu0 %v1003_v13  ;;  %v1191_v13 = vld [vmem:[#allocation8 + $0x18] sm:$0xff] }
 0x3af   : > { %v6639_v16 = vpop.f32.mrb[0].mxu0 }
 0x3b0   : > { %v1115_v17 = vadd.f32 %v6639_v16, %v1022_v14  ;;  %v1106_v18 = vpop.f32.mrb[1].mxu0  ;;  %v7108_v16 = vld [vmem:[#allocation16 + $0x4] ss:$12 sps:$4 sm:$0xff]  }
 0x3b1   : > { %v1107_v19 = vadd.f32 %v1106_v18, %v1020_v15  ;;  %v6640_v21 = vpop.f32.mrb[2].mxu0  ;;  %v7111_v18 = vld [vmem:[#allocation16 + $0x1c] ss:$12 sps:$4 sm:$0xff]   ;;  %1457 = vmatprep.subr.bf16.mxu1 %v7108_v16 }
 0x3b2   : > { %1127 = vadd.xlane.f32.xlu1 %v1115_v17  ;;  %v1109_v22 = vpop.f32.mrb[3].mxu0  ;;  %v1118_v24 = vadd.f32 %v6640_v21, %v1023_v20 }
 0x3b3   : > { %1123 = vadd.xlane.f32.xlu0 %v1107_v19  ;;  %v1110_v25 = vadd.f32 %v1109_v22, %v1021_v23 }
 0x3b6   : > { %1129 = vadd.xlane.f32.xlu1 %v1118_v24 }
 0x3b7   : > { %1125 = vadd.xlane.f32.xlu0 %v1110_v25 }
 0x43f   : > { %v1128_v26 = vpop.xlane.xlu1 %1127 }
 0x440   : > { %v1124_v27 = vpop.xlane.xlu0 %1123  ;;  %v1134_v28 = vmul.f32 0.0078125, %v1128_v26 }
 0x441   : > { %v1132_v29 = vmul.f32 0.0078125, %v1124_v27 }
 0x442   : > { %v1138_v33 = vsub.f32 %v1115_v17, %v1134_v28  ;;  %v7110_v17 = vld [vmem:[#allocation16] ss:$12 sps:$4 sm:$0xff]  }
 0x443   : > { %v1136_v30 = vsub.f32 %v1107_v19, %v1132_v29  ;;  %v1130_v31 = vpop.xlane.xlu1 %1129  ;;  %v7113_v19 = vld [vmem:[#allocation16 + $0x8] ss:$12 sps:$4 sm:$0xff]   ;;  %1458 = vmatpush1.bf16.msra.mxu1 %v7110_v17  ;;  %v6020_v17 = vld [vmem:[#allocation14] ss:$0 sm:$0xff] }
 0x444   : > { %v1126_v32 = vpop.xlane.xlu0 %1125  ;;  %v1135_v34 = vmul.f32 0.0078125, %v1130_v31  ;;  %v1142_v39 = vmul.f32 %v1138_v33, %v1138_v33  ;;  %6641 = vmatprep.subr.bf16.mxu0 %v7113_v19  ;;  %1459 = vmatprep.subr.bf16.mxu1 %v7111_v18 }
 0x445   : > { %v1133_v35 = vmul.f32 0.0078125, %v1126_v32  ;;  %v1140_v36 = vmul.f32 %v1136_v30, %v1136_v30  ;;  %6642 = vmatpush3.bf16.msra.mxu0 %v7113_v19 }
 0x446   : > { %v1139_v38 = vsub.f32 %v1118_v24, %v1135_v34 }
 0x447   : > { %v1137_v37 = vsub.f32 %v1110_v25, %v1133_v35  ;;  %1144 = vadd.xlane.f32.xlu0 %v1140_v36  ;;  %v7114_v36 = vld [vmem:[#allocation16 + $0x18] ss:$12 sps:$4 sm:$0xff]  }
 0x448   : > { %v1143_v41 = vmul.f32 %v1139_v38, %v1139_v38  ;;  %1460 = vmatpush1.bf16.msra.mxu1 %v7114_v36 }
 0x449   : > { %v1141_v40 = vmul.f32 %v1137_v37, %v1137_v37 }
 0x44b   : > { %1148 = vadd.xlane.f32.xlu0 %v1142_v39  ;;  %1146 = vadd.xlane.f32.xlu1 %v1141_v40  ;;  %v7118_v39 = vld [vmem:[#allocation16 + $0x30] ss:$12 sps:$4 sm:$0xff]   ;;  %v7119_v40 = vld [vmem:[#allocation16 + $0x4c] ss:$12 sps:$4 sm:$0xff]  }
 0x44f   : > { %1150 = vadd.xlane.f32.xlu1 %v1143_v41  ;;  %v7121_v41 = vld [vmem:[#allocation16 + $0x38] ss:$12 sps:$4 sm:$0xff]  }
 0x4d4   : > { %v1145_v42 = vpop.xlane.xlu0 %1144 }
 0x4d5   : > { %v1152_v43 = vmul.f32 0.0078125, %v1145_v42  ;;  %v7122_v42 = vld [vmem:[#allocation16 + $0x48] ss:$12 sps:$4 sm:$0xff]  }
 0x4d7   : > { %v1156_v44 = vadd.f32 1e-05, %v1152_v43  ;;  %v7123_v43 = vld [vmem:[#allocation16 + $0x64] ss:$12 sps:$4 sm:$0xff]  }
 0x4d8   : > { %v1147_v45 = vpop.xlane.xlu1 %1146  ;;  %v1149_v46 = vpop.xlane.xlu0 %1148 }
 0x4d9   : > { %7476 = vrsqrt.f32 %v1156_v44  ;;  %v1153_v47 = vmul.f32 0.0078125, %v1147_v45  ;;  %v1154_v48 = vmul.f32 0.0078125, %v1149_v46  ;;  %v7125_v44 = vld [vmem:[#allocation16 + $0x50] ss:$12 sps:$4 sm:$0xff]   ;;  %v7126_v45 = vld [vmem:[#allocation16 + $0x60] ss:$12 sps:$4 sm:$0xff]  }
 0x4da   : > { %v7127_v46 = vld [vmem:[#allocation16 + $0x7c] ss:$12 sps:$4 sm:$0xff]  }
 0x4db   : > { %v1157_v49 = vadd.f32 1e-05, %v1153_v47  ;;  %v1158_v50 = vadd.f32 1e-05, %v1154_v48  ;;  %v7129_v47 = vld [vmem:[#allocation16 + $0x68] ss:$12 sps:$4 sm:$0xff]  }
 0x4dc   : > { %v1151_v51 = vpop.xlane.xlu1 %1150  ;;  %v7130_v48 = vld [vmem:[#allocation16 + $0x78] ss:$12 sps:$4 sm:$0xff]  }
 0x4dd   : > { %7478 = vrsqrt.f32 %v1157_v49  ;;  %v1155_v52 = vmul.f32 0.0078125, %v1151_v51  ;;  %v7131_v49 = vld [vmem:[#allocation16 + $0x94] ss:$12 sps:$4 sm:$0xff]   ;;  %v7134_v51 = vld [vmem:[#allocation16 + $0x90] ss:$12 sps:$4 sm:$0xff]  }
 0x4de   : > { %7480 = vrsqrt.f32 %v1158_v50  ;;  %v7133_v50 = vld [vmem:[#allocation16 + $0x80] ss:$12 sps:$4 sm:$0xff]  }
 0x4df   : > { %v1159_v53 = vadd.f32 1e-05, %v1155_v52  ;;  %v7135_v52 = vld [vmem:[#allocation16 + $0xac] ss:$12 sps:$4 sm:$0xff]  }
 0x4e1   : > { %7482 = vrsqrt.f32 %v1159_v53  ;;  %v7137_v53 = vld [vmem:[#allocation16 + $0x98] ss:$12 sps:$4 sm:$0xff]  }
 0x4e3   : > { %v7477_v54 = vpop.eup %7476 }
 0x4e4   : > { %v1164_v56 = vmul.f32 %v7477_v54, %v1136_v30  ;;  %v7138_v54 = vld [vmem:[#allocation16 + $0xa8] ss:$12 sps:$4 sm:$0xff]  }
 0x4e6   : > { %v1174_v58 = vmul.f32 %v6017_v55, %v1164_v56  ;;  %v7139_v56 = vld [vmem:[#allocation16 + $0xb0] ss:$12 sps:$4 sm:$0xff]  }
 0x4e7   : > { %v7479_v59 = vpop.eup %7478 }
 0x4e8   : > { %v7481_v61 = vpop.eup %7480  ;;  %v1184_v62 = vadd.f32 %v6018_v57, %v1174_v58  ;;  %v1165_v63 = vmul.f32 %v7479_v59, %v1137_v37  ;;  %v7115_v37 = vld [vmem:[#allocation16 + $0x34] ss:$12 sps:$4 sm:$0xff]  }
 0x4e9   : > { %v1166_v0 = vmul.f32 %v7481_v61, %v1138_v33  ;;  %1461 = vmatprep.subr.bf16.mxu1 %v7115_v37 }
 0x4ea   : > { %v9102_v1 = vadd.f32 %v1188_v60, %v1184_v62  ;;  %v1175_v2 = vmul.f32 %v6017_v55, %v1165_v63  ;;  %1462 = vmatpush1.bf16.msra.mxu1 %v7118_v39 }
 0x4eb   : > { %v7483_v3 = vpop.eup %7482  ;;  %v1176_v5 = vmul.f32 %v6017_v55, %v1166_v0  ;;  %1463 = vmatprep.subr.bf16.mxu1 %v7119_v40 }
 0x4ec   : > { %1214 = vadd.xlane.f32.xlu0 %v9102_v1  ;;  %v1185_v6 = vadd.f32 %v6018_v57, %v1175_v2  ;;  %v1167_v8 = vmul.f32 %v7483_v3, %v1139_v38  ;;  %v7117_v38 = vld [vmem:[#allocation16 + $0x20] ss:$12 sps:$4 sm:$0xff]  }
 0x4ed   : > { %v1186_v9 = vadd.f32 %v6018_v57, %v1176_v5  ;;  %6643 = vmatprep.subr.bf16.mxu0 %v7117_v38 }
 0x4ee   : > { %v9105_v10 = vadd.f32 %v1189_v4, %v1185_v6  ;;  %v1177_v11 = vmul.f32 %v6017_v55, %v1167_v8  ;;  %6644 = vmatpush3.bf16.msra.mxu0 %v7117_v38  ;;  %1464 = vmatpush1.bf16.msra.mxu1 %v7122_v42  ;;  %v8351_v55 = vmov 0   ;;  %v6019_v8 = vld [vmem:[#allocation13] ss:$0 sm:$0xff] }
 0x4ef   : > { %v9107_v12 = vadd.f32 %v1190_v7, %v1186_v9  ;;  %6645 = vmatprep.subr.bf16.mxu0 %v7121_v41  ;;  %1465 = vmatprep.subr.bf16.mxu1 %v7123_v43 }
 0x4f0   : > { %1216 = vadd.xlane.f32.xlu1 %v9105_v10  ;;  %v1187_v14 = vadd.f32 %v6018_v57, %v1177_v11  ;;  %1489 = vmatprep.mubr.bf16.mxu1 %v8351_v55 }
 0x4f1   : > { %1218 = vadd.xlane.f32.xlu0 %v9107_v12 }
 0x4f2   : > { %v9111_v15 = vadd.f32 %v1191_v13, %v1187_v14  ;;  %6646 = vmatpush3.bf16.msra.mxu0 %v7121_v41  ;;  %1466 = vmatpush1.bf16.msra.mxu1 %v7126_v45 }
 0x4f3   : > { %6647 = vmatprep.subr.bf16.mxu0 %v7125_v44  ;;  %1467 = vmatprep.subr.bf16.mxu1 %v7127_v46 }
 0x4f4   : > { %1220 = vadd.xlane.f32.xlu1 %v9111_v15 }
 0x4f6   : > { %6648 = vmatpush3.bf16.msra.mxu0 %v7125_v44  ;;  %1468 = vmatpush1.bf16.msra.mxu1 %v7130_v48 }
 0x4f7   : > { %6649 = vmatprep.subr.bf16.mxu0 %v7129_v47  ;;  %1469 = vmatprep.subr.bf16.mxu1 %v7131_v49 }
 0x4fa   : > { %6650 = vmatpush3.bf16.msra.mxu0 %v7129_v47  ;;  %1470 = vmatpush1.bf16.msra.mxu1 %v7134_v51 }
 0x4fb   : > { %6651 = vmatprep.subr.bf16.mxu0 %v7133_v50  ;;  %1471 = vmatprep.subr.bf16.mxu1 %v7135_v52 }
 0x4fe   : > { %6652 = vmatpush3.bf16.msra.mxu0 %v7133_v50  ;;  %1472 = vmatpush1.bf16.msra.mxu1 %v7138_v54 }
 0x4ff   : > { %6653 = vmatprep.subr.bf16.mxu0 %v7137_v53 }
 0x502   : > { %6654 = vmatpush3.bf16.msra.mxu0 %v7137_v53 }
 0x503   : > { %6655 = vmatprep.subr.bf16.mxu0 %v7139_v56 }
 0x506   : > { %6656 = vmatpush3.bf16.msra.mxu0 %v7139_v56 }
 0x579   : > { %v1215_v20 = vpop.xlane.xlu0 %1214 }
 0x57a   : > { %v1222_v21 = vmul.f32 0.0078125, %v1215_v20 }
 0x57c   : > { %v9115_v22 = vsub.f32 %v9102_v1, %v1222_v21 }
 0x57d   : > { %v1217_v23 = vpop.xlane.xlu1 %1216 }
 0x57e   : > { %v1223_v24 = vmul.f32 0.0078125, %v1217_v23  ;;  %v1219_v25 = vpop.xlane.xlu0 %1218  ;;  %v1230_v26 = vmul.f32 %v9115_v22, %v9115_v22 }
 0x57f   : > { %v1224_v27 = vmul.f32 0.0078125, %v1219_v25 }
 0x580   : > { %v9120_v28 = vsub.f32 %v9105_v10, %v1223_v24  ;;  %1234 = vadd.xlane.f32.xlu0 %v1230_v26 }
 0x581   : > { %v9123_v29 = vsub.f32 %v9107_v12, %v1224_v27  ;;  %v1221_v30 = vpop.xlane.xlu1 %1220 }
 0x582   : > { %v1225_v31 = vmul.f32 0.0078125, %v1221_v30  ;;  %v1231_v32 = vmul.f32 %v9120_v28, %v9120_v28 }
 0x583   : > { %v1232_v33 = vmul.f32 %v9123_v29, %v9123_v29 }
 0x584   : > { %v9130_v34 = vsub.f32 %v9111_v15, %v1225_v31  ;;  %1236 = vadd.xlane.f32.xlu1 %v1231_v32  ;;  %v1312_v32 = vld [vmem:[#allocation17] sm:$0x7] }
 0x585   : > { %1238 = vadd.xlane.f32.xlu0 %v1232_v33 }
 0x586   : > { %v1233_v35 = vmul.f32 %v9130_v34, %v9130_v34 }
 0x588   : > { %1240 = vadd.xlane.f32.xlu1 %v1233_v35 }
 0x60d   : > { %v1235_v57 = vpop.xlane.xlu0 %1234 }
 0x60e   : > { %v1242_v58 = vmul.f32 0.0078125, %v1235_v57 }
 0x610   : > { %v1246_v59 = vadd.f32 1e-05, %v1242_v58 }
 0x611   : > { %v1237_v60 = vpop.xlane.xlu1 %1236 }
 0x612   : > { %7484 = vrsqrt.f32 %v1246_v59  ;;  %v1243_v61 = vmul.f32 0.0078125, %v1237_v60  ;;  %v1239_v62 = vpop.xlane.xlu0 %1238 }
 0x613   : > { %v1244_v63 = vmul.f32 0.0078125, %v1239_v62 }
 0x614   : > { %v1247_v0 = vadd.f32 1e-05, %v1243_v61 }
 0x615   : > { %v1248_v2 = vadd.f32 1e-05, %v1244_v63  ;;  %v1241_v3 = vpop.xlane.xlu1 %1240 }
 0x616   : > { %7486 = vrsqrt.f32 %v1247_v0  ;;  %v1245_v4 = vmul.f32 0.0078125, %v1241_v3 }
 0x617   : > { %7488 = vrsqrt.f32 %v1248_v2 }
 0x618   : > { %v1249_v5 = vadd.f32 1e-05, %v1245_v4 }
 0x61a   : > { %7490 = vrsqrt.f32 %v1249_v5 }
 0x61c   : > { %v7485_v6 = vpop.eup %7484 }
 0x61d   : > { %v1254_v7 = vmul.f32 %v7485_v6, %v9115_v22 }
 0x61f   : > { %v1264_v14 = vmul.f32 %v6019_v8, %v1254_v7 }
 0x620   : > { %v7487_v9 = vpop.eup %7486 }
 0x621   : > { %v7489_v11 = vpop.eup %7488  ;;  %v1255_v13 = vmul.f32 %v7487_v9, %v9120_v28  ;;  %v1274_v21 = vadd.f32 %v6020_v17, %v1264_v14 }
 0x622   : > { %v1256_v16 = vmul.f32 %v7489_v11, %v9123_v29  ;;  %v1196_v29 = vlaneseq }
 0x623   : > { %v1265_v18 = vmul.f32 %v6019_v8, %v1255_v13 }
 0x624   : > { %v7491_v19 = vpop.eup %7490  ;;  %v1266_v24 = vmul.f32 %v6019_v8, %v1256_v16  ;;  %v9141_v30 = vshrl.u32 %v1196_v29, 7  ;;  %v1202_v6 = vand.u32 127, %v1196_v29 }
 0x625   : > { %v1257_v20 = vmul.f32 %v7491_v19, %v9130_v34  ;;  %v1275_v23 = vadd.f32 %v6020_v17, %v1265_v18 }
 0x626   : > { %v1276_v22 = vadd.f32 %v6020_v17, %v1266_v24  ;;  %v9144_v31 = vsub.s32 0, %v9141_v30  ;;  %v9147_v33 = vsub.s32 1, %v9141_v30  ;;  %v9151_v35 = vsub.s32 2, %v9141_v30 }
 0x627   : > { %v1278_v25 = vpack.c.bf16 %v1275_v23, %v1274_v21  ;;  %v1267_v26 = vmul.f32 %v6019_v8, %v1257_v20  ;;  %v1199_v7 = vadd.s32 16, %v9141_v30  ;;  %v1198_v8 = vadd.s32 8, %v9141_v30 }
 0x628   : > { %v1317_v34 = vrot.slane %v1312_v32, %v9144_v31  ;;  %v1321_v37 = vrot.slane %v1312_v32, %v9147_v33  ;;  %v1325_v43 = vrot.slane %v1312_v32, %v9151_v35  ;;  %vm1203_vm0 = vcmp.le.s32.totalorder %v1202_v6, %v9141_v30 }
 0x629   : > { %1490 = vmatmul.mubr.bf16.vlgmr.msra.gmra.mrb[0].mxu1 %v1278_v25  ;;  %6657 = vmatprep.mubr.bf16.mxu0 %v1278_v25  ;;  %v1277_v27 = vadd.f32 %v6020_v17, %v1267_v26  ;;  %vm1207_vm1 = vcmp.lt.s32.totalorder %v1202_v6, 24  ;;  %v1200_v9 = vadd.s32 24, %v9141_v30  ;;  %vm1205_vm2 = vcmp.le.s32.totalorder %v1202_v6, %v1199_v7 }
 0x62a   : > { %1499 = vmatprep.mubr.bf16.mxu1 %v8351_v55  ;;  %vm1204_vm3 = vcmp.le.s32.totalorder %v1202_v6, %v1198_v8  ;;  %vm9160_vm4 = vmand %vm1203_vm0, %vm1207_vm1 }
 0x62b   : > { %v1279_v28 = vpack.c.bf16 %v1277_v27, %v1276_v22  ;;  %vm9165_vm6 = vmand %vm1205_vm2, %vm1207_vm1  ;;  %vm1206_vm7 = vcmp.le.s32.totalorder %v1202_v6, %v1200_v9 }
 0x62c   : > { %vm9170_vm8 = vmand %vm1204_vm3, %vm1207_vm1 }
 0x62d   : > { %6658 = vmatmul.mubr.bf16.vlgmr.msra.gmra.mrb[4].mxu0 %v1279_v28  ;;  %vm9178_vm9 = vmand %vm1206_vm7, %vm1207_vm1 }
 0x62e   : > { %2164 = vmatprep.mubr.bf16.mxu0 %v8351_v55 }
 0x631   : > { %1500 = vmatmul.mubr.bf16.gmra.mrb[4].mxu1 %v1279_v28 }
 0x6fc   : > { %v1491_v36 = vpop.f32.mrb[0].mxu1 }
 0x6fd   : > { %v1493_v38 = vpop.f32.mrb[1].mxu1  ;;  %v1492_v40 = vadd.f32 %v1491_v36, %v1317_v34 }
 0x6fe   : > { %v1495_v39 = vpop.f32.mrb[2].mxu1  ;;  %v1494_v44 = vadd.f32 %v1493_v38, %v1321_v37 }
 0x6ff   : > { %v1496_v41 = vadd.f32 %v1495_v39, %v1317_v34  ;;  %v1497_v42 = vpop.f32.mrb[3].mxu1 }
 0x700   : > { %v1498_v45 = vadd.f32 %v1497_v42, %v1321_v37  ;;  %v6659_v46 = vpop.f32.mrb[4].mxu0 }
 0x701   : > { %v1559_v47 = vpack.c.bf16 %v1496_v41, %v1492_v40  ;;  %v1544_v48 = vpop.f32.mrb[5].mxu0  ;;  %v1553_v51 = vadd.f32 %v6659_v46, %v1325_v43 }
 0x702   : > { %v1561_v49 = vpack.c.bf16 %v1498_v45, %v1494_v44  ;;  %v6660_v50 = vpop.f32.mrb[6].mxu0  ;;  %v1545_v54 = vadd.f32 %v1544_v48, %v1325_v43 }
 0x703   : > { %v1556_v52 = vadd.f32 %v6660_v50, %v1325_v43  ;;  %v1547_v53 = vpop.f32.mrb[7].mxu0  ;;  %6665 = vmatprep.mubr.bf16.mxu1 %v1559_v47 }
 0x704   : > { %v1548_v56 = vadd.f32 %v1547_v53, %v1325_v43  ;;  %v1501_v57 = vpop.f32.mrb[4].mxu1  ;;  %6661 = vmatprep.subr.bf16.mxu1 %v1561_v49 }
 0x705   : > { %v1668_v58 = vpack.c.bf16 %v1556_v52, %v1553_v51  ;;  %v1503_v59 = vpop.f32.mrb[5].mxu1  ;;  %6662 = vmatpush3.bf16.xpose.msra.mxu1 %v1561_v49  ;;  %v1502_v62 = vadd.f32 %v1501_v57, %v1317_v34 }
 0x706   : > { %v1667_v60 = vpack.c.bf16 %v1548_v56, %v1545_v54  ;;  %v1505_v61 = vpop.f32.mrb[6].mxu1  ;;  %v1504_v2 = vadd.f32 %v1503_v59, %v1321_v37 }
 0x707   : > { %v1506_v63 = vadd.f32 %v1505_v61, %v1317_v34  ;;  %v1507_v0 = vpop.f32.mrb[7].mxu1 }
 0x708   : > { %v1508_v3 = vadd.f32 %v1507_v0, %v1321_v37 }
 0x709   : > { %v1560_v4 = vpack.c.bf16 %v1506_v63, %v1502_v62 }
 0x70a   : > { %v1562_v5 = vpack.c.bf16 %v1508_v3, %v1504_v2 }
 0x70c   : > { %6663 = vmatprep.subr.bf16.mxu1 %v1562_v5 }
 0x70d   : > { %6664 = vmatpush3.bf16.xpose.msra.mxu1 %v1562_v5 }
 0x70e   : > { %6669 = vmatprep.subr.bf16.mxu1 %v1667_v60 }
 0x714   : > { %6666 = vmatmul.mubr.bf16.vlgmr.msra.gmra.mrb[8].mxu1 %v1560_v4 }
 0x715   : > { %6670 = vmatpush3.bf16.msra.mxu1 %v1667_v60 }
 0x716   : > { %6671 = vmatprep.subr.bf16.mxu1 %v1668_v58 }
 0x719   : > { %6672 = vmatpush3.bf16.msra.mxu1 %v1668_v58  ;;  %v7140_v58 = vld [vmem:[#allocation19] sm:$0xff]  }
 0x71a   : > { %6677 = vmatprep.subr.bf16.mxu1 %v7140_v58 }
 0x7e7   : > { %v6667_v11 = vpop.f32.mrb[8].mxu1 }
 0x7e8   : > { %v1597_v13 = vpop.f32.mrb[9].mxu1  ;;  %v1614_v16 = vmul.f32 0.088388346, %v6667_v11  ;;  %v7141_v11 = vld [vmem:[#allocation19 + $0x8] sm:$0xff]  }
 0x7e9   : > { %v1612_v17 = vmul.f32 0.088388346, %v1597_v13  ;;  %v6668_v18 = vpop.f32.mrb[10].mxu1  ;;  %v7142_v13 = vld [vmem:[#allocation19 + $0x10] sm:$0xff]  }
 0x7ea   : > { %v1600_v20 = vpop.f32.mrb[11].mxu1  ;;  %v1615_v23 = vmul.f32 0.088388346, %v6668_v18  ;;  %v1618_v28 = vsel %vm9165_vm6, %v1614_v16, -1e+30  ;;  %v7143_v16 = vld [vmem:[#allocation19 + $0x18] sm:$0xff]  }
 0x7eb   : > { %v1613_v24 = vmul.f32 0.088388346, %v1600_v20  ;;  %v1616_v25 = vsel %vm9160_vm4, %v1612_v17, -1e+30  ;;  %v1627_v34 = vsel %vm1620_vm5, %v1618_v28, -inf  ;;  %v7144_v17 = vld [vmem:[#allocation19 + $0x20] sm:$0xff]  }
 0x7ec   : > { %v1621_v26 = vsel %vm1620_vm5, %v1616_v25, -inf  ;;  %v1619_v32 = vsel %vm9178_vm9, %v1615_v23, -1e+30  ;;  %v7145_v18 = vld [vmem:[#allocation19 + $0x28] sm:$0xff]   ;;  %v7146_v20 = vld [vmem:[#allocation19 + $0x30] sm:$0xff]   ;;  %v7147_v23 = vld [vmem:[#allocation19 + $0x38] sm:$0xff]  }
 0x7ed   : > { %1622 = vmax.xlane.f32.xlu0 %v1621_v26  ;;  %v1617_v27 = vsel %vm9170_vm8, %v1613_v24, -1e+30  ;;  %v1630_v36 = vsel %vm1620_vm5, %v1619_v32, -inf }
 0x7ee   : > { %v1624_v29 = vsel %vm1620_vm5, %v1617_v27, -inf }
 0x7ef   : > { %1625 = vmax.xlane.f32.xlu1 %v1624_v29 }
 0x7f1   : > { %1628 = vmax.xlane.f32.xlu0 %v1627_v34 }
 0x7f3   : > { %1631 = vmax.xlane.f32.xlu1 %v1630_v36 }
 0x87a   : > { %v1623_v37 = vpop.xlane.xlu0 %1622 }
 0x87b   : > { %v1633_v38 = vsub.f32 %v1616_v25, %v1623_v37 }
 0x87c   : > { %v1626_v39 = vpop.xlane.xlu1 %1625 }
 0x87d   : > { %v1637_v40 = vmul.f32 1.442695, %v1633_v38  ;;  %v1634_v41 = vsub.f32 %v1617_v27, %v1626_v39 }
 0x87e   : > { %v1629_v42 = vpop.xlane.xlu0 %1628 }
 0x87f   : > { %7492 = vpow2.f32 %v1637_v40  ;;  %v1639_v43 = vmul.f32 1.442695, %v1634_v41  ;;  %v1635_v44 = vsub.f32 %v1618_v28, %v1629_v42 }
 0x880   : > { %v1632_v45 = vpop.xlane.xlu1 %1631 }
 0x881   : > { %7494 = vpow2.f32 %v1639_v43  ;;  %v1641_v46 = vmul.f32 1.442695, %v1635_v44  ;;  %v1636_v47 = vsub.f32 %v1619_v32, %v1632_v45  ;;  %v6047_v32 = vld [vmem:[#allocation20] ss:$0 sm:$0xff] }
 0x883   : > { %7496 = vpow2.f32 %v1641_v46  ;;  %v1643_v48 = vmul.f32 1.442695, %v1636_v47  ;;  %v7150_v47 = vld [vmem:[#allocation25 + $0x4] ss:$16 sps:$4 sm:$0xff]  }
 0x884   : > { %2132 = vmatprep.subr.bf16.mxu0 %v7150_v47 }
 0x885   : > { %7498 = vpow2.f32 %v1643_v48  ;;  %v7151_v48 = vld [vmem:[#allocation25 + $0x8] ss:$16 sps:$4 sm:$0xff]  }
 0x889   : > { %v7493_v49 = vpop.eup %7492 }
 0x88a   : > { %v1645_v50 = vsel %vm1620_vm5, %v7493_v49, 0.0 }
 0x88b   : > { %v7495_v51 = vpop.eup %7494  ;;  %1646 = vadd.xlane.f32.xlu0 %v1645_v50  ;;  %v7159_v50 = vld [vmem:[#allocation25 + $0x2c] ss:$16 sps:$4 sm:$0xff]  }
 0x88c   : > { %v1648_v52 = vsel %vm1620_vm5, %v7495_v51, 0.0 }
 0x88d   : > { %v7497_v53 = vpop.eup %7496  ;;  %1649 = vadd.xlane.f32.xlu1 %v1648_v52 }
 0x88e   : > { %v1651_v54 = vsel %vm1620_vm5, %v7497_v53, 0.0 }
 0x88f   : > { %v7499_v56 = vpop.eup %7498  ;;  %1652 = vadd.xlane.f32.xlu0 %v1651_v54 }
 0x890   : > { %v1654_v57 = vsel %vm1620_vm5, %v7499_v56, 0.0 }
 0x891   : > { %1655 = vadd.xlane.f32.xlu1 %v1654_v57 }
 0x918   : > { %v1647_v59 = vpop.xlane.xlu0 %1646 }
 0x919   : > { %7500 = vrcp.f32 %v1647_v59 }
 0x91a   : > { %v1650_v60 = vpop.xlane.xlu1 %1649 }
 0x91b   : > { %7502 = vrcp.f32 %v1650_v60 }
 0x91c   : > { %v1653_v61 = vpop.xlane.xlu0 %1652 }
 0x91d   : > { %7504 = vrcp.f32 %v1653_v61 }
 0x91e   : > { %v1656_v62 = vpop.xlane.xlu1 %1655 }
 0x91f   : > { %7506 = vrcp.f32 %v1656_v62 }
 0x923   : > { %v7501_v63 = vpop.eup %7500 }
 0x924   : > { %v1661_v2 = vmul.f32 %v7501_v63, %v7493_v49  ;;  %v7153_v49 = vld [vmem:[#allocation25 + $0xc] ss:$16 sps:$4 sm:$0xff]  }
 0x925   : > { %v7503_v0 = vpop.eup %7502 }
 0x926   : > { %v1662_v3 = vmul.f32 %v7503_v0, %v7495_v51  ;;  %v7157_v51 = vld [vmem:[#allocation25 + $0x28] ss:$16 sps:$4 sm:$0xff]  }
 0x927   : > { %v7505_v4 = vpop.eup %7504 }
 0x928   : > { %v1665_v5 = vpack.c.bf16 %v1662_v3, %v1661_v2  ;;  %v1663_v7 = vmul.f32 %v7505_v4, %v7497_v53 }
 0x929   : > { %v7507_v6 = vpop.eup %7506 }
 0x92a   : > { %v1664_v8 = vmul.f32 %v7507_v6, %v7499_v56  ;;  %6673 = vmatprep.mubr.msk.bf16.mxu1 %vm1620_vm5, %v1665_v5  ;;  %v7162_v5 = vld [vmem:[#allocation25 + $0x44] ss:$16 sps:$4 sm:$0xff]   ;;  %v7165_v6 = vld [vmem:[#allocation25 + $0x4c] ss:$16 sps:$4 sm:$0xff]  }
 0x92c   : > { %v1666_v9 = vpack.c.bf16 %v1664_v8, %v1663_v7  ;;  %v7160_v7 = vld [vmem:[#allocation25 + $0x40] ss:$16 sps:$4 sm:$0xff]   ;;  %v7163_v8 = vld [vmem:[#allocation25 + $0x48] ss:$16 sps:$4 sm:$0xff]  }
 0x92e   : > { %6674 = vmatmul.mubr.msk.bf16.vlgmr.msra.gmra.mrb[12].mxu1 %vm1620_vm5, %v1666_v9  ;;  %v7168_v9 = vld [vmem:[#allocation25 + $0x64] ss:$16 sps:$4 sm:$0xff]  }
 0x92f   : > { %6678 = vmatpush3.bf16.msra.mxu1 %v7140_v58 }
 0x930   : > { %6679 = vmatprep.subr.bf16.mxu1 %v7141_v11 }
 0x933   : > { %6680 = vmatpush3.bf16.msra.mxu1 %v7141_v11  ;;  %v7171_v11 = vld [vmem:[#allocation25 + $0x6c] ss:$16 sps:$4 sm:$0xff]  }
 0x934   : > { %6681 = vmatprep.subr.bf16.mxu1 %v7142_v13 }
 0x937   : > { %6682 = vmatpush3.bf16.msra.mxu1 %v7142_v13  ;;  %v7166_v13 = vld [vmem:[#allocation25 + $0x60] ss:$16 sps:$4 sm:$0xff]  }
 0x938   : > { %6683 = vmatprep.subr.bf16.mxu1 %v7143_v16 }
 0x93b   : > { %6684 = vmatpush3.bf16.msra.mxu1 %v7143_v16  ;;  %v7169_v16 = vld [vmem:[#allocation25 + $0x68] ss:$16 sps:$4 sm:$0xff]  }
 0x93c   : > { %6685 = vmatprep.subr.bf16.mxu1 %v7144_v17 }
 0x93f   : > { %6686 = vmatpush3.bf16.msra.mxu1 %v7144_v17  ;;  %v7174_v17 = vld [vmem:[#allocation25 + $0x84] ss:$16 sps:$4 sm:$0xff]  }
 0x940   : > { %6687 = vmatprep.subr.bf16.mxu1 %v7145_v18 }
 0x943   : > { %6688 = vmatpush3.bf16.msra.mxu1 %v7145_v18  ;;  %v7177_v18 = vld [vmem:[#allocation25 + $0x8c] ss:$16 sps:$4 sm:$0xff]  }
 0x944   : > { %6689 = vmatprep.subr.bf16.mxu1 %v7146_v20 }
 0x947   : > { %6690 = vmatpush3.bf16.msra.mxu1 %v7146_v20  ;;  %v7172_v20 = vld [vmem:[#allocation25 + $0x80] ss:$16 sps:$4 sm:$0xff]  }
 0x948   : > { %6691 = vmatprep.subr.bf16.mxu1 %v7147_v23 }
 0x94b   : > { %6692 = vmatpush3.bf16.msra.mxu1 %v7147_v23  ;;  %v7175_v23 = vld [vmem:[#allocation25 + $0x88] ss:$16 sps:$4 sm:$0xff]  }
 0x94c   : > { %2185 = vmatprep.subr.bf16.mxu1 %v7153_v49 }
 0xa01   : > { %v6675_v24 = vpop.f32.mrb[12].mxu1 }
 0xa02   : > { %v1709_v25 = vpop.f32.mrb[13].mxu1 }
 0xa03   : > { %v6676_v26 = vpop.f32.mrb[14].mxu1 }
 0xa04   : > { %v1725_v27 = vpack.c.bf16 %v6676_v26, %v6675_v24  ;;  %v1712_v28 = vpop.f32.mrb[15].mxu1  ;;  %v7180_v24 = vld [vmem:[#allocation25 + $0xa4] ss:$16 sps:$4 sm:$0xff]   ;;  %v7178_v26 = vld [vmem:[#allocation25 + $0xa0] ss:$16 sps:$4 sm:$0xff]  }
 0xa05   : > { %v1724_v29 = vpack.c.bf16 %v1712_v28, %v1709_v25  ;;  %v7183_v25 = vld [vmem:[#allocation25 + $0xac] ss:$16 sps:$4 sm:$0xff]   ;;  %v7186_v28 = vld [vmem:[#allocation25 + $0xc4] ss:$16 sps:$4 sm:$0xff]  }
 0xa07   : > { %6693 = vmatprep.mubr.bf16.mxu1 %v1724_v29  ;;  %v7189_v29 = vld [vmem:[#allocation25 + $0xcc] ss:$16 sps:$4 sm:$0xff]  }
 0xa08   : > { %6694 = vmatmul.mubr.bf16.vlgmr.msra.gmra.mrb[16].mxu1 %v1725_v27  ;;  %v7181_v27 = vld [vmem:[#allocation25 + $0xa8] ss:$16 sps:$4 sm:$0xff]  }
 0xa09   : > { %2217 = vmatprep.mubr.bf16.mxu1 %v8351_v55  ;;  %2186 = vmatpush1.bf16.msra.mxu1 %v7151_v48 }
 0xa0a   : > { %2187 = vmatprep.subr.bf16.mxu1 %v7159_v50 }
 0xa0d   : > { %2188 = vmatpush1.bf16.msra.mxu1 %v7157_v51 }
 0xa0e   : > { %2189 = vmatprep.subr.bf16.mxu1 %v7165_v6 }
 0xa11   : > { %2190 = vmatpush1.bf16.msra.mxu1 %v7163_v8 }
 0xa12   : > { %2191 = vmatprep.subr.bf16.mxu1 %v7171_v11 }
 0xa15   : > { %2192 = vmatpush1.bf16.msra.mxu1 %v7169_v16  ;;  %v7198_v16 = vld [vmem:[#allocation28] sm:$0xff]  }
 0xa16   : > { %2193 = vmatprep.subr.bf16.mxu1 %v7177_v18  ;;  %v7200_v18 = vld [vmem:[#allocation28 + $0x48] sm:$0xff]  }
 0xa19   : > { %2194 = vmatpush1.bf16.msra.mxu1 %v7175_v23  ;;  %v7202_v23 = vld [vmem:[#allocation28 + $0x8] sm:$0xff]  }
 0xa1a   : > { %2195 = vmatprep.subr.bf16.mxu1 %v7183_v25 }
 0xa1d   : > { %2196 = vmatpush1.bf16.msra.mxu1 %v7181_v27  ;;  %v7206_v27 = vld [vmem:[#allocation28 + $0x10] sm:$0xff]  }
 0xa1e   : > { %2197 = vmatprep.subr.bf16.mxu1 %v7189_v29  ;;  %v7208_v29 = vld [vmem:[#allocation28 + $0x58] sm:$0xff]  }
 0xadb   : > { %v6695_v34 = vpop.f32.mrb[16].mxu1 }
 0xadc   : > { %v1831_v36 = vpop.f32.mrb[17].mxu1  ;;  %v1840_v40 = vadd.f32 %v6695_v34, %v6047_v32  ;;  %v7187_v34 = vld [vmem:[#allocation25 + $0xc8] ss:$16 sps:$4 sm:$0xff]  }
 0xadd   : > { %v1832_v37 = vadd.f32 %v6047_v32, %v1831_v36  ;;  %v6696_v38 = vpop.f32.mrb[18].mxu1  ;;  %v7192_v36 = vld [vmem:[#allocation25 + $0xe4] ss:$16 sps:$4 sm:$0xff]   ;;  %2198 = vmatpush1.bf16.msra.mxu1 %v7187_v34 }
 0xade   : > { %v1834_v39 = vpop.f32.mrb[19].mxu1  ;;  %v1843_v43 = vadd.f32 %v6696_v38, %v6047_v32  ;;  %v9206_v45 = vadd.f32 %v1840_v40, %v9107_v12  ;;  %v7154_v12 = vld [vmem:[#allocation25 + $0x20] ss:$16 sps:$4 sm:$0xff]   ;;  %v7210_v34 = vld [vmem:[#allocation28 + $0x18] sm:$0xff]  }
 0xadf   : > { %v9199_v41 = vadd.f32 %v1832_v37, %v9102_v1  ;;  %v1835_v42 = vadd.f32 %v6047_v32, %v1834_v39  ;;  %v7148_v1 = vld [vmem:[#allocation25] ss:$16 sps:$4 sm:$0xff]   ;;  %v7195_v37 = vld [vmem:[#allocation25 + $0xec] ss:$16 sps:$4 sm:$0xff]   ;;  %v7193_v39 = vld [vmem:[#allocation25 + $0xe8] ss:$16 sps:$4 sm:$0xff]  }
 0xae0   : > { %v9210_v46 = vadd.f32 %v1843_v43, %v9111_v15  ;;  %2133 = vmatpush1.bf16.msra.mxu0 %v7148_v1  ;;  %v7184_v32 = vld [vmem:[#allocation25 + $0xc0] ss:$16 sps:$4 sm:$0xff]   ;;  %2199 = vmatprep.subr.bf16.mxu1 %v7195_v37 }
 0xae1   : > { %v9202_v44 = vadd.f32 %v1835_v42, %v9105_v10  ;;  %1852 = vadd.xlane.f32.xlu0 %v9199_v41  ;;  %v7156_v10 = vld [vmem:[#allocation25 + $0x24] ss:$16 sps:$4 sm:$0xff]   ;;  %v7190_v38 = vld [vmem:[#allocation25 + $0xe0] ss:$16 sps:$4 sm:$0xff]   ;;  %2200 = vmatpush1.bf16.msra.mxu1 %v7193_v39 }
 0xae2   : > { %2134 = vmatprep.subr.bf16.mxu0 %v7156_v10  ;;  %v7196_v40 = vld [vmem:[#allocation28 + $0x40] sm:$0xff]  }
 0xae3   : > { %1854 = vadd.xlane.f32.xlu1 %v9202_v44  ;;  %v7197_v42 = vld [vmem:[#allocation28 + $0xc0] sm:$0xff]  }
 0xae4   : > { %2135 = vmatpush1.bf16.msra.mxu0 %v7154_v12  ;;  %6415 = vmatprep.subr.bf16.mxu1 %v7197_v42  ;;  %v7212_v37 = vld [vmem:[#allocation28 + $0x60] sm:$0xff]   ;;  %v7216_v42 = vld [vmem:[#allocation28 + $0x68] sm:$0xff]  }
 0xae5   : > { %1856 = vadd.xlane.f32.xlu0 %v9206_v45  ;;  %2136 = vmatprep.subr.bf16.mxu0 %v7162_v5  ;;  %v7214_v39 = vld [vmem:[#allocation28 + $0x20] sm:$0xff]  }
 0xae7   : > { %1858 = vadd.xlane.f32.xlu1 %v9210_v46 }
 0xae8   : > { %2137 = vmatpush1.bf16.msra.mxu0 %v7160_v7 }
 0xae9   : > { %2138 = vmatprep.subr.bf16.mxu0 %v7168_v9 }
 0xaec   : > { %2139 = vmatpush1.bf16.msra.mxu0 %v7166_v13 }
 0xaed   : > { %2140 = vmatprep.subr.bf16.mxu0 %v7174_v17  ;;  %v7199_v17 = vld [vmem:[#allocation28 + $0x80] sm:$0xff]  }
 0xaf0   : > { %2141 = vmatpush1.bf16.msra.mxu0 %v7172_v20 }
 0xaf1   : > { %2142 = vmatprep.subr.bf16.mxu0 %v7180_v24  ;;  %v7205_v24 = vld [vmem:[#allocation28 + $0xd0] sm:$0xff]  }
 0xaf4   : > { %2143 = vmatpush1.bf16.msra.mxu0 %v7178_v26 }
 0xaf5   : > { %2144 = vmatprep.subr.bf16.mxu0 %v7186_v28  ;;  %v7207_v28 = vld [vmem:[#allocation28 + $0x90] sm:$0xff]  }
 0xaf8   : > { %2145 = vmatpush1.bf16.msra.mxu0 %v7184_v32  ;;  %v7209_v32 = vld [vmem:[#allocation28 + $0xd8] sm:$0xff]  }
 0xaf9   : > { %2146 = vmatprep.subr.bf16.mxu0 %v7192_v36  ;;  %v7211_v36 = vld [vmem:[#allocation28 + $0x98] sm:$0xff]  }
 0xafc   : > { %2147 = vmatpush1.bf16.msra.mxu0 %v7190_v38  ;;  %v7213_v38 = vld [vmem:[#allocation28 + $0xe0] sm:$0xff]  }
 0xafd   : > { %6387 = vmatprep.subr.bf16.mxu0 %v7196_v40  ;;  %v7215_v40 = vld [vmem:[#allocation28 + $0xa0] sm:$0xff]  }
 0xb6e   : > { %v1853_v15 = vpop.xlane.xlu0 %1852 }
 0xb6f   : > { %v1860_v52 = vmul.f32 0.0078125, %v1853_v15 }
 0xb70   : > { %v1855_v53 = vpop.xlane.xlu1 %1854 }
 0xb71   : > { %v9215_v54 = vsub.f32 %v9199_v41, %v1860_v52  ;;  %v1861_v56 = vmul.f32 0.0078125, %v1855_v53 }
 0xb72   : > { %v1857_v57 = vpop.xlane.xlu0 %1856 }
 0xb73   : > { %v9218_v58 = vsub.f32 %v9202_v44, %v1861_v56  ;;  %v1862_v59 = vmul.f32 0.0078125, %v1857_v57  ;;  %v1868_v60 = vmul.f32 %v9215_v54, %v9215_v54  ;;  %v6056_v57 = vld [vmem:[#allocation22] ss:$0 sm:$0xff] }
 0xb74   : > { %v1859_v61 = vpop.xlane.xlu1 %1858 }
 0xb75   : > { %v9223_v62 = vsub.f32 %v9206_v45, %v1862_v59  ;;  %v1863_v63 = vmul.f32 0.0078125, %v1859_v61  ;;  %1872 = vadd.xlane.f32.xlu0 %v1868_v60  ;;  %v1869_v0 = vmul.f32 %v9218_v58, %v9218_v58 }
 0xb77   : > { %v9228_v2 = vsub.f32 %v9210_v46, %v1863_v63  ;;  %1874 = vadd.xlane.f32.xlu1 %v1869_v0  ;;  %v1870_v3 = vmul.f32 %v9223_v62, %v9223_v62 }
 0xb79   : > { %1876 = vadd.xlane.f32.xlu0 %v1870_v3  ;;  %v1871_v4 = vmul.f32 %v9228_v2, %v9228_v2  ;;  %v6057_v3 = vld [vmem:[#allocation23] ss:$0 sm:$0xff] }
 0xb7b   : > { %1878 = vadd.xlane.f32.xlu1 %v1871_v4 }
 0xc02   : > { %v1873_v43 = vpop.xlane.xlu0 %1872 }
 0xc03   : > { %v1880_v1 = vmul.f32 0.0078125, %v1873_v43  ;;  %v7217_v43 = vld [vmem:[#allocation28 + $0xe8] sm:$0xff]  }
 0xc04   : > { %v1875_v47 = vpop.xlane.xlu1 %1874 }
 0xc05   : > { %v1884_v48 = vadd.f32 1e-05, %v1880_v1  ;;  %v1881_v49 = vmul.f32 0.0078125, %v1875_v47  ;;  %v7218_v1 = vld [vmem:[#allocation28 + $0x28] sm:$0xff]  }
 0xc06   : > { %v1877_v10 = vpop.xlane.xlu0 %1876  ;;  %v7219_v47 = vld [vmem:[#allocation28 + $0xa8] sm:$0xff]  }
 0xc07   : > { %7508 = vrsqrt.f32 %v1884_v48  ;;  %v1885_v50 = vadd.f32 1e-05, %v1881_v49  ;;  %v1882_v12 = vmul.f32 0.0078125, %v1877_v10  ;;  %v7220_v48 = vld [vmem:[#allocation28 + $0x70] sm:$0xff]  }
 0xc08   : > { %v1879_v51 = vpop.xlane.xlu1 %1878  ;;  %v7221_v49 = vld [vmem:[#allocation28 + $0xf0] sm:$0xff]  }
 0xc09   : > { %7510 = vrsqrt.f32 %v1885_v50  ;;  %v1886_v15 = vadd.f32 1e-05, %v1882_v12  ;;  %v1883_v52 = vmul.f32 0.0078125, %v1879_v51  ;;  %v7222_v10 = vld [vmem:[#allocation28 + $0x30] sm:$0xff]   ;;  %v7224_v12 = vld [vmem:[#allocation28 + $0x78] sm:$0xff]  }
 0xc0a   : > { %v7223_v50 = vld [vmem:[#allocation28 + $0xb0] sm:$0xff]   ;;  %v7225_v51 = vld [vmem:[#allocation28 + $0xf8] sm:$0xff]  }
 0xc0b   : > { %7512 = vrsqrt.f32 %v1886_v15  ;;  %v1887_v53 = vadd.f32 1e-05, %v1883_v52  ;;  %v7226_v15 = vld [vmem:[#allocation28 + $0x38] sm:$0xff]  }
 0xc0c   : > { %v7227_v52 = vld [vmem:[#allocation28 + $0xb8] sm:$0xff]  }
 0xc0d   : > { %7514 = vrsqrt.f32 %v1887_v53  ;;  %v1950_v53 = vld [vmem:[#allocation26] sm:$0xf] }
 0xc11   : > { %v7509_v56 = vpop.eup %7508 }
 0xc12   : > { %v1892_v59 = vmul.f32 %v7509_v56, %v9215_v54  ;;  %v7201_v54 = vld [vmem:[#allocation28 + $0xc8] sm:$0xff]   ;;  %v9241_v56 = vsub.s32 3, %v9141_v30 }
 0xc13   : > { %v7511_v60 = vpop.eup %7510 }
 0xc14   : > { %v1893_v61 = vmul.f32 %v7511_v60, %v9218_v58  ;;  %v1902_v63 = vmul.f32 %v6056_v57, %v1892_v59  ;;  %v1963_v59 = vrot.slane %v1950_v53, %v9151_v35  ;;  %v1959_v60 = vrot.slane %v1950_v53, %v9147_v33 }
 0xc15   : > { %v7513_v0 = vpop.eup %7512 }
 0xc16   : > { %v1903_v4 = vmul.f32 %v6056_v57, %v1893_v61  ;;  %v1912_v6 = vadd.f32 %v6057_v3, %v1902_v63  ;;  %v1894_v8 = vmul.f32 %v7513_v0, %v9223_v62  ;;  %v7203_v62 = vld [vmem:[#allocation28 + $0x88] sm:$0xff]   ;;  %v1967_v61 = vrot.slane %v1950_v53, %v9241_v56 }
 0xc17   : > { %v7515_v5 = vpop.eup %7514 }
 0xc18   : > { %v1913_v7 = vadd.f32 %v6057_v3, %v1903_v4  ;;  %v1895_v9 = vmul.f32 %v7515_v5, %v9228_v2  ;;  %v1904_v58 = vmul.f32 %v6056_v57, %v1894_v8  ;;  %v7204_v2 = vld [vmem:[#allocation28 + $0x50] sm:$0xff]  }
 0xc1a   : > { %v1916_v11 = vpack.c.bf16 %v1913_v7, %v1912_v6  ;;  %v1905_v13 = vmul.f32 %v6056_v57, %v1895_v9  ;;  %v1914_v25 = vadd.f32 %v6057_v3, %v1904_v58  ;;  %v1955_v57 = vrot.slane %v1950_v53, %v9144_v31 }
 0xc1c   : > { %2165 = vmatmul.mubr.bf16.vlgmr.msra.gmra.mrb[8].mxu0 %v1916_v11  ;;  %2218 = vmatmul.mubr.bf16.vlgmr.msra.gmra.mrb[20].mxu1 %v1916_v11  ;;  %v1915_v20 = vadd.f32 %v6057_v3, %v1905_v13 }
 0xc1d   : > { %2174 = vmatprep.mubr.bf16.mxu0 %v8351_v55  ;;  %2227 = vmatprep.mubr.bf16.mxu1 %v8351_v55 }
 0xc1e   : > { %6388 = vmatpush3.bf16.msra.mxu0 %v7198_v16  ;;  %6416 = vmatpush3.bf16.msra.mxu1 %v7199_v17  ;;  %v1917_v26 = vpack.c.bf16 %v1915_v20, %v1914_v25 }
 0xc1f   : > { %6389 = vmatprep.subr.bf16.mxu0 %v7200_v18  ;;  %6417 = vmatprep.subr.bf16.mxu1 %v7201_v54 }
 0xc22   : > { %6390 = vmatpush3.bf16.msra.mxu0 %v7202_v23  ;;  %6418 = vmatpush3.bf16.msra.mxu1 %v7203_v62 }
 0xc23   : > { %6391 = vmatprep.subr.bf16.mxu0 %v7204_v2  ;;  %6419 = vmatprep.subr.bf16.mxu1 %v7205_v24 }
 0xc24   : > { %2175 = vmatmul.mubr.bf16.gmra.mrb[12].mxu0 %v1917_v26  ;;  %2228 = vmatmul.mubr.bf16.gmra.mrb[24].mxu1 %v1917_v26 }
 0xc26   : > { %6392 = vmatpush3.bf16.msra.mxu0 %v7206_v27  ;;  %6420 = vmatpush3.bf16.msra.mxu1 %v7207_v28 }
 0xc27   : > { %6393 = vmatprep.subr.bf16.mxu0 %v7208_v29  ;;  %6421 = vmatprep.subr.bf16.mxu1 %v7209_v32 }
 0xc2a   : > { %6394 = vmatpush3.bf16.msra.mxu0 %v7210_v34  ;;  %6422 = vmatpush3.bf16.msra.mxu1 %v7211_v36 }
 0xc2b   : > { %6395 = vmatprep.subr.bf16.mxu0 %v7212_v37  ;;  %6423 = vmatprep.subr.bf16.mxu1 %v7213_v38 }
 0xc2e   : > { %6396 = vmatpush3.bf16.msra.mxu0 %v7214_v39  ;;  %6424 = vmatpush3.bf16.msra.mxu1 %v7215_v40 }
 0xc2f   : > { %6397 = vmatprep.subr.bf16.mxu0 %v7216_v42  ;;  %6425 = vmatprep.subr.bf16.mxu1 %v7217_v43 }
 0xc32   : > { %6398 = vmatpush3.bf16.msra.mxu0 %v7218_v1  ;;  %6426 = vmatpush3.bf16.msra.mxu1 %v7219_v47 }
 0xc33   : > { %6399 = vmatprep.subr.bf16.mxu0 %v7220_v48  ;;  %6427 = vmatprep.subr.bf16.mxu1 %v7221_v49 }
 0xc36   : > { %6400 = vmatpush3.bf16.msra.mxu0 %v7222_v10  ;;  %6428 = vmatpush3.bf16.msra.mxu1 %v7223_v50 }
 0xc37   : > { %6401 = vmatprep.subr.bf16.mxu0 %v7224_v12  ;;  %6429 = vmatprep.subr.bf16.mxu1 %v7225_v51 }
 0xc3a   : > { %6402 = vmatpush3.bf16.msra.mxu0 %v7226_v15  ;;  %6430 = vmatpush3.bf16.msra.mxu1 %v7227_v52 }
 0xcef   : > { %v2166_v63 = vpop.f32.mrb[8].mxu0  ;;  %v2219_v0 = vpop.f32.mrb[20].mxu1 }
 0xcf0   : > { %v2167_v3 = vadd.f32 %v2166_v63, %v1955_v57  ;;  %v2220_v4 = vadd.f32 %v2219_v0, %v1963_v59  ;;  %v2168_v5 = vpop.f32.mrb[9].mxu0  ;;  %v2221_v6 = vpop.f32.mrb[21].mxu1 }
 0xcf1   : > { %v2169_v7 = vadd.f32 %v2168_v5, %v1959_v60  ;;  %v2222_v8 = vadd.f32 %v2221_v6, %v1967_v61  ;;  %v2170_v9 = vpop.f32.mrb[10].mxu0  ;;  %v2223_v11 = vpop.f32.mrb[22].mxu1 }
 0xcf2   : > { %v2171_v30 = vadd.f32 %v2170_v9, %v1955_v57  ;;  %v2224_v13 = vadd.f32 %v2223_v11, %v1963_v59  ;;  %v2172_v16 = vpop.f32.mrb[11].mxu0  ;;  %v2225_v17 = vpop.f32.mrb[23].mxu1  ;;  %v2238_v58 = vmax.f32 %v2167_v3, 0.0  ;;  %v2240_v20 = vmax.f32 %v2220_v4, 0.0 }
 0xcf3   : > { %v2173_v18 = vadd.f32 %v2172_v16, %v1959_v60  ;;  %v2226_v54 = vadd.f32 %v2225_v17, %v1967_v61  ;;  %v2239_v2 = vmax.f32 %v2169_v7, 0.0  ;;  %v2241_v24 = vmax.f32 %v2222_v8, 0.0 }
 0xcf4   : > { %v2242_v23 = vmax.f32 %v2171_v30, 0.0  ;;  %v2244_v62 = vmax.f32 %v2224_v13, 0.0 }
 0xcf5   : > { %v2243_v25 = vmax.f32 %v2173_v18, 0.0  ;;  %v2245_v26 = vmax.f32 %v2226_v54, 0.0 }
 0xcf6   : > { %v2254_v27 = vpack.c.bf16 %v2242_v23, %v2238_v58  ;;  %v2256_v28 = vpack.c.bf16 %v2244_v62, %v2240_v20 }
 0xcf7   : > { %v2255_v29 = vpack.c.bf16 %v2243_v25, %v2239_v2  ;;  %v2257_v32 = vpack.c.bf16 %v2245_v26, %v2241_v24  ;;  %v2176_v34 = vpop.f32.mrb[12].mxu0  ;;  %v2229_v36 = vpop.f32.mrb[24].mxu1 }
 0xcf8   : > { %v2177_v37 = vadd.f32 %v2176_v34, %v1955_v57  ;;  %v2230_v38 = vadd.f32 %v2229_v36, %v1963_v59  ;;  %v2178_v39 = vpop.f32.mrb[13].mxu0  ;;  %v2231_v40 = vpop.f32.mrb[25].mxu1 }
 0xcf9   : > { %v2179_v42 = vadd.f32 %v2178_v39, %v1959_v60  ;;  %v2232_v43 = vadd.f32 %v2231_v40, %v1967_v61  ;;  %v2180_v1 = vpop.f32.mrb[14].mxu0  ;;  %v2233_v47 = vpop.f32.mrb[26].mxu1  ;;  %2557 = vmatprep.mubr.bf16.mxu0 %v2255_v29  ;;  %2606 = vmatprep.mubr.bf16.mxu1 %v2257_v32 }
 0xcfa   : > { %v2181_v48 = vadd.f32 %v2180_v1, %v1955_v57  ;;  %v2234_v49 = vadd.f32 %v2233_v47, %v1963_v59  ;;  %v2182_v10 = vpop.f32.mrb[15].mxu0  ;;  %v2235_v50 = vpop.f32.mrb[27].mxu1  ;;  %2558 = vmatmul.mubr.bf16.vlgmr.msra.gmra.mrb[16].mxu0 %v2254_v27  ;;  %2607 = vmatmul.mubr.bf16.vlgmr.msra.gmra.mrb[28].mxu1 %v2256_v28  ;;  %v2246_v15 = vmax.f32 %v2177_v37, 0.0  ;;  %v2248_v52 = vmax.f32 %v2230_v38, 0.0 }
 0xcfb   : > { %v2183_v12 = vadd.f32 %v2182_v10, %v1959_v60  ;;  %v2236_v51 = vadd.f32 %v2235_v50, %v1967_v61  ;;  %v2247_v0 = vmax.f32 %v2179_v42, 0.0  ;;  %v2249_v3 = vmax.f32 %v2232_v43, 0.0  ;;  %v6090_v60 = vld [vmem:[#allocation29] ss:$0 sm:$0xff]  ;;  %v7230_v50 = vld [vmem:[#allocation16 + $0xc4] ss:$12 sps:$4 sm:$0xff]  }
 0xcfc   : > { %v2250_v53 = vmax.f32 %v2181_v48, 0.0  ;;  %v2252_v63 = vmax.f32 %v2234_v49, 0.0  ;;  %2876 = vmatprep.subr.bf16.mxu0 %v7230_v50 }
 0xcfd   : > { %v2251_v4 = vmax.f32 %v2183_v12, 0.0  ;;  %v2253_v5 = vmax.f32 %v2236_v51, 0.0  ;;  %v7233_v12 = vld [vmem:[#allocation16 + $0xdc] ss:$12 sps:$4 sm:$0xff]   ;;  %v7231_v51 = vld [vmem:[#allocation16 + $0xd8] ss:$12 sps:$4 sm:$0xff]  }
 0xcfe   : > { %v2258_v6 = vpack.c.bf16 %v2250_v53, %v2246_v15  ;;  %v2260_v7 = vpack.c.bf16 %v2252_v63, %v2248_v52 }
 0xcff   : > { %v2259_v8 = vpack.c.bf16 %v2251_v4, %v2247_v0  ;;  %v2261_v9 = vpack.c.bf16 %v2253_v5, %v2249_v3 }
 0xd01   : > { %2565 = vmatprep.mubr.bf16.mxu0 %v2259_v8  ;;  %2614 = vmatprep.mubr.bf16.mxu1 %v2261_v9 }
 0xd02   : > { %2566 = vmatmul.mubr.bf16.gmra.mrb[20].mxu0 %v2258_v6  ;;  %2615 = vmatmul.mubr.bf16.gmra.mrb[32].mxu1 %v2260_v7 }
 0xd03   : > { %2908 = vmatprep.mubr.bf16.mxu0 %v8351_v55 }
 0xdcd   : > { %v6403_v57 = vpop.f32.mrb[16].mxu0  ;;  %v6431_v59 = vpop.f32.mrb[28].mxu1 }
 0xdce   : > { %v6404_v61 = vpop.f32.mrb[17].mxu0  ;;  %v6432_v11 = vpop.f32.mrb[29].mxu1 }
 0xdcf   : > { %v6405_v30 = vadd.f32 %v6404_v61, %v6403_v57  ;;  %v6433_v13 = vadd.f32 %v6432_v11, %v6431_v59  ;;  %v6406_v16 = vpop.f32.mrb[18].mxu0  ;;  %v6434_v17 = vpop.f32.mrb[30].mxu1  ;;  %v7237_v61 = vld [vmem:[#allocation16 + $0xc8] ss:$12 sps:$4 sm:$0xff]   ;;  %v7234_v11 = vld [vmem:[#allocation16 + $0xf0] ss:$12 sps:$4 sm:$0xff]  }
 0xdd0   : > { %v6407_v18 = vpop.f32.mrb[19].mxu0  ;;  %v6435_v54 = vpop.f32.mrb[31].mxu1  ;;  %6697 = vmatprep.subr.bf16.mxu1 %v7237_v61 }
 0xdd1   : > { %v2560_v58 = vadd.f32 %v6405_v30, %v6090_v60  ;;  %v6408_v20 = vadd.f32 %v6407_v18, %v6406_v16  ;;  %v6436_v23 = vadd.f32 %v6435_v54, %v6434_v17  ;;  %6698 = vmatpush3.bf16.msra.mxu1 %v7237_v61  ;;  %v7240_v30 = vld [vmem:[#allocation16 + $0x10c] ss:$12 sps:$4 sm:$0xff]   ;;  %v7238_v16 = vld [vmem:[#allocation16 + $0x108] ss:$12 sps:$4 sm:$0xff]   ;;  %v7244_v17 = vld [vmem:[#allocation16 + $0x124] ss:$12 sps:$4 sm:$0xff]  }
 0xdd2   : > { %v7245_v18 = vld [vmem:[#allocation16 + $0xf8] ss:$12 sps:$4 sm:$0xff]   ;;  %v7242_v54 = vld [vmem:[#allocation16 + $0x120] ss:$12 sps:$4 sm:$0xff]  }
 0xdd3   : > { %v2609_v62 = vadd.f32 %v6433_v13, %v2560_v58  ;;  %v2563_v2 = vadd.f32 %v6408_v20, %v6090_v60  ;;  %v7241_v13 = vld [vmem:[#allocation16 + $0xe0] ss:$12 sps:$4 sm:$0xff]   ;;  %v7248_v58 = vld [vmem:[#allocation16 + $0x13c] ss:$12 sps:$4 sm:$0xff]  }
 0xdd4   : > { %6699 = vmatprep.subr.bf16.mxu1 %v7241_v13  ;;  %v7249_v20 = vld [vmem:[#allocation16 + $0x110] ss:$12 sps:$4 sm:$0xff]  }
 0xdd5   : > { %v2612_v24 = vadd.f32 %v6436_v23, %v2563_v2  ;;  %v6409_v25 = vpop.f32.mrb[20].mxu0  ;;  %v6437_v26 = vpop.f32.mrb[32].mxu1  ;;  %v9249_v27 = vadd.f32 %v2609_v62, %v9199_v41  ;;  %6700 = vmatpush3.bf16.msra.mxu1 %v7241_v13  ;;  %v7246_v23 = vld [vmem:[#allocation16 + $0x138] ss:$12 sps:$4 sm:$0xff]   ;;  %v7252_v62 = vld [vmem:[#allocation16 + $0x154] ss:$12 sps:$4 sm:$0xff]  }
 0xdd6   : > { %v6410_v28 = vpop.f32.mrb[21].mxu0  ;;  %v6438_v29 = vpop.f32.mrb[33].mxu1  ;;  %6701 = vmatprep.subr.bf16.mxu1 %v7245_v18  ;;  %v7253_v2 = vld [vmem:[#allocation16 + $0x128] ss:$12 sps:$4 sm:$0xff]  }
 0xdd7   : > { %v6411_v32 = vadd.f32 %v6410_v28, %v6409_v25  ;;  %v6439_v34 = vadd.f32 %v6438_v29, %v6437_v26  ;;  %v6440_v36 = vpop.f32.mrb[34].mxu1  ;;  %2631 = vadd.xlane.f32.xlu0 %v9249_v27  ;;  %v6412_v37 = vpop.f32.mrb[22].mxu0  ;;  %v9253_v38 = vadd.f32 %v2612_v24, %v9202_v44  ;;  %v7228_v44 = vld [vmem:[#allocation16 + $0xc0] ss:$12 sps:$4 sm:$0xff]   ;;  %v7250_v24 = vld [vmem:[#allocation16 + $0x150] ss:$12 sps:$4 sm:$0xff]  }
 0xdd8   : > { %v6413_v39 = vpop.f32.mrb[23].mxu0  ;;  %v6441_v40 = vpop.f32.mrb[35].mxu1  ;;  %2877 = vmatpush1.bf16.msra.mxu0 %v7228_v44  ;;  %v7254_v25 = vld [vmem:[#allocation16 + $0x168] ss:$12 sps:$4 sm:$0xff]   ;;  %v7256_v26 = vld [vmem:[#allocation16 + $0x16c] ss:$12 sps:$4 sm:$0xff]  }
 0xdd9   : > { %v2568_v42 = vadd.f32 %v6411_v32, %v6090_v60  ;;  %v6414_v43 = vadd.f32 %v6413_v39, %v6412_v37  ;;  %v6442_v1 = vadd.f32 %v6441_v40, %v6440_v36  ;;  %2633 = vadd.xlane.f32.xlu1 %v9253_v38  ;;  %2878 = vmatprep.subr.bf16.mxu0 %v7233_v12  ;;  %v7257_v28 = vld [vmem:[#allocation16 + $0x140] ss:$12 sps:$4 sm:$0xff]   ;;  %v7258_v29 = vld [vmem:[#allocation16 + $0x158] ss:$12 sps:$4 sm:$0xff]   ;;  %v7259_v32 = vld [vmem:[#allocation16 + $0x170] ss:$12 sps:$4 sm:$0xff]  }
 0xdda   : > { %6702 = vmatpush3.bf16.msra.mxu1 %v7245_v18  ;;  %v6123_v12 = vld [vmem:[#allocation13 + $0x1] ss:$0 sm:$0xff] }
 0xddb   : > { %v2617_v41 = vadd.f32 %v6439_v34, %v2568_v42  ;;  %v2571_v47 = vadd.f32 %v6414_v43, %v6090_v60  ;;  %v7236_v60 = vld [vmem:[#allocation16 + $0xf4] ss:$12 sps:$4 sm:$0xff]   ;;  %6703 = vmatprep.subr.bf16.mxu1 %v7249_v20 }
 0xddc   : > { %2879 = vmatpush1.bf16.msra.mxu0 %v7231_v51 }
 0xddd   : > { %v2620_v48 = vadd.f32 %v6442_v1, %v2571_v47  ;;  %v9257_v49 = vadd.f32 %v2617_v41, %v9206_v45  ;;  %2880 = vmatprep.subr.bf16.mxu0 %v7236_v60 }
 0xdde   : > { %6704 = vmatpush3.bf16.msra.mxu1 %v7249_v20 }
 0xddf   : > { %2635 = vadd.xlane.f32.xlu0 %v9257_v49  ;;  %v9261_v10 = vadd.f32 %v2620_v48, %v9210_v46  ;;  %6705 = vmatprep.subr.bf16.mxu1 %v7253_v2 }
 0xde0   : > { %2881 = vmatpush1.bf16.msra.mxu0 %v7234_v11 }
 0xde1   : > { %2637 = vadd.xlane.f32.xlu1 %v9261_v10  ;;  %2882 = vmatprep.subr.bf16.mxu0 %v7240_v30  ;;  %v2731_v30 = vld [vmem:[#allocation17 + $0x3] sm:$0x7] }
 0xde2   : > { %6706 = vmatpush3.bf16.msra.mxu1 %v7253_v2  ;;  %v2736_v13 = vrot.slane %v2731_v30, %v9144_v31 }
 0xde3   : > { %6707 = vmatprep.subr.bf16.mxu1 %v7257_v28 }
 0xde4   : > { %2883 = vmatpush1.bf16.msra.mxu0 %v7238_v16  ;;  %v2740_v16 = vrot.slane %v2731_v30, %v9147_v33 }
 0xde5   : > { %2884 = vmatprep.subr.bf16.mxu0 %v7244_v17 }
 0xde6   : > { %6708 = vmatpush3.bf16.msra.mxu1 %v7257_v28 }
 0xde7   : > { %6709 = vmatprep.subr.bf16.mxu1 %v7258_v29 }
 0xde8   : > { %2885 = vmatpush1.bf16.msra.mxu0 %v7242_v54 }
 0xde9   : > { %2886 = vmatprep.subr.bf16.mxu0 %v7248_v58 }
 0xdea   : > { %6710 = vmatpush3.bf16.msra.mxu1 %v7258_v29 }
 0xdeb   : > { %6711 = vmatprep.subr.bf16.mxu1 %v7259_v32 }
 0xdec   : > { %2887 = vmatpush1.bf16.msra.mxu0 %v7246_v23 }
 0xded   : > { %2888 = vmatprep.subr.bf16.mxu0 %v7252_v62 }
 0xdee   : > { %6712 = vmatpush3.bf16.msra.mxu1 %v7259_v32 }
 0xdf0   : > { %2889 = vmatpush1.bf16.msra.mxu0 %v7250_v24  ;;  %v2744_v24 = vrot.slane %v2731_v30, %v9151_v35 }
 0xdf1   : > { %2890 = vmatprep.subr.bf16.mxu0 %v7256_v26 }
 0xdf4   : > { %2891 = vmatpush1.bf16.msra.mxu0 %v7254_v25 }
 0xe64   : > { %v2632_v15 = vpop.xlane.xlu0 %2631 }
 0xe65   : > { %v2639_v52 = vmul.f32 0.0078125, %v2632_v15 }
 0xe66   : > { %v2634_v53 = vpop.xlane.xlu1 %2633 }
 0xe67   : > { %v9265_v45 = vsub.f32 %v9249_v27, %v2639_v52  ;;  %v2640_v63 = vmul.f32 0.0078125, %v2634_v53 }
 0xe69   : > { %v9268_v46 = vsub.f32 %v9253_v38, %v2640_v63  ;;  %v2647_v0 = vmul.f32 %v9265_v45, %v9265_v45  ;;  %v6124_v63 = vld [vmem:[#allocation14 + $0x1] ss:$0 sm:$0xff] }
 0xe6b   : > { %2651 = vadd.xlane.f32.xlu0 %v2647_v0  ;;  %v2648_v3 = vmul.f32 %v9268_v46, %v9268_v46 }
 0xe6c   : > { %v2636_v4 = vpop.xlane.xlu0 %2635 }
 0xe6d   : > { %v2641_v5 = vmul.f32 0.0078125, %v2636_v4  ;;  %2653 = vadd.xlane.f32.xlu1 %v2648_v3 }
 0xe6e   : > { %v2638_v6 = vpop.xlane.xlu1 %2637 }
 0xe6f   : > { %v9275_v7 = vsub.f32 %v9257_v49, %v2641_v5  ;;  %v2642_v8 = vmul.f32 0.0078125, %v2638_v6 }
 0xe71   : > { %v9278_v9 = vsub.f32 %v9261_v10, %v2642_v8  ;;  %v2649_v57 = vmul.f32 %v9275_v7, %v9275_v7 }
 0xe73   : > { %2655 = vadd.xlane.f32.xlu0 %v2649_v57  ;;  %v2650_v59 = vmul.f32 %v9278_v9, %v9278_v9 }
 0xe75   : > { %2657 = vadd.xlane.f32.xlu1 %v2650_v59 }
 0xef8   : > { %v2652_v34 = vpop.xlane.xlu0 %2651 }
 0xef9   : > { %v2659_v36 = vmul.f32 0.0078125, %v2652_v34 }
 0xefa   : > { %v2654_v37 = vpop.xlane.xlu1 %2653 }
 0xefb   : > { %v2663_v39 = vadd.f32 1e-05, %v2659_v36  ;;  %v2660_v40 = vmul.f32 0.0078125, %v2654_v37 }
 0xefd   : > { %7516 = vrsqrt.f32 %v2663_v39  ;;  %v2664_v42 = vadd.f32 1e-05, %v2660_v40 }
 0xeff   : > { %7518 = vrsqrt.f32 %v2664_v42 }
 0xf00   : > { %v2656_v43 = vpop.xlane.xlu0 %2655 }
 0xf01   : > { %v2661_v1 = vmul.f32 0.0078125, %v2656_v43 }
 0xf02   : > { %v2658_v41 = vpop.xlane.xlu1 %2657 }
 0xf03   : > { %v2665_v47 = vadd.f32 1e-05, %v2661_v1  ;;  %v2662_v48 = vmul.f32 0.0078125, %v2658_v41 }
 0xf05   : > { %7520 = vrsqrt.f32 %v2665_v47  ;;  %v2666_v44 = vadd.f32 1e-05, %v2662_v48 }
 0xf07   : > { %v7517_v50 = vpop.eup %7516  ;;  %7522 = vrsqrt.f32 %v2666_v44 }
 0xf08   : > { %v2671_v51 = vmul.f32 %v7517_v50, %v9265_v45 }
 0xf09   : > { %v7519_v15 = vpop.eup %7518 }
 0xf0a   : > { %v2681_v52 = vmul.f32 %v6123_v12, %v2671_v51  ;;  %v2672_v53 = vmul.f32 %v7519_v15, %v9268_v46 }
 0xf0c   : > { %v2682_v0 = vmul.f32 %v6123_v12, %v2672_v53  ;;  %v2691_v3 = vadd.f32 %v6124_v63, %v2681_v52 }
 0xf0e   : > { %v2692_v4 = vadd.f32 %v6124_v63, %v2682_v0 }
 0xf0f   : > { %v7521_v5 = vpop.eup %7520 }
 0xf10   : > { %v2695_v6 = vpack.c.bf16 %v2692_v4, %v2691_v3  ;;  %v2673_v8 = vmul.f32 %v7521_v5, %v9275_v7 }
 0xf11   : > { %v7523_v57 = vpop.eup %7522 }
 0xf12   : > { %2909 = vmatmul.mubr.bf16.vlgmr.msra.gmra.mrb[24].mxu0 %v2695_v6  ;;  %6713 = vmatprep.mubr.bf16.mxu1 %v2695_v6  ;;  %v2674_v59 = vmul.f32 %v7523_v57, %v9278_v9  ;;  %v2683_v60 = vmul.f32 %v6123_v12, %v2673_v8 }
 0xf13   : > { %2918 = vmatprep.mubr.bf16.mxu0 %v8351_v55 }
 0xf14   : > { %v2684_v45 = vmul.f32 %v6123_v12, %v2674_v59  ;;  %v2693_v61 = vadd.f32 %v6124_v63, %v2683_v60 }
 0xf16   : > { %v2694_v11 = vadd.f32 %v6124_v63, %v2684_v45 }
 0xf18   : > { %v2696_v46 = vpack.c.bf16 %v2694_v11, %v2693_v61 }
 0xf1a   : > { %2919 = vmatmul.mubr.bf16.gmra.mrb[28].mxu0 %v2696_v46  ;;  %6714 = vmatmul.mubr.bf16.vlgmr.msra.gmra.mrb[36].mxu1 %v2696_v46 }
 0xf1b   : > { %3588 = vmatprep.mubr.bf16.mxu1 %v8351_v55 }
 0xfe5   : > { %v2910_v7 = vpop.f32.mrb[24].mxu0 }
 0xfe6   : > { %v2912_v17 = vpop.f32.mrb[25].mxu0  ;;  %v2911_v9 = vadd.f32 %v2910_v7, %v2736_v13 }
 0xfe7   : > { %v2914_v18 = vpop.f32.mrb[26].mxu0  ;;  %v2913_v20 = vadd.f32 %v2912_v17, %v2740_v16 }
 0xfe8   : > { %v2915_v54 = vadd.f32 %v2914_v18, %v2736_v13  ;;  %v2916_v58 = vpop.f32.mrb[27].mxu0 }
 0xfe9   : > { %v2917_v23 = vadd.f32 %v2916_v58, %v2740_v16 }
 0xfea   : > { %v2978_v62 = vpack.c.bf16 %v2915_v54, %v2911_v9 }
 0xfeb   : > { %v2980_v2 = vpack.c.bf16 %v2917_v23, %v2913_v20 }
 0xfec   : > { %6721 = vmatprep.mubr.bf16.mxu0 %v2978_v62 }
 0xfed   : > { %v2920_v25 = vpop.f32.mrb[28].mxu0  ;;  %v6715_v26 = vpop.f32.mrb[36].mxu1  ;;  %6717 = vmatprep.subr.bf16.mxu0 %v2980_v2 }
 0xfee   : > { %v2922_v28 = vpop.f32.mrb[29].mxu0  ;;  %v2963_v29 = vpop.f32.mrb[37].mxu1  ;;  %6718 = vmatpush3.bf16.xpose.msra.mxu0 %v2980_v2  ;;  %v2921_v36 = vadd.f32 %v2920_v25, %v2736_v13  ;;  %v2972_v37 = vadd.f32 %v6715_v26, %v2744_v24 }
 0xfef   : > { %v2924_v32 = vpop.f32.mrb[30].mxu0  ;;  %v6716_v34 = vpop.f32.mrb[38].mxu1  ;;  %v2923_v1 = vadd.f32 %v2922_v28, %v2740_v16  ;;  %v2964_v41 = vadd.f32 %v2963_v29, %v2744_v24 }
 0xff0   : > { %v2925_v39 = vadd.f32 %v2924_v32, %v2736_v13  ;;  %v2975_v40 = vadd.f32 %v6716_v34, %v2744_v24  ;;  %v2926_v42 = vpop.f32.mrb[31].mxu0  ;;  %v2966_v43 = vpop.f32.mrb[39].mxu1  ;;  %v7260_v34 = vld [vmem:[#allocation19 + $0x40] sm:$0xff]  }
 0xff1   : > { %v2927_v47 = vadd.f32 %v2926_v42, %v2740_v16  ;;  %v2967_v48 = vadd.f32 %v2966_v43, %v2744_v24 }
 0xff2   : > { %v2979_v44 = vpack.c.bf16 %v2925_v39, %v2921_v36  ;;  %v3086_v50 = vpack.c.bf16 %v2975_v40, %v2972_v37 }
 0xff3   : > { %v2981_v12 = vpack.c.bf16 %v2927_v47, %v2923_v1  ;;  %v3085_v51 = vpack.c.bf16 %v2967_v48, %v2964_v41 }
 0xff5   : > { %6719 = vmatprep.subr.bf16.mxu0 %v2981_v12 }
 0xff6   : > { %6720 = vmatpush3.bf16.xpose.msra.mxu0 %v2981_v12 }
 0xff7   : > { %6725 = vmatprep.subr.bf16.mxu0 %v3085_v51 }
 0xffd   : > { %6722 = vmatmul.mubr.bf16.vlgmr.msra.gmra.mrb[32].mxu0 %v2979_v44 }
 0xffe   : > { %6726 = vmatpush3.bf16.msra.mxu0 %v3085_v51 }
 0xfff   : > { %6727 = vmatprep.subr.bf16.mxu0 %v3086_v50 }
0x1002   : > { %6728 = vmatpush3.bf16.msra.mxu0 %v3086_v50 }
0x1003   : > { %6733 = vmatprep.subr.bf16.mxu0 %v7260_v34 }
0x10d0   : > { %v6723_v15 = vpop.f32.mrb[32].mxu0 }
0x10d1   : > { %v3016_v52 = vpop.f32.mrb[33].mxu0  ;;  %v3033_v53 = vmul.f32 0.088388346, %v6723_v15  ;;  %v7261_v15 = vld [vmem:[#allocation19 + $0x48] sm:$0xff]  }
0x10d2   : > { %v3031_v63 = vmul.f32 0.088388346, %v3016_v52  ;;  %v6724_v0 = vpop.f32.mrb[34].mxu0  ;;  %v7262_v52 = vld [vmem:[#allocation19 + $0x50] sm:$0xff]  }
0x10d3   : > { %v3019_v3 = vpop.f32.mrb[35].mxu0  ;;  %v3034_v4 = vmul.f32 0.088388346, %v6724_v0  ;;  %v3037_v59 = vsel %vm9165_vm6, %v3033_v53, -1e+30  ;;  %v7263_v53 = vld [vmem:[#allocation19 + $0x58] sm:$0xff]  }
0x10d4   : > { %v3032_v5 = vmul.f32 0.088388346, %v3019_v3  ;;  %v3035_v6 = vsel %vm9160_vm4, %v3031_v63, -1e+30  ;;  %v3045_v61 = vsel %vm1620_vm5, %v3037_v59, -inf  ;;  %v7264_v63 = vld [vmem:[#allocation19 + $0x60] sm:$0xff]  }
0x10d5   : > { %v3039_v8 = vsel %vm1620_vm5, %v3035_v6, -inf  ;;  %v3038_v45 = vsel %vm9178_vm9, %v3034_v4, -1e+30  ;;  %v7265_v0 = vld [vmem:[#allocation19 + $0x68] sm:$0xff]   ;;  %v7266_v3 = vld [vmem:[#allocation19 + $0x70] sm:$0xff]   ;;  %v7267_v4 = vld [vmem:[#allocation19 + $0x78] sm:$0xff]  }
0x10d6   : > { %3040 = vmax.xlane.f32.xlu0 %v3039_v8  ;;  %v3036_v57 = vsel %vm9170_vm8, %v3032_v5, -1e+30  ;;  %v3048_v11 = vsel %vm1620_vm5, %v3038_v45, -inf }
0x10d7   : > { %v3042_v60 = vsel %vm1620_vm5, %v3036_v57, -inf }
0x10d8   : > { %3043 = vmax.xlane.f32.xlu1 %v3042_v60 }
0x10da   : > { %3046 = vmax.xlane.f32.xlu0 %v3045_v61 }
0x10dc   : > { %3049 = vmax.xlane.f32.xlu1 %v3048_v11 }
0x1163   : > { %v3041_v46 = vpop.xlane.xlu0 %3040 }
0x1164   : > { %v3051_v30 = vsub.f32 %v3035_v6, %v3041_v46 }
0x1165   : > { %v3044_v13 = vpop.xlane.xlu1 %3043 }
0x1166   : > { %v3055_v7 = vmul.f32 1.442695, %v3051_v30  ;;  %v3052_v16 = vsub.f32 %v3036_v57, %v3044_v13 }
0x1167   : > { %v3047_v17 = vpop.xlane.xlu0 %3046 }
0x1168   : > { %7524 = vpow2.f32 %v3055_v7  ;;  %v3057_v18 = vmul.f32 1.442695, %v3052_v16  ;;  %v3053_v9 = vsub.f32 %v3037_v59, %v3047_v17 }
0x1169   : > { %v3050_v54 = vpop.xlane.xlu1 %3049 }
0x116a   : > { %7526 = vpow2.f32 %v3057_v18  ;;  %v3059_v58 = vmul.f32 1.442695, %v3053_v9  ;;  %v3054_v20 = vsub.f32 %v3038_v45, %v3050_v54  ;;  %v6151_v45 = vld [vmem:[#allocation20 + $0x1] ss:$0 sm:$0xff] }
0x116c   : > { %7528 = vpow2.f32 %v3059_v58  ;;  %v3061_v23 = vmul.f32 1.442695, %v3054_v20  ;;  %v7270_v20 = vld [vmem:[#allocation25 + $0x104] ss:$16 sps:$4 sm:$0xff]  }
0x116d   : > { %3556 = vmatprep.subr.bf16.mxu1 %v7270_v20 }
0x116e   : > { %7530 = vpow2.f32 %v3061_v23  ;;  %v7271_v23 = vld [vmem:[#allocation25 + $0x108] ss:$16 sps:$4 sm:$0xff]  }
0x1172   : > { %v7525_v62 = vpop.eup %7524 }
0x1173   : > { %v3063_v2 = vsel %vm1620_vm5, %v7525_v62, 0.0 }
0x1174   : > { %v7527_v24 = vpop.eup %7526  ;;  %3064 = vadd.xlane.f32.xlu0 %v3063_v2  ;;  %v7279_v2 = vld [vmem:[#allocation25 + $0x12c] ss:$16 sps:$4 sm:$0xff]  }
0x1175   : > { %v3066_v25 = vsel %vm1620_vm5, %v7527_v24, 0.0 }
0x1176   : > { %v7529_v26 = vpop.eup %7528  ;;  %3067 = vadd.xlane.f32.xlu1 %v3066_v25 }
0x1177   : > { %v3069_v28 = vsel %vm1620_vm5, %v7529_v26, 0.0 }
0x1178   : > { %v7531_v29 = vpop.eup %7530  ;;  %3070 = vadd.xlane.f32.xlu0 %v3069_v28 }
0x1179   : > { %v3072_v32 = vsel %vm1620_vm5, %v7531_v29, 0.0 }
0x117a   : > { %3073 = vadd.xlane.f32.xlu1 %v3072_v32 }
0x1201   : > { %v3065_v36 = vpop.xlane.xlu0 %3064 }
0x1202   : > { %7532 = vrcp.f32 %v3065_v36 }
0x1203   : > { %v3068_v37 = vpop.xlane.xlu1 %3067 }
0x1204   : > { %7534 = vrcp.f32 %v3068_v37 }
0x1205   : > { %v3071_v39 = vpop.xlane.xlu0 %3070 }
0x1206   : > { %7536 = vrcp.f32 %v3071_v39 }
0x1207   : > { %v3074_v40 = vpop.xlane.xlu1 %3073 }
0x1208   : > { %7538 = vrcp.f32 %v3074_v40 }
0x120c   : > { %v7533_v42 = vpop.eup %7532 }
0x120d   : > { %v3079_v1 = vmul.f32 %v7533_v42, %v7525_v62  ;;  %v7273_v62 = vld [vmem:[#allocation25 + $0x10c] ss:$16 sps:$4 sm:$0xff]  }
0x120e   : > { %v7535_v43 = vpop.eup %7534 }
0x120f   : > { %v3080_v41 = vmul.f32 %v7535_v43, %v7527_v24  ;;  %v7277_v24 = vld [vmem:[#allocation25 + $0x128] ss:$16 sps:$4 sm:$0xff]  }
0x1210   : > { %v7537_v47 = vpop.eup %7536 }
0x1211   : > { %v3083_v48 = vpack.c.bf16 %v3080_v41, %v3079_v1  ;;  %v3081_v50 = vmul.f32 %v7537_v47, %v7529_v26 }
0x1212   : > { %v7539_v44 = vpop.eup %7538 }
0x1213   : > { %v3082_v12 = vmul.f32 %v7539_v44, %v7531_v29  ;;  %6729 = vmatprep.mubr.msk.bf16.mxu0 %vm1620_vm5, %v3083_v48  ;;  %v7282_v48 = vld [vmem:[#allocation25 + $0x144] ss:$16 sps:$4 sm:$0xff]   ;;  %v7285_v44 = vld [vmem:[#allocation25 + $0x14c] ss:$16 sps:$4 sm:$0xff]  }
0x1215   : > { %v3084_v51 = vpack.c.bf16 %v3082_v12, %v3081_v50  ;;  %v7280_v50 = vld [vmem:[#allocation25 + $0x140] ss:$16 sps:$4 sm:$0xff]   ;;  %v7283_v12 = vld [vmem:[#allocation25 + $0x148] ss:$16 sps:$4 sm:$0xff]  }
0x1217   : > { %6730 = vmatmul.mubr.msk.bf16.vlgmr.msra.gmra.mrb[36].mxu0 %vm1620_vm5, %v3084_v51  ;;  %v7288_v51 = vld [vmem:[#allocation25 + $0x164] ss:$16 sps:$4 sm:$0xff]  }
0x1218   : > { %6734 = vmatpush3.bf16.msra.mxu0 %v7260_v34 }
0x1219   : > { %6735 = vmatprep.subr.bf16.mxu0 %v7261_v15 }
0x121c   : > { %6736 = vmatpush3.bf16.msra.mxu0 %v7261_v15  ;;  %v7291_v15 = vld [vmem:[#allocation25 + $0x16c] ss:$16 sps:$4 sm:$0xff]  }
0x121d   : > { %6737 = vmatprep.subr.bf16.mxu0 %v7262_v52 }
0x1220   : > { %6738 = vmatpush3.bf16.msra.mxu0 %v7262_v52  ;;  %v7286_v52 = vld [vmem:[#allocation25 + $0x160] ss:$16 sps:$4 sm:$0xff]  }
0x1221   : > { %6739 = vmatprep.subr.bf16.mxu0 %v7263_v53 }
0x1224   : > { %6740 = vmatpush3.bf16.msra.mxu0 %v7263_v53  ;;  %v7289_v53 = vld [vmem:[#allocation25 + $0x168] ss:$16 sps:$4 sm:$0xff]  }
0x1225   : > { %6741 = vmatprep.subr.bf16.mxu0 %v7264_v63 }
0x1228   : > { %6742 = vmatpush3.bf16.msra.mxu0 %v7264_v63  ;;  %v7294_v63 = vld [vmem:[#allocation25 + $0x184] ss:$16 sps:$4 sm:$0xff]  }
0x1229   : > { %6743 = vmatprep.subr.bf16.mxu0 %v7265_v0 }
0x122c   : > { %6744 = vmatpush3.bf16.msra.mxu0 %v7265_v0  ;;  %v7297_v0 = vld [vmem:[#allocation25 + $0x18c] ss:$16 sps:$4 sm:$0xff]  }
0x122d   : > { %6745 = vmatprep.subr.bf16.mxu0 %v7266_v3 }
0x1230   : > { %6746 = vmatpush3.bf16.msra.mxu0 %v7266_v3  ;;  %v7292_v3 = vld [vmem:[#allocation25 + $0x180] ss:$16 sps:$4 sm:$0xff]  }
0x1231   : > { %6747 = vmatprep.subr.bf16.mxu0 %v7267_v4 }
0x1234   : > { %6748 = vmatpush3.bf16.msra.mxu0 %v7267_v4  ;;  %v7295_v4 = vld [vmem:[#allocation25 + $0x188] ss:$16 sps:$4 sm:$0xff]  }
0x1235   : > { %3609 = vmatprep.subr.bf16.mxu0 %v7273_v62 }
0x12ea   : > { %v6731_v5 = vpop.f32.mrb[36].mxu0 }
0x12eb   : > { %v3127_v6 = vpop.f32.mrb[37].mxu0 }
0x12ec   : > { %v6732_v8 = vpop.f32.mrb[38].mxu0 }
0x12ed   : > { %v3143_v57 = vpack.c.bf16 %v6732_v8, %v6731_v5  ;;  %v3130_v59 = vpop.f32.mrb[39].mxu0  ;;  %v7300_v5 = vld [vmem:[#allocation25 + $0x1a4] ss:$16 sps:$4 sm:$0xff]   ;;  %v7298_v8 = vld [vmem:[#allocation25 + $0x1a0] ss:$16 sps:$4 sm:$0xff]  }
0x12ee   : > { %v3142_v60 = vpack.c.bf16 %v3130_v59, %v3127_v6  ;;  %v7303_v6 = vld [vmem:[#allocation25 + $0x1ac] ss:$16 sps:$4 sm:$0xff]   ;;  %v7306_v59 = vld [vmem:[#allocation25 + $0x1c4] ss:$16 sps:$4 sm:$0xff]  }
0x12f0   : > { %6749 = vmatprep.mubr.bf16.mxu0 %v3142_v60  ;;  %v7309_v60 = vld [vmem:[#allocation25 + $0x1cc] ss:$16 sps:$4 sm:$0xff]  }
0x12f1   : > { %6750 = vmatmul.mubr.bf16.vlgmr.msra.gmra.mrb[40].mxu0 %v3143_v57  ;;  %v7301_v57 = vld [vmem:[#allocation25 + $0x1a8] ss:$16 sps:$4 sm:$0xff]  }
0x12f2   : > { %3641 = vmatprep.mubr.bf16.mxu0 %v8351_v55  ;;  %3610 = vmatpush1.bf16.msra.mxu0 %v7271_v23 }
0x12f3   : > { %3611 = vmatprep.subr.bf16.mxu0 %v7279_v2 }
0x12f6   : > { %3612 = vmatpush1.bf16.msra.mxu0 %v7277_v24 }
0x12f7   : > { %3613 = vmatprep.subr.bf16.mxu0 %v7285_v44 }
0x12fa   : > { %3614 = vmatpush1.bf16.msra.mxu0 %v7283_v12 }
0x12fb   : > { %3615 = vmatprep.subr.bf16.mxu0 %v7291_v15 }
0x12fe   : > { %3616 = vmatpush1.bf16.msra.mxu0 %v7289_v53  ;;  %v7318_v53 = vld [vmem:[#allocation28 + $0x100] sm:$0xff]  }
0x12ff   : > { %3617 = vmatprep.subr.bf16.mxu0 %v7297_v0  ;;  %v7320_v0 = vld [vmem:[#allocation28 + $0x148] sm:$0xff]  }
0x1302   : > { %3618 = vmatpush1.bf16.msra.mxu0 %v7295_v4  ;;  %v7322_v4 = vld [vmem:[#allocation28 + $0x108] sm:$0xff]  }
0x1303   : > { %3619 = vmatprep.subr.bf16.mxu0 %v7303_v6 }
0x1306   : > { %3620 = vmatpush1.bf16.msra.mxu0 %v7301_v57  ;;  %v7326_v57 = vld [vmem:[#allocation28 + $0x110] sm:$0xff]  }
0x1307   : > { %3621 = vmatprep.subr.bf16.mxu0 %v7309_v60  ;;  %v7328_v60 = vld [vmem:[#allocation28 + $0x158] sm:$0xff]  }
0x13c4   : > { %v6751_v61 = vpop.f32.mrb[40].mxu0 }
0x13c5   : > { %v3251_v11 = vpop.f32.mrb[41].mxu0  ;;  %v3260_v7 = vadd.f32 %v6751_v61, %v6151_v45  ;;  %v7307_v61 = vld [vmem:[#allocation25 + $0x1c8] ss:$16 sps:$4 sm:$0xff]  }
0x13c6   : > { %v3252_v46 = vadd.f32 %v6151_v45, %v3251_v11  ;;  %v6752_v30 = vpop.f32.mrb[42].mxu0  ;;  %v7312_v11 = vld [vmem:[#allocation25 + $0x1e4] ss:$16 sps:$4 sm:$0xff]   ;;  %3622 = vmatpush1.bf16.msra.mxu0 %v7307_v61 }
0x13c7   : > { %v3254_v13 = vpop.f32.mrb[43].mxu0  ;;  %v3263_v18 = vadd.f32 %v6752_v30, %v6151_v45  ;;  %v9320_v54 = vadd.f32 %v3260_v7, %v9257_v49  ;;  %v7274_v49 = vld [vmem:[#allocation25 + $0x120] ss:$16 sps:$4 sm:$0xff]   ;;  %v7330_v61 = vld [vmem:[#allocation28 + $0x118] sm:$0xff]  }
0x13c8   : > { %v9313_v16 = vadd.f32 %v3252_v46, %v9249_v27  ;;  %v3255_v17 = vadd.f32 %v6151_v45, %v3254_v13  ;;  %v7268_v27 = vld [vmem:[#allocation25 + $0x100] ss:$16 sps:$4 sm:$0xff]   ;;  %v7315_v46 = vld [vmem:[#allocation25 + $0x1ec] ss:$16 sps:$4 sm:$0xff]   ;;  %v7313_v13 = vld [vmem:[#allocation25 + $0x1e8] ss:$16 sps:$4 sm:$0xff]  }
0x13c9   : > { %v9324_v58 = vadd.f32 %v3263_v18, %v9261_v10  ;;  %3557 = vmatpush1.bf16.msra.mxu1 %v7268_v27  ;;  %v7304_v45 = vld [vmem:[#allocation25 + $0x1c0] ss:$16 sps:$4 sm:$0xff]   ;;  %3623 = vmatprep.subr.bf16.mxu0 %v7315_v46 }
0x13ca   : > { %v9316_v9 = vadd.f32 %v3255_v17, %v9253_v38  ;;  %3274 = vadd.xlane.f32.xlu0 %v9313_v16  ;;  %v7276_v38 = vld [vmem:[#allocation25 + $0x124] ss:$16 sps:$4 sm:$0xff]   ;;  %v7310_v30 = vld [vmem:[#allocation25 + $0x1e0] ss:$16 sps:$4 sm:$0xff]   ;;  %3624 = vmatpush1.bf16.msra.mxu0 %v7313_v13 }
0x13cb   : > { %3558 = vmatprep.subr.bf16.mxu1 %v7276_v38  ;;  %v7316_v7 = vld [vmem:[#allocation28 + $0x140] sm:$0xff]  }
0x13cc   : > { %3276 = vadd.xlane.f32.xlu1 %v9316_v9  ;;  %v7317_v17 = vld [vmem:[#allocation28 + $0x1c0] sm:$0xff]  }
0x13cd   : > { %3559 = vmatpush1.bf16.msra.mxu1 %v7274_v49  ;;  %6499 = vmatprep.subr.bf16.mxu0 %v7317_v17  ;;  %v7332_v46 = vld [vmem:[#allocation28 + $0x160] sm:$0xff]   ;;  %v7336_v17 = vld [vmem:[#allocation28 + $0x168] sm:$0xff]  }
0x13ce   : > { %3278 = vadd.xlane.f32.xlu0 %v9320_v54  ;;  %3560 = vmatprep.subr.bf16.mxu1 %v7282_v48  ;;  %v7334_v13 = vld [vmem:[#allocation28 + $0x120] sm:$0xff]  }
0x13d0   : > { %3280 = vadd.xlane.f32.xlu1 %v9324_v58 }
0x13d1   : > { %3561 = vmatpush1.bf16.msra.mxu1 %v7280_v50 }
0x13d2   : > { %3562 = vmatprep.subr.bf16.mxu1 %v7288_v51 }
0x13d5   : > { %3563 = vmatpush1.bf16.msra.mxu1 %v7286_v52 }
0x13d6   : > { %3564 = vmatprep.subr.bf16.mxu1 %v7294_v63  ;;  %v7319_v63 = vld [vmem:[#allocation28 + $0x180] sm:$0xff]  }
0x13d9   : > { %3565 = vmatpush1.bf16.msra.mxu1 %v7292_v3 }
0x13da   : > { %3566 = vmatprep.subr.bf16.mxu1 %v7300_v5  ;;  %v7325_v5 = vld [vmem:[#allocation28 + $0x1d0] sm:$0xff]  }
0x13dd   : > { %3567 = vmatpush1.bf16.msra.mxu1 %v7298_v8 }
0x13de   : > { %3568 = vmatprep.subr.bf16.mxu1 %v7306_v59  ;;  %v7327_v59 = vld [vmem:[#allocation28 + $0x190] sm:$0xff]  }
0x13e1   : > { %3569 = vmatpush1.bf16.msra.mxu1 %v7304_v45  ;;  %v7329_v45 = vld [vmem:[#allocation28 + $0x1d8] sm:$0xff]  }
0x13e2   : > { %3570 = vmatprep.subr.bf16.mxu1 %v7312_v11  ;;  %v7331_v11 = vld [vmem:[#allocation28 + $0x198] sm:$0xff]  }
0x13e5   : > { %3571 = vmatpush1.bf16.msra.mxu1 %v7310_v30  ;;  %v7333_v30 = vld [vmem:[#allocation28 + $0x1e0] sm:$0xff]  }
0x13e6   : > { %6471 = vmatprep.subr.bf16.mxu1 %v7316_v7  ;;  %v7335_v7 = vld [vmem:[#allocation28 + $0x1a0] sm:$0xff]  }
0x1457   : > { %v3275_v10 = vpop.xlane.xlu0 %3274 }
0x1458   : > { %v3282_v25 = vmul.f32 0.0078125, %v3275_v10 }
0x1459   : > { %v3277_v26 = vpop.xlane.xlu1 %3276 }
0x145a   : > { %v9329_v28 = vsub.f32 %v9313_v16, %v3282_v25  ;;  %v3283_v29 = vmul.f32 0.0078125, %v3277_v26 }
0x145b   : > { %v3279_v32 = vpop.xlane.xlu0 %3278 }
0x145c   : > { %v9332_v34 = vsub.f32 %v9316_v9, %v3283_v29  ;;  %v3284_v36 = vmul.f32 0.0078125, %v3279_v32  ;;  %v3290_v37 = vmul.f32 %v9329_v28, %v9329_v28  ;;  %v6160_v32 = vld [vmem:[#allocation22 + $0x1] ss:$0 sm:$0xff] }
0x145d   : > { %v3281_v39 = vpop.xlane.xlu1 %3280 }
0x145e   : > { %v9337_v40 = vsub.f32 %v9320_v54, %v3284_v36  ;;  %v3285_v42 = vmul.f32 0.0078125, %v3281_v39  ;;  %3294 = vadd.xlane.f32.xlu0 %v3290_v37  ;;  %v3291_v43 = vmul.f32 %v9332_v34, %v9332_v34 }
0x1460   : > { %v9342_v1 = vsub.f32 %v9324_v58, %v3285_v42  ;;  %3296 = vadd.xlane.f32.xlu1 %v3291_v43  ;;  %v3292_v41 = vmul.f32 %v9337_v40, %v9337_v40 }
0x1462   : > { %3298 = vadd.xlane.f32.xlu0 %v3292_v41  ;;  %v3293_v47 = vmul.f32 %v9342_v1, %v9342_v1  ;;  %v6161_v41 = vld [vmem:[#allocation23 + $0x1] ss:$0 sm:$0xff] }
0x1464   : > { %3300 = vadd.xlane.f32.xlu1 %v3293_v47 }
0x14eb   : > { %v3295_v18 = vpop.xlane.xlu0 %3294 }
0x14ec   : > { %v3302_v27 = vmul.f32 0.0078125, %v3295_v18  ;;  %v7337_v18 = vld [vmem:[#allocation28 + $0x1e8] sm:$0xff]  }
0x14ed   : > { %v3297_v20 = vpop.xlane.xlu1 %3296 }
0x14ee   : > { %v3306_v23 = vadd.f32 1e-05, %v3302_v27  ;;  %v3303_v62 = vmul.f32 0.0078125, %v3297_v20  ;;  %v7338_v27 = vld [vmem:[#allocation28 + $0x128] sm:$0xff]  }
0x14ef   : > { %v3299_v38 = vpop.xlane.xlu0 %3298  ;;  %v7339_v20 = vld [vmem:[#allocation28 + $0x1a8] sm:$0xff]  }
0x14f0   : > { %7540 = vrsqrt.f32 %v3306_v23  ;;  %v3307_v2 = vadd.f32 1e-05, %v3303_v62  ;;  %v3304_v49 = vmul.f32 0.0078125, %v3299_v38  ;;  %v7340_v23 = vld [vmem:[#allocation28 + $0x170] sm:$0xff]  }
0x14f1   : > { %v3301_v24 = vpop.xlane.xlu1 %3300  ;;  %v7341_v62 = vld [vmem:[#allocation28 + $0x1f0] sm:$0xff]  }
0x14f2   : > { %7542 = vrsqrt.f32 %v3307_v2  ;;  %v3308_v10 = vadd.f32 1e-05, %v3304_v49  ;;  %v3305_v25 = vmul.f32 0.0078125, %v3301_v24  ;;  %v7342_v38 = vld [vmem:[#allocation28 + $0x130] sm:$0xff]   ;;  %v7344_v49 = vld [vmem:[#allocation28 + $0x178] sm:$0xff]  }
0x14f3   : > { %v7343_v2 = vld [vmem:[#allocation28 + $0x1b0] sm:$0xff]   ;;  %v7345_v24 = vld [vmem:[#allocation28 + $0x1f8] sm:$0xff]  }
0x14f4   : > { %7544 = vrsqrt.f32 %v3308_v10  ;;  %v3309_v26 = vadd.f32 1e-05, %v3305_v25  ;;  %v7346_v10 = vld [vmem:[#allocation28 + $0x138] sm:$0xff]  }
0x14f5   : > { %v7347_v25 = vld [vmem:[#allocation28 + $0x1b8] sm:$0xff]  }
0x14f6   : > { %7546 = vrsqrt.f32 %v3309_v26  ;;  %v3374_v26 = vld [vmem:[#allocation26 + $0x4] sm:$0xf] }
0x14fa   : > { %v7541_v29 = vpop.eup %7540 }
0x14fb   : > { %v3314_v36 = vmul.f32 %v7541_v29, %v9329_v28  ;;  %v7321_v28 = vld [vmem:[#allocation28 + $0x1c8] sm:$0xff]   ;;  %v3379_v29 = vrot.slane %v3374_v26, %v9144_v31 }
0x14fc   : > { %v7543_v37 = vpop.eup %7542 }
0x14fd   : > { %v3315_v39 = vmul.f32 %v7543_v37, %v9332_v34  ;;  %v3324_v42 = vmul.f32 %v6160_v32, %v3314_v36  ;;  %v3383_v36 = vrot.slane %v3374_v26, %v9147_v33  ;;  %v3391_v37 = vrot.slane %v3374_v26, %v9241_v56 }
0x14fe   : > { %v7545_v43 = vpop.eup %7544 }
0x14ff   : > { %v3325_v47 = vmul.f32 %v6160_v32, %v3315_v39  ;;  %v3334_v44 = vadd.f32 %v6161_v41, %v3324_v42  ;;  %v3316_v12 = vmul.f32 %v7545_v43, %v9337_v40  ;;  %v7323_v40 = vld [vmem:[#allocation28 + $0x188] sm:$0xff]  }
0x1500   : > { %v7547_v48 = vpop.eup %7546 }
0x1501   : > { %v3335_v50 = vadd.f32 %v6161_v41, %v3325_v47  ;;  %v3317_v51 = vmul.f32 %v7547_v48, %v9342_v1  ;;  %v3326_v34 = vmul.f32 %v6160_v32, %v3316_v12  ;;  %v7324_v1 = vld [vmem:[#allocation28 + $0x150] sm:$0xff]  }
0x1503   : > { %v3338_v15 = vpack.c.bf16 %v3335_v50, %v3334_v44  ;;  %v3327_v52 = vmul.f32 %v6160_v32, %v3317_v51  ;;  %v3336_v6 = vadd.f32 %v6161_v41, %v3326_v34  ;;  %v3387_v32 = vrot.slane %v3374_v26, %v9151_v35 }
0x1505   : > { %3589 = vmatmul.mubr.bf16.vlgmr.msra.gmra.mrb[40].mxu1 %v3338_v15  ;;  %3642 = vmatmul.mubr.bf16.vlgmr.msra.gmra.mrb[44].mxu0 %v3338_v15  ;;  %v3337_v3 = vadd.f32 %v6161_v41, %v3327_v52 }
0x1506   : > { %3598 = vmatprep.mubr.bf16.mxu1 %v8351_v55  ;;  %3651 = vmatprep.mubr.bf16.mxu0 %v8351_v55 }
0x1507   : > { %6472 = vmatpush3.bf16.msra.mxu1 %v7318_v53  ;;  %6500 = vmatpush3.bf16.msra.mxu0 %v7319_v63  ;;  %v3339_v8 = vpack.c.bf16 %v3337_v3, %v3336_v6 }
0x1508   : > { %6473 = vmatprep.subr.bf16.mxu1 %v7320_v0  ;;  %6501 = vmatprep.subr.bf16.mxu0 %v7321_v28 }
0x150b   : > { %6474 = vmatpush3.bf16.msra.mxu1 %v7322_v4  ;;  %6502 = vmatpush3.bf16.msra.mxu0 %v7323_v40 }
0x150c   : > { %6475 = vmatprep.subr.bf16.mxu1 %v7324_v1  ;;  %6503 = vmatprep.subr.bf16.mxu0 %v7325_v5 }
0x150d   : > { %3599 = vmatmul.mubr.bf16.gmra.mrb[44].mxu1 %v3339_v8  ;;  %3652 = vmatmul.mubr.bf16.gmra.mrb[48].mxu0 %v3339_v8 }
0x150f   : > { %6476 = vmatpush3.bf16.msra.mxu1 %v7326_v57  ;;  %6504 = vmatpush3.bf16.msra.mxu0 %v7327_v59 }
0x1510   : > { %6477 = vmatprep.subr.bf16.mxu1 %v7328_v60  ;;  %6505 = vmatprep.subr.bf16.mxu0 %v7329_v45 }
0x1513   : > { %6478 = vmatpush3.bf16.msra.mxu1 %v7330_v61  ;;  %6506 = vmatpush3.bf16.msra.mxu0 %v7331_v11 }
0x1514   : > { %6479 = vmatprep.subr.bf16.mxu1 %v7332_v46  ;;  %6507 = vmatprep.subr.bf16.mxu0 %v7333_v30 }
0x1517   : > { %6480 = vmatpush3.bf16.msra.mxu1 %v7334_v13  ;;  %6508 = vmatpush3.bf16.msra.mxu0 %v7335_v7 }
0x1518   : > { %6481 = vmatprep.subr.bf16.mxu1 %v7336_v17  ;;  %6509 = vmatprep.subr.bf16.mxu0 %v7337_v18 }
0x151b   : > { %6482 = vmatpush3.bf16.msra.mxu1 %v7338_v27  ;;  %6510 = vmatpush3.bf16.msra.mxu0 %v7339_v20 }
0x151c   : > { %6483 = vmatprep.subr.bf16.mxu1 %v7340_v23  ;;  %6511 = vmatprep.subr.bf16.mxu0 %v7341_v62 }
0x151f   : > { %6484 = vmatpush3.bf16.msra.mxu1 %v7342_v38  ;;  %6512 = vmatpush3.bf16.msra.mxu0 %v7343_v2 }
0x1520   : > { %6485 = vmatprep.subr.bf16.mxu1 %v7344_v49  ;;  %6513 = vmatprep.subr.bf16.mxu0 %v7345_v24 }
0x1523   : > { %6486 = vmatpush3.bf16.msra.mxu1 %v7346_v10  ;;  %6514 = vmatpush3.bf16.msra.mxu0 %v7347_v25 }
0x15d8   : > { %v3590_v39 = vpop.f32.mrb[40].mxu1  ;;  %v3643_v42 = vpop.f32.mrb[44].mxu0 }
0x15d9   : > { %v3591_v43 = vadd.f32 %v3590_v39, %v3379_v29  ;;  %v3644_v41 = vadd.f32 %v3643_v42, %v3387_v32  ;;  %v3592_v47 = vpop.f32.mrb[41].mxu1  ;;  %v3645_v48 = vpop.f32.mrb[45].mxu0 }
0x15da   : > { %v3593_v44 = vadd.f32 %v3592_v47, %v3383_v36  ;;  %v3646_v50 = vadd.f32 %v3645_v48, %v3391_v37  ;;  %v3594_v12 = vpop.f32.mrb[42].mxu1  ;;  %v3647_v51 = vpop.f32.mrb[46].mxu0 }
0x15db   : > { %v3595_v15 = vadd.f32 %v3594_v12, %v3379_v29  ;;  %v3648_v52 = vadd.f32 %v3647_v51, %v3387_v32  ;;  %v3596_v53 = vpop.f32.mrb[43].mxu1  ;;  %v3649_v63 = vpop.f32.mrb[47].mxu0  ;;  %v3662_v34 = vmax.f32 %v3591_v43, 0.0  ;;  %v3664_v3 = vmax.f32 %v3644_v41, 0.0 }
0x15dc   : > { %v3597_v0 = vadd.f32 %v3596_v53, %v3383_v36  ;;  %v3650_v28 = vadd.f32 %v3649_v63, %v3391_v37  ;;  %v3663_v1 = vmax.f32 %v3593_v44, 0.0  ;;  %v3665_v5 = vmax.f32 %v3646_v50, 0.0 }
0x15dd   : > { %v3666_v4 = vmax.f32 %v3595_v15, 0.0  ;;  %v3668_v40 = vmax.f32 %v3648_v52, 0.0 }
0x15de   : > { %v3667_v6 = vmax.f32 %v3597_v0, 0.0  ;;  %v3669_v8 = vmax.f32 %v3650_v28, 0.0 }
0x15df   : > { %v3678_v57 = vpack.c.bf16 %v3666_v4, %v3662_v34  ;;  %v3680_v59 = vpack.c.bf16 %v3668_v40, %v3664_v3 }
0x15e0   : > { %v3679_v60 = vpack.c.bf16 %v3667_v6, %v3663_v1  ;;  %v3681_v45 = vpack.c.bf16 %v3669_v8, %v3665_v5  ;;  %v3600_v61 = vpop.f32.mrb[44].mxu1  ;;  %v3653_v11 = vpop.f32.mrb[48].mxu0 }
0x15e1   : > { %v3601_v46 = vadd.f32 %v3600_v61, %v3379_v29  ;;  %v3654_v30 = vadd.f32 %v3653_v11, %v3387_v32  ;;  %v3602_v13 = vpop.f32.mrb[45].mxu1  ;;  %v3655_v7 = vpop.f32.mrb[49].mxu0 }
0x15e2   : > { %v3603_v17 = vadd.f32 %v3602_v13, %v3383_v36  ;;  %v3656_v18 = vadd.f32 %v3655_v7, %v3391_v37  ;;  %v3604_v27 = vpop.f32.mrb[46].mxu1  ;;  %v3657_v20 = vpop.f32.mrb[50].mxu0  ;;  %3983 = vmatprep.mubr.bf16.mxu1 %v3679_v60  ;;  %4032 = vmatprep.mubr.bf16.mxu0 %v3681_v45 }
0x15e3   : > { %v3605_v23 = vadd.f32 %v3604_v27, %v3379_v29  ;;  %v3658_v62 = vadd.f32 %v3657_v20, %v3387_v32  ;;  %v3606_v38 = vpop.f32.mrb[47].mxu1  ;;  %v3659_v2 = vpop.f32.mrb[51].mxu0  ;;  %3984 = vmatmul.mubr.bf16.vlgmr.msra.gmra.mrb[48].mxu1 %v3678_v57  ;;  %4033 = vmatmul.mubr.bf16.vlgmr.msra.gmra.mrb[52].mxu0 %v3680_v59  ;;  %v3670_v10 = vmax.f32 %v3601_v46, 0.0  ;;  %v3672_v25 = vmax.f32 %v3654_v30, 0.0 }
0x15e4   : > { %v3607_v49 = vadd.f32 %v3606_v38, %v3383_v36  ;;  %v3660_v24 = vadd.f32 %v3659_v2, %v3391_v37  ;;  %v3671_v42 = vmax.f32 %v3603_v17, 0.0  ;;  %v3673_v43 = vmax.f32 %v3656_v18, 0.0  ;;  %v6194_v36 = vld [vmem:[#allocation29 + $0x1] ss:$0 sm:$0xff]  ;;  %v7350_v2 = vld [vmem:[#allocation16 + $0x184] ss:$12 sps:$4 sm:$0xff]  }
0x15e5   : > { %v3674_v26 = vmax.f32 %v3605_v23, 0.0  ;;  %v3676_v39 = vmax.f32 %v3658_v62, 0.0  ;;  %4302 = vmatprep.subr.bf16.mxu1 %v7350_v2 }
0x15e6   : > { %v3675_v41 = vmax.f32 %v3607_v49, 0.0  ;;  %v3677_v47 = vmax.f32 %v3660_v24, 0.0  ;;  %v7353_v49 = vld [vmem:[#allocation16 + $0x19c] ss:$12 sps:$4 sm:$0xff]   ;;  %v7351_v24 = vld [vmem:[#allocation16 + $0x198] ss:$12 sps:$4 sm:$0xff]  }
0x15e7   : > { %v3682_v48 = vpack.c.bf16 %v3674_v26, %v3670_v10  ;;  %v3684_v44 = vpack.c.bf16 %v3676_v39, %v3672_v25 }
0x15e8   : > { %v3683_v50 = vpack.c.bf16 %v3675_v41, %v3671_v42  ;;  %v3685_v12 = vpack.c.bf16 %v3677_v47, %v3673_v43 }
0x15ea   : > { %3991 = vmatprep.mubr.bf16.mxu1 %v3683_v50  ;;  %4040 = vmatprep.mubr.bf16.mxu0 %v3685_v12 }
0x15eb   : > { %3992 = vmatmul.mubr.bf16.gmra.mrb[52].mxu1 %v3682_v48  ;;  %4041 = vmatmul.mubr.bf16.gmra.mrb[56].mxu0 %v3684_v44 }
0x15ec   : > { %4334 = vmatprep.mubr.bf16.mxu1 %v8351_v55 }
0x16b6   : > { %v6487_v29 = vpop.f32.mrb[48].mxu1  ;;  %v6515_v32 = vpop.f32.mrb[52].mxu0 }
0x16b7   : > { %v6488_v37 = vpop.f32.mrb[49].mxu1  ;;  %v6516_v51 = vpop.f32.mrb[53].mxu0 }
0x16b8   : > { %v6489_v15 = vadd.f32 %v6488_v37, %v6487_v29  ;;  %v6517_v52 = vadd.f32 %v6516_v51, %v6515_v32  ;;  %v6490_v53 = vpop.f32.mrb[50].mxu1  ;;  %v6518_v63 = vpop.f32.mrb[54].mxu0  ;;  %v7357_v37 = vld [vmem:[#allocation16 + $0x188] ss:$12 sps:$4 sm:$0xff]   ;;  %v7354_v51 = vld [vmem:[#allocation16 + $0x1b0] ss:$12 sps:$4 sm:$0xff]  }
0x16b9   : > { %v6491_v0 = vpop.f32.mrb[51].mxu1  ;;  %v6519_v28 = vpop.f32.mrb[55].mxu0  ;;  %6753 = vmatprep.subr.bf16.mxu0 %v7357_v37 }
0x16ba   : > { %v3986_v34 = vadd.f32 %v6489_v15, %v6194_v36  ;;  %v6492_v3 = vadd.f32 %v6491_v0, %v6490_v53  ;;  %v6520_v4 = vadd.f32 %v6519_v28, %v6518_v63  ;;  %6754 = vmatpush3.bf16.msra.mxu0 %v7357_v37  ;;  %v7360_v15 = vld [vmem:[#allocation16 + $0x1cc] ss:$12 sps:$4 sm:$0xff]   ;;  %v7358_v53 = vld [vmem:[#allocation16 + $0x1c8] ss:$12 sps:$4 sm:$0xff]   ;;  %v7364_v63 = vld [vmem:[#allocation16 + $0x1e4] ss:$12 sps:$4 sm:$0xff]  }
0x16bb   : > { %v7365_v0 = vld [vmem:[#allocation16 + $0x1b8] ss:$12 sps:$4 sm:$0xff]   ;;  %v7362_v28 = vld [vmem:[#allocation16 + $0x1e0] ss:$12 sps:$4 sm:$0xff]  }
0x16bc   : > { %v4035_v40 = vadd.f32 %v6517_v52, %v3986_v34  ;;  %v3989_v1 = vadd.f32 %v6492_v3, %v6194_v36  ;;  %v7361_v52 = vld [vmem:[#allocation16 + $0x1a0] ss:$12 sps:$4 sm:$0xff]   ;;  %v7368_v34 = vld [vmem:[#allocation16 + $0x1fc] ss:$12 sps:$4 sm:$0xff]  }
0x16bd   : > { %6755 = vmatprep.subr.bf16.mxu0 %v7361_v52  ;;  %v7369_v3 = vld [vmem:[#allocation16 + $0x1d0] ss:$12 sps:$4 sm:$0xff]  }
0x16be   : > { %v4038_v5 = vadd.f32 %v6520_v4, %v3989_v1  ;;  %v6493_v6 = vpop.f32.mrb[52].mxu1  ;;  %v6521_v8 = vpop.f32.mrb[56].mxu0  ;;  %v9360_v57 = vadd.f32 %v4035_v40, %v9313_v16  ;;  %6756 = vmatpush3.bf16.msra.mxu0 %v7361_v52  ;;  %v7366_v4 = vld [vmem:[#allocation16 + $0x1f8] ss:$12 sps:$4 sm:$0xff]   ;;  %v7372_v40 = vld [vmem:[#allocation16 + $0x214] ss:$12 sps:$4 sm:$0xff]  }
0x16bf   : > { %v6494_v59 = vpop.f32.mrb[53].mxu1  ;;  %v6522_v60 = vpop.f32.mrb[57].mxu0  ;;  %6757 = vmatprep.subr.bf16.mxu0 %v7365_v0  ;;  %v7373_v1 = vld [vmem:[#allocation16 + $0x1e8] ss:$12 sps:$4 sm:$0xff]  }
0x16c0   : > { %v6495_v45 = vadd.f32 %v6494_v59, %v6493_v6  ;;  %v6523_v61 = vadd.f32 %v6522_v60, %v6521_v8  ;;  %v6524_v11 = vpop.f32.mrb[58].mxu0  ;;  %4057 = vadd.xlane.f32.xlu0 %v9360_v57  ;;  %v6496_v46 = vpop.f32.mrb[54].mxu1  ;;  %v9364_v30 = vadd.f32 %v4038_v5, %v9316_v9  ;;  %v7348_v9 = vld [vmem:[#allocation16 + $0x180] ss:$12 sps:$4 sm:$0xff]   ;;  %v7370_v5 = vld [vmem:[#allocation16 + $0x210] ss:$12 sps:$4 sm:$0xff]  }
0x16c1   : > { %v6497_v13 = vpop.f32.mrb[55].mxu1  ;;  %v6525_v7 = vpop.f32.mrb[59].mxu0  ;;  %4303 = vmatpush1.bf16.msra.mxu1 %v7348_v9  ;;  %v7374_v6 = vld [vmem:[#allocation16 + $0x228] ss:$12 sps:$4 sm:$0xff]   ;;  %v7376_v8 = vld [vmem:[#allocation16 + $0x22c] ss:$12 sps:$4 sm:$0xff]  }
0x16c2   : > { %v3994_v17 = vadd.f32 %v6495_v45, %v6194_v36  ;;  %v6498_v18 = vadd.f32 %v6497_v13, %v6496_v46  ;;  %v6526_v27 = vadd.f32 %v6525_v7, %v6524_v11  ;;  %4059 = vadd.xlane.f32.xlu1 %v9364_v30  ;;  %4304 = vmatprep.subr.bf16.mxu1 %v7353_v49  ;;  %v7377_v59 = vld [vmem:[#allocation16 + $0x200] ss:$12 sps:$4 sm:$0xff]   ;;  %v7378_v60 = vld [vmem:[#allocation16 + $0x218] ss:$12 sps:$4 sm:$0xff]   ;;  %v7379_v45 = vld [vmem:[#allocation16 + $0x230] ss:$12 sps:$4 sm:$0xff]  }
0x16c3   : > { %6758 = vmatpush3.bf16.msra.mxu0 %v7365_v0  ;;  %v6227_v49 = vld [vmem:[#allocation13 + $0x2] ss:$0 sm:$0xff] }
0x16c4   : > { %v4043_v16 = vadd.f32 %v6523_v61, %v3994_v17  ;;  %v3997_v20 = vadd.f32 %v6498_v18, %v6194_v36  ;;  %v7356_v36 = vld [vmem:[#allocation16 + $0x1b4] ss:$12 sps:$4 sm:$0xff]   ;;  %6759 = vmatprep.subr.bf16.mxu0 %v7369_v3 }
0x16c5   : > { %4305 = vmatpush1.bf16.msra.mxu1 %v7351_v24 }
0x16c6   : > { %v4046_v23 = vadd.f32 %v6526_v27, %v3997_v20  ;;  %v9368_v62 = vadd.f32 %v4043_v16, %v9320_v54  ;;  %4306 = vmatprep.subr.bf16.mxu1 %v7356_v36 }
0x16c7   : > { %6760 = vmatpush3.bf16.msra.mxu0 %v7369_v3 }
0x16c8   : > { %4061 = vadd.xlane.f32.xlu0 %v9368_v62  ;;  %v9372_v38 = vadd.f32 %v4046_v23, %v9324_v58  ;;  %6761 = vmatprep.subr.bf16.mxu0 %v7373_v1 }
0x16c9   : > { %4307 = vmatpush1.bf16.msra.mxu1 %v7354_v51 }
0x16ca   : > { %4063 = vadd.xlane.f32.xlu1 %v9372_v38  ;;  %4308 = vmatprep.subr.bf16.mxu1 %v7360_v15  ;;  %v4157_v15 = vld [vmem:[#allocation17 + $0x6] sm:$0x7] }
0x16cb   : > { %6762 = vmatpush3.bf16.msra.mxu0 %v7373_v1  ;;  %v4162_v52 = vrot.slane %v4157_v15, %v9144_v31 }
0x16cc   : > { %6763 = vmatprep.subr.bf16.mxu0 %v7377_v59 }
0x16cd   : > { %4309 = vmatpush1.bf16.msra.mxu1 %v7358_v53  ;;  %v4166_v53 = vrot.slane %v4157_v15, %v9147_v33 }
0x16ce   : > { %4310 = vmatprep.subr.bf16.mxu1 %v7364_v63 }
0x16cf   : > { %6764 = vmatpush3.bf16.msra.mxu0 %v7377_v59 }
0x16d0   : > { %6765 = vmatprep.subr.bf16.mxu0 %v7378_v60 }
0x16d1   : > { %4311 = vmatpush1.bf16.msra.mxu1 %v7362_v28 }
0x16d2   : > { %4312 = vmatprep.subr.bf16.mxu1 %v7368_v34 }
0x16d3   : > { %6766 = vmatpush3.bf16.msra.mxu0 %v7378_v60 }
0x16d4   : > { %6767 = vmatprep.subr.bf16.mxu0 %v7379_v45 }
0x16d5   : > { %4313 = vmatpush1.bf16.msra.mxu1 %v7366_v4 }
0x16d6   : > { %4314 = vmatprep.subr.bf16.mxu1 %v7372_v40 }
0x16d7   : > { %6768 = vmatpush3.bf16.msra.mxu0 %v7379_v45 }
0x16d9   : > { %4315 = vmatpush1.bf16.msra.mxu1 %v7370_v5  ;;  %v4170_v5 = vrot.slane %v4157_v15, %v9151_v35 }
0x16da   : > { %4316 = vmatprep.subr.bf16.mxu1 %v7376_v8 }
0x16dd   : > { %4317 = vmatpush1.bf16.msra.mxu1 %v7374_v6 }
0x174d   : > { %v4058_v10 = vpop.xlane.xlu0 %4057 }
0x174e   : > { %v4065_v25 = vmul.f32 0.0078125, %v4058_v10 }
0x174f   : > { %v4060_v26 = vpop.xlane.xlu1 %4059 }
0x1750   : > { %v9376_v54 = vsub.f32 %v9360_v57, %v4065_v25  ;;  %v4066_v39 = vmul.f32 0.0078125, %v4060_v26 }
0x1752   : > { %v9379_v58 = vsub.f32 %v9364_v30, %v4066_v39  ;;  %v4073_v42 = vmul.f32 %v9376_v54, %v9376_v54  ;;  %v6228_v39 = vld [vmem:[#allocation14 + $0x2] ss:$0 sm:$0xff] }
0x1754   : > { %4077 = vadd.xlane.f32.xlu0 %v4073_v42  ;;  %v4074_v43 = vmul.f32 %v9379_v58, %v9379_v58 }
0x1755   : > { %v4062_v41 = vpop.xlane.xlu0 %4061 }
0x1756   : > { %v4067_v47 = vmul.f32 0.0078125, %v4062_v41  ;;  %4079 = vadd.xlane.f32.xlu1 %v4074_v43 }
0x1757   : > { %v4064_v48 = vpop.xlane.xlu1 %4063 }
0x1758   : > { %v9386_v44 = vsub.f32 %v9368_v62, %v4067_v47  ;;  %v4068_v50 = vmul.f32 0.0078125, %v4064_v48 }
0x175a   : > { %v9389_v12 = vsub.f32 %v9372_v38, %v4068_v50  ;;  %v4075_v29 = vmul.f32 %v9386_v44, %v9386_v44 }
0x175c   : > { %4081 = vadd.xlane.f32.xlu0 %v4075_v29  ;;  %v4076_v32 = vmul.f32 %v9389_v12, %v9389_v12 }
0x175e   : > { %4083 = vadd.xlane.f32.xlu1 %v4076_v32 }
0x17e1   : > { %v4078_v61 = vpop.xlane.xlu0 %4077 }
0x17e2   : > { %v4085_v11 = vmul.f32 0.0078125, %v4078_v61 }
0x17e3   : > { %v4080_v46 = vpop.xlane.xlu1 %4079 }
0x17e4   : > { %v4089_v13 = vadd.f32 1e-05, %v4085_v11  ;;  %v4086_v7 = vmul.f32 0.0078125, %v4080_v46 }
0x17e6   : > { %7548 = vrsqrt.f32 %v4089_v13  ;;  %v4090_v17 = vadd.f32 1e-05, %v4086_v7 }
0x17e8   : > { %7550 = vrsqrt.f32 %v4090_v17 }
0x17e9   : > { %v4082_v18 = vpop.xlane.xlu0 %4081 }
0x17ea   : > { %v4087_v27 = vmul.f32 0.0078125, %v4082_v18 }
0x17eb   : > { %v4084_v16 = vpop.xlane.xlu1 %4083 }
0x17ec   : > { %v4091_v20 = vadd.f32 1e-05, %v4087_v27  ;;  %v4088_v23 = vmul.f32 0.0078125, %v4084_v16 }
0x17ee   : > { %7552 = vrsqrt.f32 %v4091_v20  ;;  %v4092_v9 = vadd.f32 1e-05, %v4088_v23 }
0x17f0   : > { %v7549_v2 = vpop.eup %7548  ;;  %7554 = vrsqrt.f32 %v4092_v9 }
0x17f1   : > { %v4097_v24 = vmul.f32 %v7549_v2, %v9376_v54 }
0x17f2   : > { %v7551_v10 = vpop.eup %7550 }
0x17f3   : > { %v4107_v25 = vmul.f32 %v6227_v49, %v4097_v24  ;;  %v4098_v26 = vmul.f32 %v7551_v10, %v9379_v58 }
0x17f5   : > { %v4108_v42 = vmul.f32 %v6227_v49, %v4098_v26  ;;  %v4117_v43 = vadd.f32 %v6228_v39, %v4107_v25 }
0x17f7   : > { %v4118_v41 = vadd.f32 %v6228_v39, %v4108_v42 }
0x17f8   : > { %v7553_v47 = vpop.eup %7552 }
0x17f9   : > { %v4121_v48 = vpack.c.bf16 %v4118_v41, %v4117_v43  ;;  %v4099_v50 = vmul.f32 %v7553_v47, %v9386_v44 }
0x17fa   : > { %v7555_v29 = vpop.eup %7554 }
0x17fb   : > { %4335 = vmatmul.mubr.bf16.vlgmr.msra.gmra.mrb[56].mxu1 %v4121_v48  ;;  %6769 = vmatprep.mubr.bf16.mxu0 %v4121_v48  ;;  %v4100_v32 = vmul.f32 %v7555_v29, %v9389_v12  ;;  %v4109_v36 = vmul.f32 %v6227_v49, %v4099_v50 }
0x17fc   : > { %4344 = vmatprep.mubr.bf16.mxu1 %v8351_v55 }
0x17fd   : > { %v4110_v54 = vmul.f32 %v6227_v49, %v4100_v32  ;;  %v4119_v37 = vadd.f32 %v6228_v39, %v4109_v36 }
0x17ff   : > { %v4120_v51 = vadd.f32 %v6228_v39, %v4110_v54 }
0x1801   : > { %v4122_v58 = vpack.c.bf16 %v4120_v51, %v4119_v37 }
0x1803   : > { %4345 = vmatmul.mubr.bf16.gmra.mrb[60].mxu1 %v4122_v58  ;;  %6770 = vmatmul.mubr.bf16.vlgmr.msra.gmra.mrb[60].mxu0 %v4122_v58 }
0x1804   : > { %5014 = vmatprep.mubr.bf16.mxu0 %v8351_v55 }
0x18ce   : > { %v4336_v44 = vpop.f32.mrb[56].mxu1 }
0x18cf   : > { %v4338_v63 = vpop.f32.mrb[57].mxu1  ;;  %v4337_v12 = vadd.f32 %v4336_v44, %v4162_v52 }
0x18d0   : > { %v4340_v0 = vpop.f32.mrb[58].mxu1  ;;  %v4339_v3 = vadd.f32 %v4338_v63, %v4166_v53 }
0x18d1   : > { %v4341_v28 = vadd.f32 %v4340_v0, %v4162_v52  ;;  %v4342_v34 = vpop.f32.mrb[59].mxu1 }
0x18d2   : > { %v4343_v4 = vadd.f32 %v4342_v34, %v4166_v53 }
0x18d3   : > { %v4404_v40 = vpack.c.bf16 %v4341_v28, %v4337_v12 }
0x18d4   : > { %v4406_v1 = vpack.c.bf16 %v4343_v4, %v4339_v3 }
0x18d5   : > { %6777 = vmatprep.mubr.bf16.mxu1 %v4404_v40 }
0x18d6   : > { %v4346_v6 = vpop.f32.mrb[60].mxu1  ;;  %v6771_v8 = vpop.f32.mrb[60].mxu0  ;;  %6773 = vmatprep.subr.bf16.mxu1 %v4406_v1 }
0x18d7   : > { %v4348_v59 = vpop.f32.mrb[61].mxu1  ;;  %v4389_v60 = vpop.f32.mrb[61].mxu0  ;;  %6774 = vmatpush3.bf16.xpose.msra.mxu1 %v4406_v1  ;;  %v4347_v11 = vadd.f32 %v4346_v6, %v4162_v52  ;;  %v4398_v46 = vadd.f32 %v6771_v8, %v4170_v5  ;;  %v7380_v8 = vld [vmem:[#allocation19 + $0x80] sm:$0xff]  }
0x18d8   : > { %v4350_v45 = vpop.f32.mrb[62].mxu1  ;;  %v6772_v61 = vpop.f32.mrb[62].mxu0  ;;  %v4349_v27 = vadd.f32 %v4348_v59, %v4166_v53  ;;  %v4390_v16 = vadd.f32 %v4389_v60, %v4170_v5 }
0x18d9   : > { %v4351_v13 = vadd.f32 %v4350_v45, %v4162_v52  ;;  %v4401_v7 = vadd.f32 %v6772_v61, %v4170_v5  ;;  %v4352_v17 = vpop.f32.mrb[63].mxu1  ;;  %v4392_v18 = vpop.f32.mrb[63].mxu0 }
0x18da   : > { %v4353_v20 = vadd.f32 %v4352_v17, %v4166_v53  ;;  %v4393_v23 = vadd.f32 %v4392_v18, %v4170_v5 }
0x18db   : > { %v4405_v9 = vpack.c.bf16 %v4351_v13, %v4347_v11  ;;  %v4512_v2 = vpack.c.bf16 %v4401_v7, %v4398_v46 }
0x18dc   : > { %v4407_v49 = vpack.c.bf16 %v4353_v20, %v4349_v27  ;;  %v4511_v24 = vpack.c.bf16 %v4393_v23, %v4390_v16 }
0x18de   : > { %6775 = vmatprep.subr.bf16.mxu1 %v4407_v49 }
0x18df   : > { %6776 = vmatpush3.bf16.xpose.msra.mxu1 %v4407_v49  ;;  %v7383_v49 = vld [vmem:[#allocation19 + $0x98] sm:$0xff]  }
0x18e0   : > { %6781 = vmatprep.subr.bf16.mxu1 %v4511_v24 }
0x18e6   : > { %6778 = vmatmul.mubr.bf16.vlgmr.msra.gmra.mrb[64].mxu1 %v4405_v9  ;;  %v7381_v9 = vld [vmem:[#allocation19 + $0x88] sm:$0xff]  }
0x18e7   : > { %6782 = vmatpush3.bf16.msra.mxu1 %v4511_v24  ;;  %v7384_v24 = vld [vmem:[#allocation19 + $0xa0] sm:$0xff]  }
0x18e8   : > { %6783 = vmatprep.subr.bf16.mxu1 %v4512_v2 }
0x18eb   : > { %6784 = vmatpush3.bf16.msra.mxu1 %v4512_v2  ;;  %v7382_v2 = vld [vmem:[#allocation19 + $0x90] sm:$0xff]  }
0x18ec   : > { %6789 = vmatprep.subr.bf16.mxu1 %v7380_v8 }
0x19b9   : > { %v6779_v10 = vpop.f32.mrb[64].mxu1 }
0x19ba   : > { %v4442_v25 = vpop.f32.mrb[65].mxu1  ;;  %v4459_v26 = vmul.f32 0.088388346, %v6779_v10  ;;  %v7385_v10 = vld [vmem:[#allocation19 + $0xa8] sm:$0xff]  }
0x19bb   : > { %v4457_v39 = vmul.f32 0.088388346, %v4442_v25  ;;  %v6780_v42 = vpop.f32.mrb[66].mxu1  ;;  %v7386_v25 = vld [vmem:[#allocation19 + $0xb0] sm:$0xff]  }
0x19bc   : > { %v4445_v43 = vpop.f32.mrb[67].mxu1  ;;  %v4460_v41 = vmul.f32 0.088388346, %v6780_v42  ;;  %v4463_v32 = vsel %vm9165_vm6, %v4459_v26, -1e+30  ;;  %v7387_v26 = vld [vmem:[#allocation19 + $0xb8] sm:$0xff]  }
0x19bd   : > { %v4458_v47 = vmul.f32 0.088388346, %v4445_v43  ;;  %v4461_v48 = vsel %vm9160_vm4, %v4457_v39, -1e+30  ;;  %v4471_v37 = vsel %vm1620_vm5, %v4463_v32, -inf }
0x19be   : > { %v4465_v50 = vsel %vm1620_vm5, %v4461_v48, -inf  ;;  %v4464_v54 = vsel %vm9178_vm9, %v4460_v41, -1e+30 }
0x19bf   : > { %4466 = vmax.xlane.f32.xlu0 %v4465_v50  ;;  %v4462_v29 = vsel %vm9170_vm8, %v4458_v47, -1e+30  ;;  %v4474_v14 = vsel %vm1620_vm5, %v4464_v54, -inf  ;;  %v6255_v50 = vld [vmem:[#allocation20 + $0x2] ss:$0 sm:$0xff] }
0x19c0   : > { %v4468_v36 = vsel %vm1620_vm5, %v4462_v29, -inf }
0x19c1   : > { %4469 = vmax.xlane.f32.xlu1 %v4468_v36 }
0x19c3   : > { %4472 = vmax.xlane.f32.xlu0 %v4471_v37 }
0x19c5   : > { %4475 = vmax.xlane.f32.xlu1 %v4474_v14 }
0x1a4c   : > { %v4467_v51 = vpop.xlane.xlu0 %4466 }
0x1a4d   : > { %v4477_v58 = vsub.f32 %v4461_v48, %v4467_v51 }
0x1a4e   : > { %v4470_v15 = vpop.xlane.xlu1 %4469 }
0x1a4f   : > { %v4481_v21 = vmul.f32 1.442695, %v4477_v58  ;;  %v4478_v52 = vsub.f32 %v4462_v29, %v4470_v15 }
0x1a50   : > { %v4473_v44 = vpop.xlane.xlu0 %4472 }
0x1a51   : > { %7556 = vpow2.f32 %v4481_v21  ;;  %v4483_v19 = vmul.f32 1.442695, %v4478_v52  ;;  %v4479_v53 = vsub.f32 %v4463_v32, %v4473_v44 }
0x1a52   : > { %v4476_v63 = vpop.xlane.xlu1 %4475 }
0x1a53   : > { %7558 = vpow2.f32 %v4483_v19  ;;  %v4485_v0 = vmul.f32 1.442695, %v4479_v53  ;;  %v4480_v22 = vsub.f32 %v4464_v54, %v4476_v63  ;;  %v7390_v19 = vld [vmem:[#allocation25 + $0x204] ss:$16 sps:$4 sm:$0xff]   ;;  %v7391_v53 = vld [vmem:[#allocation25 + $0x208] ss:$16 sps:$4 sm:$0xff]  }
0x1a54   : > { %v7393_v63 = vld [vmem:[#allocation25 + $0x20c] ss:$16 sps:$4 sm:$0xff]   ;;  %4982 = vmatprep.subr.bf16.mxu0 %v7390_v19 }
0x1a55   : > { %7560 = vpow2.f32 %v4485_v0  ;;  %v4487_v12 = vmul.f32 1.442695, %v4480_v22  ;;  %v7399_v0 = vld [vmem:[#allocation25 + $0x22c] ss:$16 sps:$4 sm:$0xff]   ;;  %v7397_v22 = vld [vmem:[#allocation25 + $0x228] ss:$16 sps:$4 sm:$0xff]  }
0x1a57   : > { %7562 = vpow2.f32 %v4487_v12 }
0x1a5b   : > { %v7557_v28 = vpop.eup %7556 }
0x1a5c   : > { %v4489_v34 = vsel %vm1620_vm5, %v7557_v28, 0.0 }
0x1a5d   : > { %v7559_v3 = vpop.eup %7558  ;;  %4490 = vadd.xlane.f32.xlu0 %v4489_v34 }
0x1a5e   : > { %v4492_v4 = vsel %vm1620_vm5, %v7559_v3, 0.0 }
0x1a5f   : > { %v7561_v40 = vpop.eup %7560  ;;  %4493 = vadd.xlane.f32.xlu1 %v4492_v4 }
0x1a60   : > { %v4495_v1 = vsel %vm1620_vm5, %v7561_v40, 0.0 }
0x1a61   : > { %v7563_v5 = vpop.eup %7562  ;;  %4496 = vadd.xlane.f32.xlu0 %v4495_v1 }
0x1a62   : > { %v4498_v6 = vsel %vm1620_vm5, %v7563_v5, 0.0 }
0x1a63   : > { %4499 = vadd.xlane.f32.xlu1 %v4498_v6 }
0x1aea   : > { %v4491_v59 = vpop.xlane.xlu0 %4490 }
0x1aeb   : > { %7564 = vrcp.f32 %v4491_v59 }
0x1aec   : > { %v4494_v60 = vpop.xlane.xlu1 %4493 }
0x1aed   : > { %7566 = vrcp.f32 %v4494_v60 }
0x1aee   : > { %v4497_v45 = vpop.xlane.xlu0 %4496 }
0x1aef   : > { %7568 = vrcp.f32 %v4497_v45 }
0x1af0   : > { %v4500_v61 = vpop.xlane.xlu1 %4499 }
0x1af1   : > { %7570 = vrcp.f32 %v4500_v61 }
0x1af5   : > { %v7565_v11 = vpop.eup %7564 }
0x1af6   : > { %v4505_v13 = vmul.f32 %v7565_v11, %v7557_v28 }
0x1af7   : > { %v7567_v46 = vpop.eup %7566 }
0x1af8   : > { %v4506_v7 = vmul.f32 %v7567_v46, %v7559_v3  ;;  %v7402_v46 = vld [vmem:[#allocation25 + $0x244] ss:$16 sps:$4 sm:$0xff]  }
0x1af9   : > { %v7569_v17 = vpop.eup %7568 }
0x1afa   : > { %v4509_v18 = vpack.c.bf16 %v4506_v7, %v4505_v13  ;;  %v4507_v16 = vmul.f32 %v7569_v17, %v7561_v40  ;;  %v7405_v13 = vld [vmem:[#allocation25 + $0x24c] ss:$16 sps:$4 sm:$0xff]   ;;  %v7400_v7 = vld [vmem:[#allocation25 + $0x240] ss:$16 sps:$4 sm:$0xff]   ;;  %v7403_v17 = vld [vmem:[#allocation25 + $0x248] ss:$16 sps:$4 sm:$0xff]  }
0x1afb   : > { %v7571_v27 = vpop.eup %7570 }
0x1afc   : > { %v4508_v20 = vmul.f32 %v7571_v27, %v7563_v5  ;;  %6785 = vmatprep.mubr.msk.bf16.mxu1 %vm1620_vm5, %v4509_v18  ;;  %v7408_v18 = vld [vmem:[#allocation25 + $0x264] ss:$16 sps:$4 sm:$0xff]   ;;  %v7411_v27 = vld [vmem:[#allocation25 + $0x26c] ss:$16 sps:$4 sm:$0xff]  }
0x1afe   : > { %v4510_v23 = vpack.c.bf16 %v4508_v20, %v4507_v16  ;;  %v7406_v16 = vld [vmem:[#allocation25 + $0x260] ss:$16 sps:$4 sm:$0xff]   ;;  %v7409_v20 = vld [vmem:[#allocation25 + $0x268] ss:$16 sps:$4 sm:$0xff]  }
0x1b00   : > { %6786 = vmatmul.mubr.msk.bf16.vlgmr.msra.gmra.mrb[68].mxu1 %vm1620_vm5, %v4510_v23  ;;  %v7414_v23 = vld [vmem:[#allocation25 + $0x284] ss:$16 sps:$4 sm:$0xff]  }
0x1b01   : > { %6790 = vmatpush3.bf16.msra.mxu1 %v7380_v8 }
0x1b02   : > { %6791 = vmatprep.subr.bf16.mxu1 %v7381_v9 }
0x1b05   : > { %6792 = vmatpush3.bf16.msra.mxu1 %v7381_v9  ;;  %v7417_v9 = vld [vmem:[#allocation25 + $0x28c] ss:$16 sps:$4 sm:$0xff]  }
0x1b06   : > { %6793 = vmatprep.subr.bf16.mxu1 %v7382_v2 }
0x1b09   : > { %6794 = vmatpush3.bf16.msra.mxu1 %v7382_v2  ;;  %v7412_v2 = vld [vmem:[#allocation25 + $0x280] ss:$16 sps:$4 sm:$0xff]  }
0x1b0a   : > { %6795 = vmatprep.subr.bf16.mxu1 %v7383_v49 }
0x1b0d   : > { %6796 = vmatpush3.bf16.msra.mxu1 %v7383_v49  ;;  %v7415_v49 = vld [vmem:[#allocation25 + $0x288] ss:$16 sps:$4 sm:$0xff]  }
0x1b0e   : > { %6797 = vmatprep.subr.bf16.mxu1 %v7384_v24 }
0x1b11   : > { %6798 = vmatpush3.bf16.msra.mxu1 %v7384_v24  ;;  %v7420_v24 = vld [vmem:[#allocation25 + $0x2a4] ss:$16 sps:$4 sm:$0xff]  }
0x1b12   : > { %6799 = vmatprep.subr.bf16.mxu1 %v7385_v10 }
0x1b15   : > { %6800 = vmatpush3.bf16.msra.mxu1 %v7385_v10  ;;  %v7423_v10 = vld [vmem:[#allocation25 + $0x2ac] ss:$16 sps:$4 sm:$0xff]  }
0x1b16   : > { %6801 = vmatprep.subr.bf16.mxu1 %v7386_v25 }
0x1b19   : > { %6802 = vmatpush3.bf16.msra.mxu1 %v7386_v25  ;;  %v7418_v25 = vld [vmem:[#allocation25 + $0x2a0] ss:$16 sps:$4 sm:$0xff]  }
0x1b1a   : > { %6803 = vmatprep.subr.bf16.mxu1 %v7387_v26 }
0x1b1d   : > { %6804 = vmatpush3.bf16.msra.mxu1 %v7387_v26  ;;  %v7421_v26 = vld [vmem:[#allocation25 + $0x2a8] ss:$16 sps:$4 sm:$0xff]  }
0x1b1e   : > { %5035 = vmatprep.subr.bf16.mxu1 %v7393_v63 }
0x1bd3   : > { %v6787_v39 = vpop.f32.mrb[68].mxu1 }
0x1bd4   : > { %v4553_v42 = vpop.f32.mrb[69].mxu1 }
0x1bd5   : > { %v6788_v43 = vpop.f32.mrb[70].mxu1 }
0x1bd6   : > { %v4569_v41 = vpack.c.bf16 %v6788_v43, %v6787_v39  ;;  %v4556_v47 = vpop.f32.mrb[71].mxu1  ;;  %v7426_v39 = vld [vmem:[#allocation25 + $0x2c4] ss:$16 sps:$4 sm:$0xff]   ;;  %v7424_v43 = vld [vmem:[#allocation25 + $0x2c0] ss:$16 sps:$4 sm:$0xff]  }
0x1bd7   : > { %v4568_v48 = vpack.c.bf16 %v4556_v47, %v4553_v42  ;;  %v7429_v42 = vld [vmem:[#allocation25 + $0x2cc] ss:$16 sps:$4 sm:$0xff]   ;;  %v7432_v47 = vld [vmem:[#allocation25 + $0x2e4] ss:$16 sps:$4 sm:$0xff]  }
0x1bd9   : > { %6805 = vmatprep.mubr.bf16.mxu1 %v4568_v48  ;;  %v7435_v48 = vld [vmem:[#allocation25 + $0x2ec] ss:$16 sps:$4 sm:$0xff]  }
0x1bda   : > { %6806 = vmatmul.mubr.bf16.vlgmr.msra.gmra.mrb[72].mxu1 %v4569_v41  ;;  %v7427_v41 = vld [vmem:[#allocation25 + $0x2c8] ss:$16 sps:$4 sm:$0xff]  }
0x1bdb   : > { %5067 = vmatprep.mubr.bf16.mxu1 %v8351_v55  ;;  %5036 = vmatpush1.bf16.msra.mxu1 %v7391_v53 }
0x1bdc   : > { %5037 = vmatprep.subr.bf16.mxu1 %v7399_v0 }
0x1bdf   : > { %5038 = vmatpush1.bf16.msra.mxu1 %v7397_v22 }
0x1be0   : > { %5039 = vmatprep.subr.bf16.mxu1 %v7405_v13 }
0x1be3   : > { %5040 = vmatpush1.bf16.msra.mxu1 %v7403_v17  ;;  %v7438_v17 = vld [vmem:[#allocation28 + $0x200] sm:$0xff]  }
0x1be4   : > { %5041 = vmatprep.subr.bf16.mxu1 %v7411_v27  ;;  %v7440_v27 = vld [vmem:[#allocation28 + $0x248] sm:$0xff]  }
0x1be7   : > { %5042 = vmatpush1.bf16.msra.mxu1 %v7409_v20  ;;  %v7442_v20 = vld [vmem:[#allocation28 + $0x208] sm:$0xff]  }
0x1be8   : > { %5043 = vmatprep.subr.bf16.mxu1 %v7417_v9 }
0x1beb   : > { %5044 = vmatpush1.bf16.msra.mxu1 %v7415_v49  ;;  %v7446_v49 = vld [vmem:[#allocation28 + $0x210] sm:$0xff]  }
0x1bec   : > { %5045 = vmatprep.subr.bf16.mxu1 %v7423_v10  ;;  %v7448_v10 = vld [vmem:[#allocation28 + $0x258] sm:$0xff]  }
0x1bef   : > { %5046 = vmatpush1.bf16.msra.mxu1 %v7421_v26  ;;  %v7451_v26 = vld [vmem:[#allocation28 + $0x298] sm:$0xff]  }
0x1bf0   : > { %5047 = vmatprep.subr.bf16.mxu1 %v7429_v42  ;;  %v7453_v42 = vld [vmem:[#allocation28 + $0x2e0] sm:$0xff]  }
0x1bf3   : > { %5048 = vmatpush1.bf16.msra.mxu1 %v7427_v41  ;;  %v7455_v41 = vld [vmem:[#allocation28 + $0x2a0] sm:$0xff]  }
0x1bf4   : > { %5049 = vmatprep.subr.bf16.mxu1 %v7435_v48  ;;  %v7457_v48 = vld [vmem:[#allocation28 + $0x2e8] sm:$0xff]  }
0x1cad   : > { %v6807_v29 = vpop.f32.mrb[72].mxu1 }
0x1cae   : > { %v4677_v32 = vpop.f32.mrb[73].mxu1  ;;  %v4686_v14 = vadd.f32 %v6807_v29, %v6255_v50  ;;  %v7433_v29 = vld [vmem:[#allocation25 + $0x2e8] ss:$16 sps:$4 sm:$0xff]  }
0x1caf   : > { %v4678_v36 = vadd.f32 %v6255_v50, %v4677_v32  ;;  %v6808_v54 = vpop.f32.mrb[74].mxu1  ;;  %5050 = vmatpush1.bf16.msra.mxu1 %v7433_v29  ;;  %v7436_v32 = vld [vmem:[#allocation28 + $0x240] sm:$0xff]   ;;  %v7459_v29 = vld [vmem:[#allocation28 + $0x2a8] sm:$0xff]  }
0x1cb0   : > { %v4680_v37 = vpop.f32.mrb[75].mxu1  ;;  %v4689_v15 = vadd.f32 %v6808_v54, %v6255_v50  ;;  %v9431_v52 = vadd.f32 %v4686_v14, %v9368_v62  ;;  %v7394_v62 = vld [vmem:[#allocation25 + $0x220] ss:$16 sps:$4 sm:$0xff]  }
0x1cb1   : > { %v9424_v51 = vadd.f32 %v4678_v36, %v9360_v57  ;;  %v4681_v58 = vadd.f32 %v6255_v50, %v4680_v37  ;;  %v7388_v57 = vld [vmem:[#allocation25 + $0x200] ss:$16 sps:$4 sm:$0xff]  }
0x1cb2   : > { %v9435_v44 = vadd.f32 %v4689_v15, %v9372_v38  ;;  %4983 = vmatpush1.bf16.msra.mxu0 %v7388_v57  ;;  %v7430_v50 = vld [vmem:[#allocation25 + $0x2e0] ss:$16 sps:$4 sm:$0xff]  }
0x1cb3   : > { %v9427_v21 = vadd.f32 %v4681_v58, %v9364_v30  ;;  %4700 = vadd.xlane.f32.xlu0 %v9424_v51  ;;  %v7396_v30 = vld [vmem:[#allocation25 + $0x224] ss:$16 sps:$4 sm:$0xff]   ;;  %v7437_v36 = vld [vmem:[#allocation28 + $0x2c0] sm:$0xff]  }
0x1cb4   : > { %4984 = vmatprep.subr.bf16.mxu0 %v7396_v30  ;;  %6583 = vmatprep.subr.bf16.mxu1 %v7437_v36  ;;  %v7461_v36 = vld [vmem:[#allocation28 + $0x2f0] sm:$0xff]  }
0x1cb5   : > { %4702 = vadd.xlane.f32.xlu1 %v9427_v21 }
0x1cb6   : > { %4985 = vmatpush1.bf16.msra.mxu0 %v7394_v62 }
0x1cb7   : > { %4704 = vadd.xlane.f32.xlu0 %v9431_v52  ;;  %4986 = vmatprep.subr.bf16.mxu0 %v7402_v46 }
0x1cb9   : > { %4706 = vadd.xlane.f32.xlu1 %v9435_v44 }
0x1cba   : > { %4987 = vmatpush1.bf16.msra.mxu0 %v7400_v7 }
0x1cbb   : > { %4988 = vmatprep.subr.bf16.mxu0 %v7408_v18  ;;  %v7439_v18 = vld [vmem:[#allocation28 + $0x280] sm:$0xff]  }
0x1cbe   : > { %4989 = vmatpush1.bf16.msra.mxu0 %v7406_v16 }
0x1cbf   : > { %4990 = vmatprep.subr.bf16.mxu0 %v7414_v23  ;;  %v7445_v23 = vld [vmem:[#allocation28 + $0x2d0] sm:$0xff]  }
0x1cc2   : > { %4991 = vmatpush1.bf16.msra.mxu0 %v7412_v2 }
0x1cc3   : > { %4992 = vmatprep.subr.bf16.mxu0 %v7420_v24  ;;  %v7447_v24 = vld [vmem:[#allocation28 + $0x290] sm:$0xff]  }
0x1cc6   : > { %4993 = vmatpush1.bf16.msra.mxu0 %v7418_v25  ;;  %v7449_v25 = vld [vmem:[#allocation28 + $0x2d8] sm:$0xff]  }
0x1cc7   : > { %4994 = vmatprep.subr.bf16.mxu0 %v7426_v39  ;;  %v7452_v39 = vld [vmem:[#allocation28 + $0x260] sm:$0xff]  }
0x1cca   : > { %4995 = vmatpush1.bf16.msra.mxu0 %v7424_v43  ;;  %v7454_v43 = vld [vmem:[#allocation28 + $0x220] sm:$0xff]  }
0x1ccb   : > { %4996 = vmatprep.subr.bf16.mxu0 %v7432_v47  ;;  %v7456_v47 = vld [vmem:[#allocation28 + $0x268] sm:$0xff]  }
0x1cce   : > { %4997 = vmatpush1.bf16.msra.mxu0 %v7430_v50  ;;  %v7458_v50 = vld [vmem:[#allocation28 + $0x228] sm:$0xff]  }
0x1ccf   : > { %6555 = vmatprep.subr.bf16.mxu0 %v7436_v32  ;;  %v7460_v32 = vld [vmem:[#allocation28 + $0x270] sm:$0xff]  }
0x1d40   : > { %v4701_v38 = vpop.xlane.xlu0 %4700 }
0x1d41   : > { %v4708_v12 = vmul.f32 0.0078125, %v4701_v38  ;;  %v6264_v38 = vld [vmem:[#allocation22 + $0x2] ss:$0 sm:$0xff] }
0x1d42   : > { %v4703_v28 = vpop.xlane.xlu1 %4702 }
0x1d43   : > { %v9440_v34 = vsub.f32 %v9424_v51, %v4708_v12  ;;  %v4709_v3 = vmul.f32 0.0078125, %v4703_v28 }
0x1d44   : > { %v4705_v4 = vpop.xlane.xlu0 %4704 }
0x1d45   : > { %v9443_v40 = vsub.f32 %v9427_v21, %v4709_v3  ;;  %v4710_v1 = vmul.f32 0.0078125, %v4705_v4  ;;  %v4716_v5 = vmul.f32 %v9440_v34, %v9440_v34 }
0x1d46   : > { %v4707_v6 = vpop.xlane.xlu1 %4706 }
0x1d47   : > { %v9448_v8 = vsub.f32 %v9431_v52, %v4710_v1  ;;  %v4711_v59 = vmul.f32 0.0078125, %v4707_v6  ;;  %4720 = vadd.xlane.f32.xlu0 %v4716_v5  ;;  %v4717_v60 = vmul.f32 %v9443_v40, %v9443_v40  ;;  %v6265_v5 = vld [vmem:[#allocation23 + $0x2] ss:$0 sm:$0xff] }
0x1d49   : > { %v9453_v45 = vsub.f32 %v9435_v44, %v4711_v59  ;;  %4722 = vadd.xlane.f32.xlu1 %v4717_v60  ;;  %v4718_v61 = vmul.f32 %v9448_v8, %v9448_v8 }
0x1d4b   : > { %4724 = vadd.xlane.f32.xlu0 %v4718_v61  ;;  %v4719_v11 = vmul.f32 %v9453_v45, %v9453_v45 }
0x1d4d   : > { %4726 = vadd.xlane.f32.xlu1 %v4719_v11 }
0x1dd4   : > { %v4721_v54 = vpop.xlane.xlu0 %4720 }
0x1dd5   : > { %v4728_v37 = vmul.f32 0.0078125, %v4721_v54  ;;  %v7462_v54 = vld [vmem:[#allocation28 + $0x230] sm:$0xff]  }
0x1dd6   : > { %v4723_v14 = vpop.xlane.xlu1 %4722 }
0x1dd7   : > { %v4732_v58 = vadd.f32 1e-05, %v4728_v37  ;;  %v4729_v15 = vmul.f32 0.0078125, %v4723_v14  ;;  %v7463_v37 = vld [vmem:[#allocation28 + $0x2b0] sm:$0xff]   ;;  %v7464_v14 = vld [vmem:[#allocation28 + $0x278] sm:$0xff]  }
0x1dd8   : > { %v4725_v57 = vpop.xlane.xlu0 %4724 }
0x1dd9   : > { %7572 = vrsqrt.f32 %v4732_v58  ;;  %v4733_v19 = vadd.f32 1e-05, %v4729_v15  ;;  %v4730_v53 = vmul.f32 0.0078125, %v4725_v57  ;;  %v7465_v58 = vld [vmem:[#allocation28 + $0x2f8] sm:$0xff]  }
0x1dda   : > { %v4727_v63 = vpop.xlane.xlu1 %4726  ;;  %v7466_v15 = vld [vmem:[#allocation28 + $0x238] sm:$0xff]  }
0x1ddb   : > { %7574 = vrsqrt.f32 %v4733_v19  ;;  %v4734_v30 = vadd.f32 1e-05, %v4730_v53  ;;  %v4731_v0 = vmul.f32 0.0078125, %v4727_v63  ;;  %v7467_v57 = vld [vmem:[#allocation28 + $0x2b8] sm:$0xff]  }
0x1ddc   : > { %v4800_v19 = vld [vmem:[#allocation26 + $0x8] sm:$0xf] }
0x1ddd   : > { %7576 = vrsqrt.f32 %v4734_v30  ;;  %v4735_v62 = vadd.f32 1e-05, %v4731_v0  ;;  %v4805_v53 = vrot.slane %v4800_v19, %v9144_v31  ;;  %v4813_v63 = vrot.slane %v4800_v19, %v9151_v35 }
0x1dde   : > { %v4809_v30 = vrot.slane %v4800_v19, %v9147_v33  ;;  %v4817_v0 = vrot.slane %v4800_v19, %v9241_v56 }
0x1ddf   : > { %7578 = vrsqrt.f32 %v4735_v62 }
0x1de3   : > { %v7573_v22 = vpop.eup %7572 }
0x1de4   : > { %v4740_v12 = vmul.f32 %v7573_v22, %v9440_v34  ;;  %v7441_v34 = vld [vmem:[#allocation28 + $0x2c8] sm:$0xff]  }
0x1de5   : > { %v7575_v28 = vpop.eup %7574 }
0x1de6   : > { %v4741_v3 = vmul.f32 %v7575_v28, %v9443_v40  ;;  %v4750_v4 = vmul.f32 %v6264_v38, %v4740_v12 }
0x1de7   : > { %v7577_v1 = vpop.eup %7576 }
0x1de8   : > { %v4751_v6 = vmul.f32 %v6264_v38, %v4741_v3  ;;  %v4760_v60 = vadd.f32 %v6265_v5, %v4750_v4  ;;  %v4742_v11 = vmul.f32 %v7577_v1, %v9448_v8  ;;  %v7443_v8 = vld [vmem:[#allocation28 + $0x288] sm:$0xff]  }
0x1de9   : > { %v7579_v59 = vpop.eup %7578 }
0x1dea   : > { %v4761_v61 = vadd.f32 %v6265_v5, %v4751_v6  ;;  %v4743_v46 = vmul.f32 %v7579_v59, %v9453_v45  ;;  %v4752_v40 = vmul.f32 %v6264_v38, %v4742_v11  ;;  %v7444_v45 = vld [vmem:[#allocation28 + $0x250] sm:$0xff]  }
0x1dec   : > { %v4764_v13 = vpack.c.bf16 %v4761_v61, %v4760_v60  ;;  %v4753_v7 = vmul.f32 %v6264_v38, %v4743_v46  ;;  %v4762_v9 = vadd.f32 %v6265_v5, %v4752_v40 }
0x1dee   : > { %5015 = vmatmul.mubr.bf16.vlgmr.msra.gmra.mrb[64].mxu0 %v4764_v13  ;;  %5068 = vmatmul.mubr.bf16.vlgmr.msra.gmra.mrb[76].mxu1 %v4764_v13  ;;  %v4763_v16 = vadd.f32 %v6265_v5, %v4753_v7 }
0x1def   : > { %5024 = vmatprep.mubr.bf16.mxu0 %v8351_v55  ;;  %5077 = vmatprep.mubr.bf16.mxu1 %v8351_v55  ;;  %v7450_v55 = vld [vmem:[#allocation28 + $0x218] sm:$0xff]  }
0x1df0   : > { %6556 = vmatpush3.bf16.msra.mxu0 %v7438_v17  ;;  %6584 = vmatpush3.bf16.msra.mxu1 %v7439_v18  ;;  %v4765_v2 = vpack.c.bf16 %v4763_v16, %v4762_v9 }
0x1df1   : > { %6557 = vmatprep.subr.bf16.mxu0 %v7440_v27  ;;  %6585 = vmatprep.subr.bf16.mxu1 %v7441_v34 }
0x1df4   : > { %6558 = vmatpush3.bf16.msra.mxu0 %v7442_v20  ;;  %6586 = vmatpush3.bf16.msra.mxu1 %v7443_v8 }
0x1df5   : > { %6559 = vmatprep.subr.bf16.mxu0 %v7444_v45  ;;  %6587 = vmatprep.subr.bf16.mxu1 %v7445_v23 }
0x1df6   : > { %5025 = vmatmul.mubr.bf16.gmra.mrb[68].mxu0 %v4765_v2  ;;  %5078 = vmatmul.mubr.bf16.gmra.mrb[80].mxu1 %v4765_v2 }
0x1df8   : > { %6560 = vmatpush3.bf16.msra.mxu0 %v7446_v49  ;;  %6588 = vmatpush3.bf16.msra.mxu1 %v7447_v24 }
0x1df9   : > { %6561 = vmatprep.subr.bf16.mxu0 %v7448_v10  ;;  %6589 = vmatprep.subr.bf16.mxu1 %v7449_v25 }
0x1dfc   : > { %6562 = vmatpush3.bf16.msra.mxu0 %v7450_v55  ;;  %6590 = vmatpush3.bf16.msra.mxu1 %v7451_v26 }
0x1dfd   : > { %6563 = vmatprep.subr.bf16.mxu0 %v7452_v39  ;;  %6591 = vmatprep.subr.bf16.mxu1 %v7453_v42 }
0x1e00   : > { %6564 = vmatpush3.bf16.msra.mxu0 %v7454_v43  ;;  %6592 = vmatpush3.bf16.msra.mxu1 %v7455_v41 }
0x1e01   : > { %6565 = vmatprep.subr.bf16.mxu0 %v7456_v47  ;;  %6593 = vmatprep.subr.bf16.mxu1 %v7457_v48 }
0x1e04   : > { %6566 = vmatpush3.bf16.msra.mxu0 %v7458_v50  ;;  %6594 = vmatpush3.bf16.msra.mxu1 %v7459_v29 }
0x1e05   : > { %6567 = vmatprep.subr.bf16.mxu0 %v7460_v32  ;;  %6595 = vmatprep.subr.bf16.mxu1 %v7461_v36 }
0x1e08   : > { %6568 = vmatpush3.bf16.msra.mxu0 %v7462_v54  ;;  %6596 = vmatpush3.bf16.msra.mxu1 %v7463_v37 }
0x1e09   : > { %6569 = vmatprep.subr.bf16.mxu0 %v7464_v14  ;;  %6597 = vmatprep.subr.bf16.mxu1 %v7465_v58 }
0x1e0c   : > { %6570 = vmatpush3.bf16.msra.mxu0 %v7466_v15  ;;  %6598 = vmatpush3.bf16.msra.mxu1 %v7467_v57 }
0x1ec1   : > { %v5016_v62 = vpop.f32.mrb[64].mxu0  ;;  %v5069_v22 = vpop.f32.mrb[76].mxu1 }
0x1ec2   : > { %v5017_v38 = vadd.f32 %v5016_v62, %v4805_v53  ;;  %v5070_v12 = vadd.f32 %v5069_v22, %v4813_v63  ;;  %v5018_v28 = vpop.f32.mrb[65].mxu0  ;;  %v5071_v3 = vpop.f32.mrb[77].mxu1 }
0x1ec3   : > { %v5019_v4 = vadd.f32 %v5018_v28, %v4809_v30  ;;  %v5072_v1 = vadd.f32 %v5071_v3, %v4817_v0  ;;  %v5020_v5 = vpop.f32.mrb[66].mxu0  ;;  %v5073_v6 = vpop.f32.mrb[78].mxu1 }
0x1ec4   : > { %v5021_v59 = vadd.f32 %v5020_v5, %v4805_v53  ;;  %v5074_v60 = vadd.f32 %v5073_v6, %v4813_v63  ;;  %v5022_v61 = vpop.f32.mrb[67].mxu0  ;;  %v5075_v31 = vpop.f32.mrb[79].mxu1  ;;  %v5088_v46 = vmax.f32 %v5017_v38, 0.0  ;;  %v5090_v33 = vmax.f32 %v5070_v12, 0.0 }
0x1ec5   : > { %v5023_v11 = vadd.f32 %v5022_v61, %v4809_v30  ;;  %v5076_v35 = vadd.f32 %v5075_v31, %v4817_v0  ;;  %v5089_v7 = vmax.f32 %v5019_v4, 0.0  ;;  %v5091_v17 = vmax.f32 %v5072_v1, 0.0 }
0x1ec6   : > { %v5092_v13 = vmax.f32 %v5021_v59, 0.0  ;;  %v5094_v56 = vmax.f32 %v5074_v60, 0.0 }
0x1ec7   : > { %v5093_v18 = vmax.f32 %v5023_v11, 0.0  ;;  %v5095_v27 = vmax.f32 %v5076_v35, 0.0 }
0x1ec8   : > { %v5104_v34 = vpack.c.bf16 %v5092_v13, %v5088_v46  ;;  %v5106_v40 = vpack.c.bf16 %v5094_v56, %v5090_v33 }
0x1ec9   : > { %v5105_v16 = vpack.c.bf16 %v5093_v18, %v5089_v7  ;;  %v5107_v20 = vpack.c.bf16 %v5095_v27, %v5091_v17  ;;  %v5026_v8 = vpop.f32.mrb[68].mxu0  ;;  %v5079_v45 = vpop.f32.mrb[80].mxu1 }
0x1eca   : > { %v5027_v23 = vadd.f32 %v5026_v8, %v4805_v53  ;;  %v5080_v9 = vadd.f32 %v5079_v45, %v4813_v63  ;;  %v5028_v2 = vpop.f32.mrb[69].mxu0  ;;  %v5081_v49 = vpop.f32.mrb[81].mxu1 }
0x1ecb   : > { %v5029_v24 = vadd.f32 %v5028_v2, %v4809_v30  ;;  %v5082_v10 = vadd.f32 %v5081_v49, %v4817_v0  ;;  %v5030_v25 = vpop.f32.mrb[70].mxu0  ;;  %v5083_v55 = vpop.f32.mrb[82].mxu1  ;;  %5409 = vmatprep.mubr.bf16.mxu0 %v5105_v16  ;;  %5458 = vmatprep.mubr.bf16.mxu1 %v5107_v20 }
0x1ecc   : > { %v5031_v26 = vadd.f32 %v5030_v25, %v4805_v53  ;;  %v5084_v39 = vadd.f32 %v5083_v55, %v4813_v63  ;;  %v5032_v42 = vpop.f32.mrb[71].mxu0  ;;  %v5085_v43 = vpop.f32.mrb[83].mxu1  ;;  %5410 = vmatmul.mubr.bf16.vlgmr.msra.gmra.mrb[72].mxu0 %v5104_v34  ;;  %5459 = vmatmul.mubr.bf16.vlgmr.msra.gmra.mrb[84].mxu1 %v5106_v40  ;;  %v5096_v48 = vmax.f32 %v5027_v23, 0.0  ;;  %v5098_v50 = vmax.f32 %v5080_v9, 0.0 }
0x1ecd   : > { %v5033_v41 = vadd.f32 %v5032_v42, %v4809_v30  ;;  %v5086_v47 = vadd.f32 %v5085_v43, %v4817_v0  ;;  %v5097_v36 = vmax.f32 %v5029_v24, 0.0  ;;  %v5099_v54 = vmax.f32 %v5082_v10, 0.0  ;;  %v6298_v30 = vld [vmem:[#allocation29 + $0x2] ss:$0 sm:$0xff] }
0x1ece   : > { %v5100_v29 = vmax.f32 %v5031_v26, 0.0  ;;  %v5102_v32 = vmax.f32 %v5084_v39, 0.0 }
0x1ecf   : > { %v5101_v37 = vmax.f32 %v5033_v41, 0.0  ;;  %v5103_v14 = vmax.f32 %v5086_v47, 0.0 }
0x1ed0   : > { %v5108_v58 = vpack.c.bf16 %v5100_v29, %v5096_v48  ;;  %v5110_v15 = vpack.c.bf16 %v5102_v32, %v5098_v50  ;;  %v7468_v50 = vld [vmem:[#allocation34] sm:$0xff]   ;;  %v7469_v29 = vld [vmem:[#allocation34 + $0x8] sm:$0xff]   ;;  %v7470_v32 = vld [vmem:[#allocation34 + $0x10] sm:$0xff]  }
0x1ed1   : > { %v5109_v57 = vpack.c.bf16 %v5101_v37, %v5097_v36  ;;  %v5111_v19 = vpack.c.bf16 %v5103_v14, %v5099_v54  ;;  %6809 = vmatprep.subr.bf16.mxu0 %v7468_v50  ;;  %v7471_v36 = vld [vmem:[#allocation34 + $0x18] sm:$0xff]   ;;  %v7472_v54 = vld [vmem:[#allocation34 + $0x20] sm:$0xff]   ;;  %v7473_v37 = vld [vmem:[#allocation34 + $0x28] sm:$0xff]  }
0x1ed2   : > { %6810 = vmatpush3.bf16.msra.mxu0 %v7468_v50  ;;  %v7474_v14 = vld [vmem:[#allocation34 + $0x30] sm:$0xff]  }
0x1ed3   : > { %5417 = vmatprep.mubr.bf16.mxu0 %v5109_v57  ;;  %5466 = vmatprep.mubr.bf16.mxu1 %v5111_v19 }
0x1ed4   : > { %5418 = vmatmul.mubr.bf16.gmra.mrb[76].mxu0 %v5108_v58  ;;  %5467 = vmatmul.mubr.bf16.gmra.mrb[88].mxu1 %v5110_v15  ;;  %v7475_v58 = vld [vmem:[#allocation34 + $0x38] sm:$0xff]  }
0x1ed5   : > { %6811 = vmatprep.subr.bf16.mxu0 %v7469_v29 }
0x1ed6   : > { %6812 = vmatpush3.bf16.msra.mxu0 %v7469_v29 }
0x1ed7   : > { %6813 = vmatprep.subr.bf16.mxu0 %v7470_v32 }
0x1eda   : > { %6814 = vmatpush3.bf16.msra.mxu0 %v7470_v32 }
0x1edb   : > { %6815 = vmatprep.subr.bf16.mxu0 %v7471_v36 }
0x1ede   : > { %6816 = vmatpush3.bf16.msra.mxu0 %v7471_v36 }
0x1edf   : > { %6817 = vmatprep.subr.bf16.mxu0 %v7472_v54 }
0x1ee2   : > { %6818 = vmatpush3.bf16.msra.mxu0 %v7472_v54 }
0x1ee3   : > { %6819 = vmatprep.subr.bf16.mxu0 %v7473_v37 }
0x1ee6   : > { %6820 = vmatpush3.bf16.msra.mxu0 %v7473_v37 }
0x1ee7   : > { %6821 = vmatprep.subr.bf16.mxu0 %v7474_v14 }
0x1eea   : > { %6822 = vmatpush3.bf16.msra.mxu0 %v7474_v14 }
0x1eeb   : > { %6823 = vmatprep.subr.bf16.mxu0 %v7475_v58 }
0x1eee   : > { %6824 = vmatpush3.bf16.msra.mxu0 %v7475_v58 }
0x1f9f   : > { %v6571_v53 = vpop.f32.mrb[72].mxu0  ;;  %v6599_v63 = vpop.f32.mrb[84].mxu1 }
0x1fa0   : > { %v6572_v0 = vpop.f32.mrb[73].mxu0  ;;  %v6600_v62 = vpop.f32.mrb[85].mxu1 }
0x1fa1   : > { %v6573_v22 = vadd.f32 %v6572_v0, %v6571_v53  ;;  %v6601_v38 = vadd.f32 %v6600_v62, %v6599_v63  ;;  %v6574_v12 = vpop.f32.mrb[74].mxu0  ;;  %v6602_v28 = vpop.f32.mrb[86].mxu1 }
0x1fa2   : > { %v6575_v3 = vpop.f32.mrb[75].mxu0  ;;  %v6603_v4 = vpop.f32.mrb[87].mxu1 }
0x1fa3   : > { %v5412_v1 = vadd.f32 %v6573_v22, %v6298_v30  ;;  %v6576_v5 = vadd.f32 %v6575_v3, %v6574_v12  ;;  %v6604_v6 = vadd.f32 %v6603_v4, %v6602_v28  ;;  %v6331_v4 = vld [vmem:[#allocation31] ss:$0 sm:$0xff] }
0x1fa5   : > { %v5461_v59 = vadd.f32 %v6601_v38, %v5412_v1  ;;  %v5415_v60 = vadd.f32 %v6576_v5, %v6298_v30 }
0x1fa7   : > { %v5464_v61 = vadd.f32 %v6604_v6, %v5415_v60  ;;  %v6577_v31 = vpop.f32.mrb[76].mxu0  ;;  %v6605_v11 = vpop.f32.mrb[88].mxu1  ;;  %v5475_v35 = vadd.f32 %v5461_v59, %v9424_v51  ;;  %v6332_v60 = vld [vmem:[#allocation32] ss:$0 sm:$0xff] }
0x1fa8   : > { %v6578_v46 = vpop.f32.mrb[77].mxu0  ;;  %v6606_v33 = vpop.f32.mrb[89].mxu1 }
0x1fa9   : > { %v6579_v13 = vadd.f32 %v6578_v46, %v6577_v31  ;;  %v6607_v56 = vadd.f32 %v6606_v33, %v6605_v11  ;;  %v6608_v7 = vpop.f32.mrb[90].mxu1  ;;  %5481 = vadd.xlane.f32.xlu0 %v5475_v35  ;;  %v6580_v17 = vpop.f32.mrb[78].mxu0  ;;  %v5476_v18 = vadd.f32 %v5464_v61, %v9427_v21 }
0x1faa   : > { %v6581_v27 = vpop.f32.mrb[79].mxu0  ;;  %v6609_v34 = vpop.f32.mrb[91].mxu1 }
0x1fab   : > { %v5420_v40 = vadd.f32 %v6579_v13, %v6298_v30  ;;  %v6582_v16 = vadd.f32 %v6581_v27, %v6580_v17  ;;  %v6610_v20 = vadd.f32 %v6609_v34, %v6608_v7  ;;  %5483 = vadd.xlane.f32.xlu1 %v5476_v18 }
0x1fad   : > { %v5469_v8 = vadd.f32 %v6607_v56, %v5420_v40  ;;  %v5423_v45 = vadd.f32 %v6582_v16, %v6298_v30  ;;  %v6333_v40 = vld [vmem:[#allocation35] ss:$0 sm:$0xff] }
0x1faf   : > { %v5472_v23 = vadd.f32 %v6610_v20, %v5423_v45  ;;  %v5477_v51 = vadd.f32 %v5469_v8, %v9431_v52 }
0x1fb1   : > { %5485 = vadd.xlane.f32.xlu0 %v5477_v51  ;;  %v5478_v9 = vadd.f32 %v5472_v23, %v9435_v44 }
0x1fb3   : > { %5487 = vadd.xlane.f32.xlu1 %v5478_v9 }
0x2036   : > { %v5482_v2 = vpop.xlane.xlu0 %5481 }
0x2037   : > { %v5489_v49 = vmul.f32 0.0078125, %v5482_v2 }
0x2038   : > { %v5484_v24 = vpop.xlane.xlu1 %5483 }
0x2039   : > { %v5493_v10 = vsub.f32 %v5475_v35, %v5489_v49  ;;  %v5490_v21 = vmul.f32 0.0078125, %v5484_v24 }
0x203b   : > { %v5494_v25 = vsub.f32 %v5476_v18, %v5490_v21  ;;  %v5497_v55 = vmul.f32 %v5493_v10, %v5493_v10 }
0x203d   : > { %5501 = vadd.xlane.f32.xlu0 %v5497_v55  ;;  %v5498_v26 = vmul.f32 %v5494_v25, %v5494_v25 }
0x203e   : > { %v5486_v39 = vpop.xlane.xlu0 %5485 }
0x203f   : > { %v5491_v42 = vmul.f32 0.0078125, %v5486_v39  ;;  %5503 = vadd.xlane.f32.xlu1 %v5498_v26 }
0x2040   : > { %v5488_v43 = vpop.xlane.xlu1 %5487 }
0x2041   : > { %v5495_v41 = vsub.f32 %v5477_v51, %v5491_v42  ;;  %v5492_v47 = vmul.f32 0.0078125, %v5488_v43 }
0x2043   : > { %v5496_v52 = vsub.f32 %v5478_v9, %v5492_v47  ;;  %v5499_v48 = vmul.f32 %v5495_v41, %v5495_v41 }
0x2045   : > { %5505 = vadd.xlane.f32.xlu0 %v5499_v48  ;;  %v5500_v44 = vmul.f32 %v5496_v52, %v5496_v52 }
0x2047   : > { %5507 = vadd.xlane.f32.xlu1 %v5500_v44 }
0x20ca   : > { %v5502_v15 = vpop.xlane.xlu0 %5501 }
0x20cb   : > { %v5509_v57 = vmul.f32 0.0078125, %v5502_v15 }
0x20cc   : > { %v5504_v19 = vpop.xlane.xlu1 %5503 }
0x20cd   : > { %v5513_v53 = vadd.f32 1e-05, %v5509_v57  ;;  %v5510_v63 = vmul.f32 0.0078125, %v5504_v19 }
0x20cf   : > { %7580 = vrsqrt.f32 %v5513_v53  ;;  %v5514_v30 = vadd.f32 1e-05, %v5510_v63 }
0x20d1   : > { %7582 = vrsqrt.f32 %v5514_v30 }
0x20d2   : > { %v5506_v0 = vpop.xlane.xlu0 %5505 }
0x20d3   : > { %v5511_v62 = vmul.f32 0.0078125, %v5506_v0 }
0x20d4   : > { %v5508_v22 = vpop.xlane.xlu1 %5507 }
0x20d5   : > { %v5515_v38 = vadd.f32 1e-05, %v5511_v62  ;;  %v5512_v12 = vmul.f32 0.0078125, %v5508_v22 }
0x20d7   : > { %7584 = vrsqrt.f32 %v5515_v38  ;;  %v5516_v28 = vadd.f32 1e-05, %v5512_v12 }
0x20d9   : > { %v7581_v3 = vpop.eup %7580  ;;  %7586 = vrsqrt.f32 %v5516_v28 }
0x20da   : > { %v5521_v1 = vmul.f32 %v7581_v3, %v5493_v10 }
0x20db   : > { %v7583_v5 = vpop.eup %7582 }
0x20dc   : > { %v5522_v6 = vmul.f32 %v7583_v5, %v5494_v25  ;;  %v5531_v59 = vmul.f32 %v6331_v4, %v5521_v1 }
0x20de   : > { %v5532_v61 = vmul.f32 %v6331_v4, %v5522_v6  ;;  %v5541_v31 = vadd.f32 %v6332_v60, %v5531_v59 }
0x20e0   : > { %v5542_v11 = vadd.f32 %v6332_v60, %v5532_v61 }
0x20e1   : > { %v7585_v35 = vpop.eup %7584 }
0x20e2   : > { %v5523_v46 = vmul.f32 %v7585_v35, %v5495_v41  ;;  %v5545_v33 = vpack.c.bf16 %v5542_v11, %v5541_v31 }
0x20e3   : > { %v7587_v13 = vpop.eup %7586 }
0x20e4   : > { %v5524_v56 = vmul.f32 %v7587_v13, %v5496_v52  ;;  %6825 = vmatprep.mubr.bf16.mxu0 %v5545_v33  ;;  %v5533_v7 = vmul.f32 %v6331_v4, %v5523_v46 }
0x20e6   : > { %v5534_v17 = vmul.f32 %v6331_v4, %v5524_v56  ;;  %v5543_v18 = vadd.f32 %v6332_v60, %v5533_v7 }
0x20e8   : > { %v5544_v27 = vadd.f32 %v6332_v60, %v5534_v17 }
0x20ea   : > { %v5546_v34 = vpack.c.bf16 %v5544_v27, %v5543_v18 }
0x20ec   : > { %6826 = vmatmul.mubr.bf16.vlgmr.msra.gmra.mrb[80].mxu0 %v5546_v34 }
0x21bf   : > { %v6827_v16 = vpop.f32.mrb[80].mxu0 }
0x21c0   : > { %v5661_v20 = vadd.f32 %v6827_v16, %v6333_v40  ;;  %v5652_v8 = vpop.f32.mrb[81].mxu0 }
0x21c1   : > { %v5653_v45 = vadd.f32 %v6333_v40, %v5652_v8  ;;  %v6828_v23 = vpop.f32.mrb[82].mxu0 }
0x21c2   : > { %5669 = vst [vmem:[%s996_s0 + $0x10] sm:$0xff] %v5661_v20  ;;  %v5664_v51 = vadd.f32 %v6828_v23, %v6333_v40  ;;  %v5655_v9 = vpop.f32.mrb[83].mxu0 }
0x21c3   : > { %5667 = vst [vmem:[%s996_s0] sm:$0xff] %v5653_v45  ;;  %v5656_v2 = vadd.f32 %v6333_v40, %v5655_v9 }
0x21c4   : > { %5670 = vst [vmem:[%s996_s0 + $0x18] sm:$0xff] %v5664_v51 }
0x21c5   : > { %5668 = vst [vmem:[%s996_s0 + $0x8] sm:$0xff] %v5656_v2 }
0x21c6   : > { %8219 = shalt.err (!%p8216_p9)
}
0x21c7   : > { %s8220_s20 = scalar_lea.hbm %s9481_s23, 512  ;;  %s8224_s7 = scalar_lea.hbm %s9679_s4, 1024 }
0x21c8   : > { %p8221_p4 = scmp.ne.s32.totalorder %s9481_s23, %s8220_s20  ;;  %p8225_p2 = scmp.lt.u32.totalorder %s9481_s23, %s9679_s4 }
0x21c9   : > { %p8226_p6 = scmp.lt.u32.totalorder %s8224_s7, %s8220_s20  ;;  %p8228_p10 = scmp.lt.u32.totalorder %s8220_s20, %s9481_s23 }
0x21ca   : > { %p8222_p3 = pnand %p8221_p4, %p9680_p1 }
0x21cb   : > { %p8227_p5 = por %p8226_p6, %p8225_p2 }
0x21cc   : > { %p8223_p0 = pneg %p8222_p3 }
0x21cd   : > { %p8229_p11 = por %p8228_p10, %p8227_p5 }
0x21cf   : > { %p8230_p12 = pnand %p8229_p11, %p8223_p0 }
0x21d1   : > { %8233 = shalt.err (!%p8230_p12)
}
0x21d2   : > { %s8353_s13 = smov 128   ;;  %s8354_s28 = smov 8  }
0x21d3   : > { %6915 = dma.vmem_to_hbm [thread:$0]  (%p9680_p1), %s9476_s24, 512, %s9481_s23, %s5672_s6, %s8353_s13, %s8353_s13, %s8354_s28  }
0x21d4 PF: > { %s9681_s17 = sld [smem:[#allocation51_spill]]  ;;  %s9682_s0 = sld [smem:[#allocation54_spill]] }
0x21d5   : > { %p9683_p13 = scmp.ne.s32.totalorder %s9643_s22, 0 }
0x21da   : > { %s5700_s3 = sand.u32 1, %s9681_s17   ;;  %p9684_p8 = scmp.ge.s32.totalorder %s9682_s0, 2 }
0x21db   : > { %s5701_s20 = scalar_lea.sflag [#allocation4], %s5700_s3 }
0x21dc   : > { %p6986_p7 = pnand %p9684_p8, %p9683_p13 }
0x21de   : > { %8299 = dma.done.wait (!%p6986_p7), %s5701_s20, 512  }
0x21df   : > { %8301 = vsyncadd (!%p6986_p7), %s5701_s20, 4294966784  ;;  %s9685_s3 = sld [smem:[#allocation52_spill]]  ;;  %s9686_s28 = sld [smem:[#allocation53_spill]] }
0x21e0   : > { %p46_p9 = scmp.ge.s32.totalorder %s8960_s5, 4   ;;  %s9687_s29 = smov %s8971_s26 }
0x21e1   : > { %s9688_s30 = smov %s8960_s5 }
0x21e2   :  { %48 = sbr.rel (!%p46_p9) target bundleno = 34 (0x22), region = 261 }
0x21e9   :  { %5706 = vsyncpa [#allocation3], 1 }
0x21ea   :  { %5708 = vsyncpa [#allocation3 + $0x1], 1 }
0x21eb   :  { %5709 = vsyncpa [#allocation6], 1 }
0x21ec   :  { %5710 = vsyncpa [#allocation9], 1 }
0x21ed   :  { %5711 = vsyncpa [#allocation12], 1 }
0x21ee   :  { %5712 = vsyncpa [#allocation15], 1 }
0x21ef   :  { %5713 = vsyncpa [#allocation18], 1 }
0x21f0   :  { %5714 = vsyncpa [#allocation21], 1 }
0x21f1   :  { %5715 = vsyncpa [#allocation24], 1 }
0x21f2   :  { %5716 = vsyncpa [#allocation27], 1 }
0x21f3   :  { %5717 = vsyncpa [#allocation30], 1 }
0x21f4   :  { %5718 = vsyncpa [#allocation33], 1 }
0x21f5   :  { %5719 = vsyncpa [#allocation36], 1 }
0x21f6   :  { %5720 = vsyncpa [#allocation4], 1 }
0x21f7   :  { %5722 = vsyncpa [#allocation4 + $0x1], 1 }

</bundles_post_ra>
